<compile_context>
chip_gen: v6e
topology: v6e:2x2x1
jax: 0.10.0
libtpu: 0.0.40
codegen_flags: <defaults>
</compile_context>

<pallas_src>
import jax
import jax.numpy as jnp
from jax.experimental import pallas as pl
from jax.experimental.pallas import tpu as pltpu

CHNS = [64, 192, 384, 256, 256]   # LPIPS 'alex' channel counts
_MAX_P_TILE = 1024                # multiple of 16 (bf16 sublane packing)


def _cdiv(a, b):
    return -(-a // b)


# ----------------------- Pallas kernel: LPIPS head ---------------------------
def _make_lpips_level_kernel(inv_p, tile_p, n_pt_ps, true_p, needs_mask):
    """One LPIPS level via the d^2 expansion + MXU channel reductions.

    Per pixel p (reference semantics: f_hat = f / (||f|| + eps)):
        sum_c w_c (fr_hat - fx_hat)^2
          = A*ir^2 - 2*B*ir*ix + C*ix^2
    with A = sum_c w fr^2, B = sum_c w fr fx, C = sum_c w fx^2,
         ir = 1/(||fr||+eps), ix = 1/(||fx||+eps).
    The five channel sums come from three (tile_p, C) @ (C, 2) MXU dots against
    RHS = [ones | w]; only three bf16 elementwise products stay on the VPU.
    Accumulation is f32 (MXU preferred_element_type); cancellation when
    fr_hat ~= fx_hat is below the bf16 feature-cast noise already accepted.
    """
    def kernel(r_ref, f_ref, out_ref, acc_ref):
        j = pl.program_id(2)
        fr = f_ref[0]                               # (tile_p, C) bf16  (ref)
        fx = f_ref[1]                               # (tile_p, C) bf16  (x)
        red = r_ref[...]                            # (C, 2) bf16: [ones | w]
        rr = jnp.dot(fr * fr, red, preferred_element_type=jnp.float32)
        xx = jnp.dot(fx * fx, red, preferred_element_type=jnp.float32)
        cc = jnp.dot(fr * fx, red, preferred_element_type=jnp.float32)
        eps = 1e-10
        inv_r = pl.reciprocal(jnp.sqrt(rr[:, 0:1]) + eps, approx=True)  # EUP
        inv_x = pl.reciprocal(jnp.sqrt(xx[:, 0:1]) + eps, approx=True)
        term = (rr[:, 1:2] * (inv_r * inv_r)
                - 2.0 * cc[:, 1:2] * (inv_r * inv_x)
                + xx[:, 1:2] * (inv_x * inv_x))     # (tile_p, 1) f32

        if needs_mask:
            # Partial / fully-out-of-range P tiles contribute exactly 0; the
            # final mean divides by the true (unpadded) P.
            s = pl.program_id(0)
            start = (s * n_pt_ps + j) * tile_p
            row = jax.lax.broadcasted_iota(jnp.int32, (tile_p, 1), 0)
            term = jnp.where(row + start < true_p, term, 0.0)

        @pl.when(j == 0)
        def _():
            acc_ref[...] = term

        @pl.when(j > 0)
        def _():
            acc_ref[...] = acc_ref[...] + term

        @pl.when(j == pl.num_programs(2) - 1)
        def _():
            total = jnp.sum(acc_ref[...], axis=0, keepdims=True)   # (1, 1)
            out_ref[...] = (total * inv_p).reshape(1, 1, 1, 1)     # spatial avg

    return kernel


def lpips_level(feats, w):
    """feats: (2N, P, C) bf16, interleaved batch (row 2i = ref_i, 2i+1 = x_i).
    w: (C,) f32 NetLinLayer 1x1-conv weight.  Returns (N, 1, 1, 1) f32."""
    two_n, p, c = feats.shape
    n = two_n // 2
    tile_p = p if p <= _MAX_P_TILE else _MAX_P_TILE   # full dim or 16-aligned
    n_pt = _cdiv(p, tile_p)
    # Split the reduction (P-tile) range over two "parallel" programs when the
    # batch axis alone cannot feed both v7x TensorCores; partials are summed in
    # the wrapper (cheap).  On 1-TC chips this is just two outer iterations.
    n_splits = 2 if (n == 1 and n_pt >= 2) else 1
    n_pt_ps = _cdiv(n_pt, n_splits)
    needs_mask = (n_splits * n_pt_ps * tile_p) != p

    rhs = jnp.concatenate(
        [jnp.ones((c, 1), jnp.float32), w.reshape(c, 1).astype(jnp.float32)],
        axis=1).astype(jnp.bfloat16)                  # (C, 2): [ones | w]

    # 2 pipeline buffers of the (2, tile_p, C) bf16 block + 3 bf16 products
    # + f32 dot outputs / padded scratch.
    est = 16 * tile_p * c + 1024 * tile_p
    vmem_limit = int(min(32 << 20, max(16 << 20, 2 * est)))

    out = pl.pallas_call(
        _make_lpips_level_kernel(1.0 / p, tile_p, n_pt_ps, p, needs_mask),
        out_shape=jax.ShapeDtypeStruct((n_splits, n, 1, 1), jnp.float32),
        grid=(n_splits, n, n_pt_ps),
        in_specs=[
            pl.BlockSpec((c, 2), lambda s, ni, j: (0, 0)),
            # One block carries the (ref_i, x_i) pair: rows 2*ni and 2*ni+1.
            pl.BlockSpec((2, tile_p, c),
                         lambda s, ni, j: (ni, s * n_pt_ps + j, 0)),
        ],
        out_specs=pl.BlockSpec((1, 1, 1, 1), lambda s, ni, j: (s, ni, 0, 0)),
        scratch_shapes=[pltpu.VMEM((tile_p, 1), jnp.float32)],
        compiler_params=pltpu.CompilerParams(
            dimension_semantics=("parallel", "parallel", "arbitrary"),
            vmem_limit_bytes=vmem_limit),
    )(rhs, feats)
    return jnp.sum(out, axis=0).reshape(n, 1, 1, 1)   # sum split partials


def lpips_head(feats, lin_ws):
    """feats: list of (2N, H, W, C) bf16 interleaved feature maps.
    Returns list of per-level LPIPS terms, each (N, 1, 1, 1) f32."""
    # TODO(synk): the C=64 relu1 level runs at 50% lane utilization; a
    # two-pixels-per-row repack (P,64)->(P/2,128) needs P even (host pad), so
    # it is skipped here to keep the head copy-free.
    res = []
    for f, w in zip(feats, lin_ws):
        two_n, h, wd, c = f.shape
        res.append(lpips_level(f.reshape(two_n, h * wd, c), w))   # free reshape
    return res


# ----------------------- backbone (plain-JAX glue, NHWC, bf16) ----------------
def _conv_bf16(x, w, b, stride=1, padding=0):
    # bf16 conv with f32 accumulation; bias + relu + bf16 downcast fuse into the
    # conv epilogue, so only bf16 activations ever touch HBM.
    y = jax.lax.conv_general_dilated(
        x, w.astype(jnp.bfloat16),
        window_strides=(stride, stride),
        padding=[(padding, padding), (padding, padding)],
        dimension_numbers=("NHWC", "HWIO", "NHWC"),
        preferred_element_type=jnp.float32)
    return jax.nn.relu(y + b).astype(jnp.bfloat16)


def _maxpool(x, k=3, s=2):
    return jax.lax.reduce_window(
        x, jnp.array(-jnp.inf, dtype=x.dtype), jax.lax.max,
        window_dimensions=(1, k, k, 1),
        window_strides=(1, s, s, 1), padding="VALID")


def alexnet_features(x, params):
    """torchvision AlexNet .features, sliced like lpips pretrained_networks.alexnet."""
    h = _conv_bf16(x, params["c1_w"], params["c1_b"], stride=4, padding=2)
    relu1 = h
    h = _maxpool(h)
    h = _conv_bf16(h, params["c2_w"], params["c2_b"], stride=1, padding=2)
    relu2 = h
    h = _maxpool(h)
    h = _conv_bf16(h, params["c3_w"], params["c3_b"], stride=1, padding=1)
    relu3 = h
    h = _conv_bf16(h, params["c4_w"], params["c4_b"], stride=1, padding=1)
    relu4 = h
    h = _conv_bf16(h, params["c5_w"], params["c5_b"], stride=1, padding=1)
    relu5 = h
    return [relu1, relu2, relu3, relu4, relu5]


# ----------------------- deterministic parameter init ------------------------
def init_params(key):
    # TODO(synk): pretrained ImageNet AlexNet weights cannot be loaded here;
    # shapes match torchvision alexnet.features (HWIO layout), values synthetic.
    conv_shapes = {
        "c1": (11, 11, 3, 64),
        "c2": (5, 5, 64, 192),
        "c3": (3, 3, 192, 384),
        "c4": (3, 3, 384, 256),
        "c5": (3, 3, 256, 256),
    }
    params = {}
    keys = jax.random.split(key, 2 * len(conv_shapes) + len(CHNS))
    ki = 0
    for name, shp in conv_shapes.items():
        fan_in = shp[0] * shp[1] * shp[2]
        params[name + "_w"] = (jax.random.normal(keys[ki], shp, jnp.float32)
                               * (2.0 / fan_in) ** 0.5)
        ki += 1
        params[name + "_b"] = jax.random.normal(keys[ki], (shp[3],), jnp.float32) * 0.01
        ki += 1
    # NetLinLayer weights: torch shape (1, C, 1, 1), bias=False; stored as (C,)
    lins = []
    for c in CHNS:
        lins.append(jax.random.uniform(keys[ki], (c,), jnp.float32))
        ki += 1
    params["lins"] = lins
    return params


# ----------------------- LPIPSsinglewRef.forward -----------------------------
def _prep_batch(ref, x, normalize):
    """NCHW ref/x -> one interleaved bf16 NHWC batch (row 2i = ref_i, 2i+1 = x_i).
    One backbone pass doubles conv batch (MXU occupancy) and keeps each (ref, x)
    pair adjacent so the head reads both with a single (2, tile_p, C) block."""
    if normalize:
        ref = 2 * ref - 1
        x = 2 * x - 1
    ref = jnp.transpose(ref, (0, 2, 3, 1))   # tiny 3-channel transpose only
    x = jnp.transpose(x, (0, 2, 3, 1))
    n = ref.shape[0]
    both = jnp.stack([ref, x], axis=1).reshape((2 * n,) + ref.shape[1:])
    return both.astype(jnp.bfloat16)


def lpips_single_w_ref(params, ref, x, normalize=False):
    # ref, x: NCHW images (PyTorch convention).  nn.Dropout before each 1x1
    # conv is identity in eval mode; omitted.
    both = _prep_batch(ref, x, normalize)
    feats = alexnet_features(both, params)            # list of (2N,H,W,C) bf16
    res = lpips_head(feats, params["lins"])           # each (N, 1, 1, 1) f32
    val = res[0]
    for l in range(1, len(res)):
        val = val + res[l]
    val = jnp.squeeze(jnp.squeeze(val, -1), -1)       # (N, 1)
    return val, res


# ----------------------- plain-JAX reference for the head (check only) -------
def _lpips_head_ref(feats, lins):
    res = []
    for f, w in zip(feats, lins):
        f = f.astype(jnp.float32)
        fr, fx = f[0::2], f[1::2]

        def unit(t):
            nrm = jnp.sqrt(jnp.sum(t * t, axis=-1, keepdims=True))
            return t / (nrm + 1e-10)

        d2 = (unit(fr) - unit(fx)) ** 2
        r = jnp.mean(jnp.sum(d2 * w, axis=-1), axis=(1, 2))
        res.append(r.reshape(-1, 1, 1, 1))
    return res


if __name__ == "__main__":
    key = jax.random.PRNGKey(0)
    kp, kr, kx = jax.random.split(key, 3)
    params = init_params(kp)
    ref = jax.random.uniform(kr, (2, 3, 64, 64), dtype=jnp.float32)
    x = jax.random.uniform(kx, (2, 3, 64, 64), dtype=jnp.float32)

    fwd = jax.jit(lambda p, r, xx: lpips_single_w_ref(p, r, xx, normalize=False))
    val, res = fwd(params, ref, x)
    jax.block_until_ready(val)

    assert val.shape == (2, 1), val.shape
    assert len(res) == len(CHNS)
    assert all(r.shape == (2, 1, 1, 1) for r in res)
    assert bool(jnp.all(jnp.isfinite(val)))

    # Light numerical check: Pallas head vs plain-JAX f32 math on the same
    # bf16 features (bounds the bf16-product / approx-reciprocal error).
    both = _prep_batch(ref, x, normalize=False)
    feats = alexnet_features(both, params)
    ref_res = _lpips_head_ref(feats, params["lins"])
    for r_pallas, r_plain in zip(res, ref_res):
        err = jnp.max(jnp.abs(r_pallas - r_plain) / (jnp.abs(r_plain) + 1e-6))
        assert float(err) < 0.1, float(err)

    print("KERNEL_OK")
</pallas_src>

<mosaic_0001>
module attributes {stable_mosaic.version = 11 : i64} {
  func.func @kernel(%arg0: i32, %arg1: i32, %arg2: i32, %arg3: memref<256x2xbf16, #tpu.memory_space<vmem>>, %arg4: memref<2x9x256xbf16, #tpu.memory_space<vmem>>, %arg5: memref<1x1x1x1xf32, #tpu.memory_space<vmem>>, %arg6: memref<9x1xf32, #tpu.memory_space<vmem>>) attributes {dimension_semantics = [#tpu.dimension_semantics<parallel>, #tpu.dimension_semantics<parallel>, #tpu.dimension_semantics<arbitrary>], iteration_bounds = array<i64: 1, 2, 1>, scalar_prefetch = 0 : i64, scratch_operands = 1 : i64, tpu.core_type = #tpu.core_type<tc>, window_params = [{pipeline_mode = #tpu.pipeline_mode<synchronous>, transform_indices = @transform_0, window_bounds = array<i64: 256, 2>}, {transform_indices = @transform_1, window_bounds = array<i64: 2, 9, 256>}, {transform_indices = @transform_2, window_bounds = array<i64: 1, 1, 1, 1>}]} {
    %c0 = arith.constant 0 : index
    %c0_0 = arith.constant 0 : index
    %c0_1 = arith.constant 0 : index
    %0 = vector.load %arg4[%c0, %c0_0, %c0_1] : memref<2x9x256xbf16, #tpu.memory_space<vmem>>, vector<1x9x256xbf16>
    %1 = vector.shape_cast %0 : vector<1x9x256xbf16> to vector<9x256xbf16>
    %c1 = arith.constant 1 : index
    %c0_2 = arith.constant 0 : index
    %c0_3 = arith.constant 0 : index
    %2 = vector.load %arg4[%c1, %c0_2, %c0_3] : memref<2x9x256xbf16, #tpu.memory_space<vmem>>, vector<1x9x256xbf16>
    %3 = vector.shape_cast %2 : vector<1x9x256xbf16> to vector<9x256xbf16>
    %c0_4 = arith.constant 0 : index
    %c0_5 = arith.constant 0 : index
    %4 = vector.load %arg3[%c0_4, %c0_5] : memref<256x2xbf16, #tpu.memory_space<vmem>>, vector<256x2xbf16>
    %5 = arith.mulf %1, %1 : vector<9x256xbf16>
    %cst = arith.constant dense<0.000000e+00> : vector<9x2xf32>
    %6 = tpu.matmul %5, %4, %cst {dimension_numbers = #tpu.dot_dimension_numbers<[1], [0], [0], [1], [0, 0, 1, 1], [], []>} : vector<9x256xbf16>, vector<256x2xbf16>, vector<9x2xf32> -> vector<9x2xf32>
    %7 = arith.mulf %3, %3 : vector<9x256xbf16>
    %cst_6 = arith.constant dense<0.000000e+00> : vector<9x2xf32>
    %8 = tpu.matmul %7, %4, %cst_6 {dimension_numbers = #tpu.dot_dimension_numbers<[1], [0], [0], [1], [0, 0, 1, 1], [], []>} : vector<9x256xbf16>, vector<256x2xbf16>, vector<9x2xf32> -> vector<9x2xf32>
    %9 = arith.mulf %1, %3 : vector<9x256xbf16>
    %cst_7 = arith.constant dense<0.000000e+00> : vector<9x2xf32>
    %10 = tpu.matmul %9, %4, %cst_7 {dimension_numbers = #tpu.dot_dimension_numbers<[1], [0], [0], [1], [0, 0, 1, 1], [], []>} : vector<9x256xbf16>, vector<256x2xbf16>, vector<9x2xf32> -> vector<9x2xf32>
    %11 = vector.extract_strided_slice %6 {offsets = [0, 0], sizes = [9, 1], strides = [1, 1]} : vector<9x2xf32> to vector<9x1xf32>
    %12 = math.sqrt %11 : vector<9x1xf32>
    %cst_8 = arith.constant 1.000000e-10 : f32
    %13 = vector.broadcast %cst_8 : f32 to vector<9x1xf32>
    %14 = arith.addf %12, %13 : vector<9x1xf32>
    %15 = tpu.reciprocal %14 {approx = true} : vector<9x1xf32> -> vector<9x1xf32>
    %16 = vector.extract_strided_slice %8 {offsets = [0, 0], sizes = [9, 1], strides = [1, 1]} : vector<9x2xf32> to vector<9x1xf32>
    %17 = math.sqrt %16 : vector<9x1xf32>
    %cst_9 = arith.constant 1.000000e-10 : f32
    %18 = vector.broadcast %cst_9 : f32 to vector<9x1xf32>
    %19 = arith.addf %17, %18 : vector<9x1xf32>
    %20 = tpu.reciprocal %19 {approx = true} : vector<9x1xf32> -> vector<9x1xf32>
    %21 = vector.extract_strided_slice %6 {offsets = [0, 1], sizes = [9, 1], strides = [1, 1]} : vector<9x2xf32> to vector<9x1xf32>
    %22 = arith.mulf %15, %15 : vector<9x1xf32>
    %23 = arith.mulf %21, %22 : vector<9x1xf32>
    %24 = vector.extract_strided_slice %10 {offsets = [0, 1], sizes = [9, 1], strides = [1, 1]} : vector<9x2xf32> to vector<9x1xf32>
    %cst_10 = arith.constant 2.000000e+00 : f32
    %25 = vector.broadcast %cst_10 : f32 to vector<9x1xf32>
    %26 = arith.mulf %25, %24 : vector<9x1xf32>
    %27 = arith.mulf %15, %20 : vector<9x1xf32>
    %28 = arith.mulf %26, %27 : vector<9x1xf32>
    %29 = arith.subf %23, %28 : vector<9x1xf32>
    %30 = vector.extract_strided_slice %8 {offsets = [0, 1], sizes = [9, 1], strides = [1, 1]} : vector<9x2xf32> to vector<9x1xf32>
    %31 = arith.mulf %20, %20 : vector<9x1xf32>
    %32 = arith.mulf %30, %31 : vector<9x1xf32>
    %33 = arith.addf %29, %32 : vector<9x1xf32>
    %c0_i32 = arith.constant 0 : i32
    %34 = arith.cmpi eq, %arg2, %c0_i32 : i32
    %35 = arith.extui %34 : i1 to i32
    %c0_i32_11 = arith.constant 0 : i32
    %36 = arith.cmpi ne, %35, %c0_i32_11 : i32
    scf.if %36 {
      %c0_16 = arith.constant 0 : index
      %c0_17 = arith.constant 0 : index
      %43 = vector.load %arg6[%c0_16, %c0_17] : memref<9x1xf32, #tpu.memory_space<vmem>>, vector<9x1xf32>
      tpu.vector_store %arg6[%c0_16, %c0_17], %33 {strides = array<i32>} : memref<9x1xf32, #tpu.memory_space<vmem>>, vector<9x1xf32>,
    } else {
    }
    %c0_i32_12 = arith.constant 0 : i32
    %37 = arith.cmpi sgt, %arg2, %c0_i32_12 : i32
    %38 = arith.extui %37 : i1 to i32
    %c0_i32_13 = arith.constant 0 : i32
    %39 = arith.cmpi ne, %38, %c0_i32_13 : i32
    scf.if %39 {
      %c0_16 = arith.constant 0 : index
      %c0_17 = arith.constant 0 : index
      %43 = vector.load %arg6[%c0_16, %c0_17] : memref<9x1xf32, #tpu.memory_space<vmem>>, vector<9x1xf32>
      %44 = arith.addf %43, %33 : vector<9x1xf32>
      %c0_18 = arith.constant 0 : index
      %c0_19 = arith.constant 0 : index
      %45 = vector.load %arg6[%c0_18, %c0_19] : memref<9x1xf32, #tpu.memory_space<vmem>>, vector<9x1xf32>
      tpu.vector_store %arg6[%c0_18, %c0_19], %44 {strides = array<i32>} : memref<9x1xf32, #tpu.memory_space<vmem>>, vector<9x1xf32>,
    } else {
    }
    %c0_i32_14 = arith.constant 0 : i32
    %40 = arith.cmpi eq, %arg2, %c0_i32_14 : i32
    %41 = arith.extui %40 : i1 to i32
    %c0_i32_15 = arith.constant 0 : i32
    %42 = arith.cmpi ne, %41, %c0_i32_15 : i32
    scf.if %42 {
      %c0_16 = arith.constant 0 : index
      %c0_17 = arith.constant 0 : index
      %43 = vector.load %arg6[%c0_16, %c0_17] : memref<9x1xf32, #tpu.memory_space<vmem>>, vector<9x1xf32>
      %cst_18 = arith.constant dense<0.000000e+00> : vector<1xf32>
      %44 = vector.multi_reduction <add>, %43, %cst_18 [0] : vector<9x1xf32> to vector<1xf32>
      %45 = vector.shape_cast %44 : vector<1xf32> to vector<1x1xf32>
      %cst_19 = arith.constant 0.111111112 : f32
      %46 = vector.broadcast %cst_19 : f32 to vector<1x1xf32>
      %47 = arith.mulf %45, %46 : vector<1x1xf32>
      %48 = vector.shape_cast %47 : vector<1x1xf32> to vector<1x1x1x1xf32>
      %c0_20 = arith.constant 0 : index
      %c0_21 = arith.constant 0 : index
      %c0_22 = arith.constant 0 : index
      %c0_23 = arith.constant 0 : index
      %49 = vector.load %arg5[%c0_20, %c0_21, %c0_22, %c0_23] : memref<1x1x1x1xf32, #tpu.memory_space<vmem>>, vector<1x1x1x1xf32>
      tpu.vector_store %arg5[%c0_20, %c0_21, %c0_22, %c0_23], %48 {strides = array<i32>} : memref<1x1x1x1xf32, #tpu.memory_space<vmem>>, vector<1x1x1x1xf32>,
    } else {
    }
    return
  }
  func.func @transform_0(%arg0: i32, %arg1: i32, %arg2: i32) -> (i32, i32) {
    %c0_i32 = arith.constant 0 : i32
    %c0_i32_0 = arith.constant 0 : i32
    %c0_i32_1 = arith.constant 0 : i32
    return %c0_i32, %c0_i32_0 : i32, i32
  }
  func.func @transform_1(%arg0: i32, %arg1: i32, %arg2: i32) -> (i32, i32, i32) {
    %c1_i32 = arith.constant 1 : i32
    %0 = arith.muli %arg0, %c1_i32 : i32
    %1 = arith.addi %0, %arg2 : i32
    %c0_i32 = arith.constant 0 : i32
    %c0_i32_0 = arith.constant 0 : i32
    return %arg1, %1, %c0_i32 : i32, i32, i32
  }
  func.func @transform_2(%arg0: i32, %arg1: i32, %arg2: i32) -> (i32, i32, i32, i32) {
    %c0_i32 = arith.constant 0 : i32
    %c0_i32_0 = arith.constant 0 : i32
    %c0_i32_1 = arith.constant 0 : i32
    return %arg0, %arg1, %c0_i32, %c0_i32_0 : i32, i32, i32, i32
  }
}

module attributes {stable_mosaic.version = 11 : i64} {
  func.func @kernel(%arg0: i32, %arg1: i32, %arg2: i32, %arg3: memref<384x2xbf16, #tpu.memory_space<vmem>>, %arg4: memref<2x9x384xbf16, #tpu.memory_space<vmem>>, %arg5: memref<1x1x1x1xf32, #tpu.memory_space<vmem>>, %arg6: memref<9x1xf32, #tpu.memory_space<vmem>>) attributes {dimension_semantics = [#tpu.dimension_semantics<parallel>, #tpu.dimension_semantics<parallel>, #tpu.dimension_semantics<arbitrary>], iteration_bounds = array<i64: 1, 2, 1>, scalar_prefetch = 0 : i64, scratch_operands = 1 : i64, tpu.core_type = #tpu.core_type<tc>, window_params = [{pipeline_mode = #tpu.pipeline_mode<synchronous>, transform_indices = @transform_0, window_bounds = array<i64: 384, 2>}, {transform_indices = @transform_1, window_bounds = array<i64: 2, 9, 384>}, {transform_indices = @transform_2, window_bounds = array<i64: 1, 1, 1, 1>}]} {
    %c0 = arith.constant 0 : index
    %c0_0 = arith.constant 0 : index
    %c0_1 = arith.constant 0 : index
    %0 = vector.load %arg4[%c0, %c0_0, %c0_1] : memref<2x9x384xbf16, #tpu.memory_space<vmem>>, vector<1x9x384xbf16>
    %1 = vector.shape_cast %0 : vector<1x9x384xbf16> to vector<9x384xbf16>
    %c1 = arith.constant 1 : index
    %c0_2 = arith.constant 0 : index
    %c0_3 = arith.constant 0 : index
    %2 = vector.load %arg4[%c1, %c0_2, %c0_3] : memref<2x9x384xbf16, #tpu.memory_space<vmem>>, vector<1x9x384xbf16>
    %3 = vector.shape_cast %2 : vector<1x9x384xbf16> to vector<9x384xbf16>
    %c0_4 = arith.constant 0 : index
    %c0_5 = arith.constant 0 : index
    %4 = vector.load %arg3[%c0_4, %c0_5] : memref<384x2xbf16, #tpu.memory_space<vmem>>, vector<384x2xbf16>
    %5 = arith.mulf %1, %1 : vector<9x384xbf16>
    %cst = arith.constant dense<0.000000e+00> : vector<9x2xf32>
    %6 = tpu.matmul %5, %4, %cst {dimension_numbers = #tpu.dot_dimension_numbers<[1], [0], [0], [1], [0, 0, 1, 1], [], []>} : vector<9x384xbf16>, vector<384x2xbf16>, vector<9x2xf32> -> vector<9x2xf32>
    %7 = arith.mulf %3, %3 : vector<9x384xbf16>
    %cst_6 = arith.constant dense<0.000000e+00> : vector<9x2xf32>
    %8 = tpu.matmul %7, %4, %cst_6 {dimension_numbers = #tpu.dot_dimension_numbers<[1], [0], [0], [1], [0, 0, 1, 1], [], []>} : vector<9x384xbf16>, vector<384x2xbf16>, vector<9x2xf32> -> vector<9x2xf32>
    %9 = arith.mulf %1, %3 : vector<9x384xbf16>
    %cst_7 = arith.constant dense<0.000000e+00> : vector<9x2xf32>
    %10 = tpu.matmul %9, %4, %cst_7 {dimension_numbers = #tpu.dot_dimension_numbers<[1], [0], [0], [1], [0, 0, 1, 1], [], []>} : vector<9x384xbf16>, vector<384x2xbf16>, vector<9x2xf32> -> vector<9x2xf32>
    %11 = vector.extract_strided_slice %6 {offsets = [0, 0], sizes = [9, 1], strides = [1, 1]} : vector<9x2xf32> to vector<9x1xf32>
    %12 = math.sqrt %11 : vector<9x1xf32>
    %cst_8 = arith.constant 1.000000e-10 : f32
    %13 = vector.broadcast %cst_8 : f32 to vector<9x1xf32>
    %14 = arith.addf %12, %13 : vector<9x1xf32>
    %15 = tpu.reciprocal %14 {approx = true} : vector<9x1xf32> -> vector<9x1xf32>
    %16 = vector.extract_strided_slice %8 {offsets = [0, 0], sizes = [9, 1], strides = [1, 1]} : vector<9x2xf32> to vector<9x1xf32>
    %17 = math.sqrt %16 : vector<9x1xf32>
    %cst_9 = arith.constant 1.000000e-10 : f32
    %18 = vector.broadcast %cst_9 : f32 to vector<9x1xf32>
    %19 = arith.addf %17, %18 : vector<9x1xf32>
    %20 = tpu.reciprocal %19 {approx = true} : vector<9x1xf32> -> vector<9x1xf32>
    %21 = vector.extract_strided_slice %6 {offsets = [0, 1], sizes = [9, 1], strides = [1, 1]} : vector<9x2xf32> to vector<9x1xf32>
    %22 = arith.mulf %15, %15 : vector<9x1xf32>
    %23 = arith.mulf %21, %22 : vector<9x1xf32>
    %24 = vector.extract_strided_slice %10 {offsets = [0, 1], sizes = [9, 1], strides = [1, 1]} : vector<9x2xf32> to vector<9x1xf32>
    %cst_10 = arith.constant 2.000000e+00 : f32
    %25 = vector.broadcast %cst_10 : f32 to vector<9x1xf32>
    %26 = arith.mulf %25, %24 : vector<9x1xf32>
    %27 = arith.mulf %15, %20 : vector<9x1xf32>
    %28 = arith.mulf %26, %27 : vector<9x1xf32>
    %29 = arith.subf %23, %28 : vector<9x1xf32>
    %30 = vector.extract_strided_slice %8 {offsets = [0, 1], sizes = [9, 1], strides = [1, 1]} : vector<9x2xf32> to vector<9x1xf32>
    %31 = arith.mulf %20, %20 : vector<9x1xf32>
    %32 = arith.mulf %30, %31 : vector<9x1xf32>
    %33 = arith.addf %29, %32 : vector<9x1xf32>
    %c0_i32 = arith.constant 0 : i32
    %34 = arith.cmpi eq, %arg2, %c0_i32 : i32
    %35 = arith.extui %34 : i1 to i32
    %c0_i32_11 = arith.constant 0 : i32
    %36 = arith.cmpi ne, %35, %c0_i32_11 : i32
    scf.if %36 {
      %c0_16 = arith.constant 0 : index
      %c0_17 = arith.constant 0 : index
      %43 = vector.load %arg6[%c0_16, %c0_17] : memref<9x1xf32, #tpu.memory_space<vmem>>, vector<9x1xf32>
      tpu.vector_store %arg6[%c0_16, %c0_17], %33 {strides = array<i32>} : memref<9x1xf32, #tpu.memory_space<vmem>>, vector<9x1xf32>,
    } else {
    }
    %c0_i32_12 = arith.constant 0 : i32
    %37 = arith.cmpi sgt, %arg2, %c0_i32_12 : i32
    %38 = arith.extui %37 : i1 to i32
    %c0_i32_13 = arith.constant 0 : i32
    %39 = arith.cmpi ne, %38, %c0_i32_13 : i32
    scf.if %39 {
      %c0_16 = arith.constant 0 : index
      %c0_17 = arith.constant 0 : index
      %43 = vector.load %arg6[%c0_16, %c0_17] : memref<9x1xf32, #tpu.memory_space<vmem>>, vector<9x1xf32>
      %44 = arith.addf %43, %33 : vector<9x1xf32>
      %c0_18 = arith.constant 0 : index
      %c0_19 = arith.constant 0 : index
      %45 = vector.load %arg6[%c0_18, %c0_19] : memref<9x1xf32, #tpu.memory_space<vmem>>, vector<9x1xf32>
      tpu.vector_store %arg6[%c0_18, %c0_19], %44 {strides = array<i32>} : memref<9x1xf32, #tpu.memory_space<vmem>>, vector<9x1xf32>,
    } else {
    }
    %c0_i32_14 = arith.constant 0 : i32
    %40 = arith.cmpi eq, %arg2, %c0_i32_14 : i32
    %41 = arith.extui %40 : i1 to i32
    %c0_i32_15 = arith.constant 0 : i32
    %42 = arith.cmpi ne, %41, %c0_i32_15 : i32
    scf.if %42 {
      %c0_16 = arith.constant 0 : index
      %c0_17 = arith.constant 0 : index
      %43 = vector.load %arg6[%c0_16, %c0_17] : memref<9x1xf32, #tpu.memory_space<vmem>>, vector<9x1xf32>
      %cst_18 = arith.constant dense<0.000000e+00> : vector<1xf32>
      %44 = vector.multi_reduction <add>, %43, %cst_18 [0] : vector<9x1xf32> to vector<1xf32>
      %45 = vector.shape_cast %44 : vector<1xf32> to vector<1x1xf32>
      %cst_19 = arith.constant 0.111111112 : f32
      %46 = vector.broadcast %cst_19 : f32 to vector<1x1xf32>
      %47 = arith.mulf %45, %46 : vector<1x1xf32>
      %48 = vector.shape_cast %47 : vector<1x1xf32> to vector<1x1x1x1xf32>
      %c0_20 = arith.constant 0 : index
      %c0_21 = arith.constant 0 : index
      %c0_22 = arith.constant 0 : index
      %c0_23 = arith.constant 0 : index
      %49 = vector.load %arg5[%c0_20, %c0_21, %c0_22, %c0_23] : memref<1x1x1x1xf32, #tpu.memory_space<vmem>>, vector<1x1x1x1xf32>
      tpu.vector_store %arg5[%c0_20, %c0_21, %c0_22, %c0_23], %48 {strides = array<i32>} : memref<1x1x1x1xf32, #tpu.memory_space<vmem>>, vector<1x1x1x1xf32>,
    } else {
    }
    return
  }
  func.func @transform_0(%arg0: i32, %arg1: i32, %arg2: i32) -> (i32, i32) {
    %c0_i32 = arith.constant 0 : i32
    %c0_i32_0 = arith.constant 0 : i32
    %c0_i32_1 = arith.constant 0 : i32
    return %c0_i32, %c0_i32_0 : i32, i32
  }
  func.func @transform_1(%arg0: i32, %arg1: i32, %arg2: i32) -> (i32, i32, i32) {
    %c1_i32 = arith.constant 1 : i32
    %0 = arith.muli %arg0, %c1_i32 : i32
    %1 = arith.addi %0, %arg2 : i32
    %c0_i32 = arith.constant 0 : i32
    %c0_i32_0 = arith.constant 0 : i32
    return %arg1, %1, %c0_i32 : i32, i32, i32
  }
  func.func @transform_2(%arg0: i32, %arg1: i32, %arg2: i32) -> (i32, i32, i32, i32) {
    %c0_i32 = arith.constant 0 : i32
    %c0_i32_0 = arith.constant 0 : i32
    %c0_i32_1 = arith.constant 0 : i32
    return %arg0, %arg1, %c0_i32, %c0_i32_0 : i32, i32, i32, i32
  }
}

module attributes {stable_mosaic.version = 11 : i64} {
  func.func @kernel(%arg0: i32, %arg1: i32, %arg2: i32, %arg3: memref<192x2xbf16, #tpu.memory_space<vmem>>, %arg4: memref<2x49x192xbf16, #tpu.memory_space<vmem>>, %arg5: memref<1x1x1x1xf32, #tpu.memory_space<vmem>>, %arg6: memref<49x1xf32, #tpu.memory_space<vmem>>) attributes {dimension_semantics = [#tpu.dimension_semantics<parallel>, #tpu.dimension_semantics<parallel>, #tpu.dimension_semantics<arbitrary>], iteration_bounds = array<i64: 1, 2, 1>, scalar_prefetch = 0 : i64, scratch_operands = 1 : i64, tpu.core_type = #tpu.core_type<tc>, window_params = [{pipeline_mode = #tpu.pipeline_mode<synchronous>, transform_indices = @transform_0, window_bounds = array<i64: 192, 2>}, {transform_indices = @transform_1, window_bounds = array<i64: 2, 49, 192>}, {transform_indices = @transform_2, window_bounds = array<i64: 1, 1, 1, 1>}]} {
    %c0 = arith.constant 0 : index
    %c0_0 = arith.constant 0 : index
    %c0_1 = arith.constant 0 : index
    %0 = vector.load %arg4[%c0, %c0_0, %c0_1] : memref<2x49x192xbf16, #tpu.memory_space<vmem>>, vector<1x49x192xbf16>
    %1 = vector.shape_cast %0 : vector<1x49x192xbf16> to vector<49x192xbf16>
    %c1 = arith.constant 1 : index
    %c0_2 = arith.constant 0 : index
    %c0_3 = arith.constant 0 : index
    %2 = vector.load %arg4[%c1, %c0_2, %c0_3] : memref<2x49x192xbf16, #tpu.memory_space<vmem>>, vector<1x49x192xbf16>
    %3 = vector.shape_cast %2 : vector<1x49x192xbf16> to vector<49x192xbf16>
    %c0_4 = arith.constant 0 : index
    %c0_5 = arith.constant 0 : index
    %4 = vector.load %arg3[%c0_4, %c0_5] : memref<192x2xbf16, #tpu.memory_space<vmem>>, vector<192x2xbf16>
    %5 = arith.mulf %1, %1 : vector<49x192xbf16>
    %cst = arith.constant dense<0.000000e+00> : vector<49x2xf32>
    %6 = tpu.matmul %5, %4, %cst {dimension_numbers = #tpu.dot_dimension_numbers<[1], [0], [0], [1], [0, 0, 1, 1], [], []>} : vector<49x192xbf16>, vector<192x2xbf16>, vector<49x2xf32> -> vector<49x2xf32>
    %7 = arith.mulf %3, %3 : vector<49x192xbf16>
    %cst_6 = arith.constant dense<0.000000e+00> : vector<49x2xf32>
    %8 = tpu.matmul %7, %4, %cst_6 {dimension_numbers = #tpu.dot_dimension_numbers<[1], [0], [0], [1], [0, 0, 1, 1], [], []>} : vector<49x192xbf16>, vector<192x2xbf16>, vector<49x2xf32> -> vector<49x2xf32>
    %9 = arith.mulf %1, %3 : vector<49x192xbf16>
    %cst_7 = arith.constant dense<0.000000e+00> : vector<49x2xf32>
    %10 = tpu.matmul %9, %4, %cst_7 {dimension_numbers = #tpu.dot_dimension_numbers<[1], [0], [0], [1], [0, 0, 1, 1], [], []>} : vector<49x192xbf16>, vector<192x2xbf16>, vector<49x2xf32> -> vector<49x2xf32>
    %11 = vector.extract_strided_slice %6 {offsets = [0, 0], sizes = [49, 1], strides = [1, 1]} : vector<49x2xf32> to vector<49x1xf32>
    %12 = math.sqrt %11 : vector<49x1xf32>
    %cst_8 = arith.constant 1.000000e-10 : f32
    %13 = vector.broadcast %cst_8 : f32 to vector<49x1xf32>
    %14 = arith.addf %12, %13 : vector<49x1xf32>
    %15 = tpu.reciprocal %14 {approx = true} : vector<49x1xf32> -> vector<49x1xf32>
    %16 = vector.extract_strided_slice %8 {offsets = [0, 0], sizes = [49, 1], strides = [1, 1]} : vector<49x2xf32> to vector<49x1xf32>
    %17 = math.sqrt %16 : vector<49x1xf32>
    %cst_9 = arith.constant 1.000000e-10 : f32
    %18 = vector.broadcast %cst_9 : f32 to vector<49x1xf32>
    %19 = arith.addf %17, %18 : vector<49x1xf32>
    %20 = tpu.reciprocal %19 {approx = true} : vector<49x1xf32> -> vector<49x1xf32>
    %21 = vector.extract_strided_slice %6 {offsets = [0, 1], sizes = [49, 1], strides = [1, 1]} : vector<49x2xf32> to vector<49x1xf32>
    %22 = arith.mulf %15, %15 : vector<49x1xf32>
    %23 = arith.mulf %21, %22 : vector<49x1xf32>
    %24 = vector.extract_strided_slice %10 {offsets = [0, 1], sizes = [49, 1], strides = [1, 1]} : vector<49x2xf32> to vector<49x1xf32>
    %cst_10 = arith.constant 2.000000e+00 : f32
    %25 = vector.broadcast %cst_10 : f32 to vector<49x1xf32>
    %26 = arith.mulf %25, %24 : vector<49x1xf32>
    %27 = arith.mulf %15, %20 : vector<49x1xf32>
    %28 = arith.mulf %26, %27 : vector<49x1xf32>
    %29 = arith.subf %23, %28 : vector<49x1xf32>
    %30 = vector.extract_strided_slice %8 {offsets = [0, 1], sizes = [49, 1], strides = [1, 1]} : vector<49x2xf32> to vector<49x1xf32>
    %31 = arith.mulf %20, %20 : vector<49x1xf32>
    %32 = arith.mulf %30, %31 : vector<49x1xf32>
    %33 = arith.addf %29, %32 : vector<49x1xf32>
    %c0_i32 = arith.constant 0 : i32
    %34 = arith.cmpi eq, %arg2, %c0_i32 : i32
    %35 = arith.extui %34 : i1 to i32
    %c0_i32_11 = arith.constant 0 : i32
    %36 = arith.cmpi ne, %35, %c0_i32_11 : i32
    scf.if %36 {
      %c0_16 = arith.constant 0 : index
      %c0_17 = arith.constant 0 : index
      %43 = vector.load %arg6[%c0_16, %c0_17] : memref<49x1xf32, #tpu.memory_space<vmem>>, vector<49x1xf32>
      tpu.vector_store %arg6[%c0_16, %c0_17], %33 {strides = array<i32>} : memref<49x1xf32, #tpu.memory_space<vmem>>, vector<49x1xf32>,
    } else {
    }
    %c0_i32_12 = arith.constant 0 : i32
    %37 = arith.cmpi sgt, %arg2, %c0_i32_12 : i32
    %38 = arith.extui %37 : i1 to i32
    %c0_i32_13 = arith.constant 0 : i32
    %39 = arith.cmpi ne, %38, %c0_i32_13 : i32
    scf.if %39 {
      %c0_16 = arith.constant 0 : index
      %c0_17 = arith.constant 0 : index
      %43 = vector.load %arg6[%c0_16, %c0_17] : memref<49x1xf32, #tpu.memory_space<vmem>>, vector<49x1xf32>
      %44 = arith.addf %43, %33 : vector<49x1xf32>
      %c0_18 = arith.constant 0 : index
      %c0_19 = arith.constant 0 : index
      %45 = vector.load %arg6[%c0_18, %c0_19] : memref<49x1xf32, #tpu.memory_space<vmem>>, vector<49x1xf32>
      tpu.vector_store %arg6[%c0_18, %c0_19], %44 {strides = array<i32>} : memref<49x1xf32, #tpu.memory_space<vmem>>, vector<49x1xf32>,
    } else {
    }
    %c0_i32_14 = arith.constant 0 : i32
    %40 = arith.cmpi eq, %arg2, %c0_i32_14 : i32
    %41 = arith.extui %40 : i1 to i32
    %c0_i32_15 = arith.constant 0 : i32
    %42 = arith.cmpi ne, %41, %c0_i32_15 : i32
    scf.if %42 {
      %c0_16 = arith.constant 0 : index
      %c0_17 = arith.constant 0 : index
      %43 = vector.load %arg6[%c0_16, %c0_17] : memref<49x1xf32, #tpu.memory_space<vmem>>, vector<49x1xf32>
      %cst_18 = arith.constant dense<0.000000e+00> : vector<1xf32>
      %44 = vector.multi_reduction <add>, %43, %cst_18 [0] : vector<49x1xf32> to vector<1xf32>
      %45 = vector.shape_cast %44 : vector<1xf32> to vector<1x1xf32>
      %cst_19 = arith.constant 0.0204081628 : f32
      %46 = vector.broadcast %cst_19 : f32 to vector<1x1xf32>
      %47 = arith.mulf %45, %46 : vector<1x1xf32>
      %48 = vector.shape_cast %47 : vector<1x1xf32> to vector<1x1x1x1xf32>
      %c0_20 = arith.constant 0 : index
      %c0_21 = arith.constant 0 : index
      %c0_22 = arith.constant 0 : index
      %c0_23 = arith.constant 0 : index
      %49 = vector.load %arg5[%c0_20, %c0_21, %c0_22, %c0_23] : memref<1x1x1x1xf32, #tpu.memory_space<vmem>>, vector<1x1x1x1xf32>
      tpu.vector_store %arg5[%c0_20, %c0_21, %c0_22, %c0_23], %48 {strides = array<i32>} : memref<1x1x1x1xf32, #tpu.memory_space<vmem>>, vector<1x1x1x1xf32>,
    } else {
    }
    return
  }
  func.func @transform_0(%arg0: i32, %arg1: i32, %arg2: i32) -> (i32, i32) {
    %c0_i32 = arith.constant 0 : i32
    %c0_i32_0 = arith.constant 0 : i32
    %c0_i32_1 = arith.constant 0 : i32
    return %c0_i32, %c0_i32_0 : i32, i32
  }
  func.func @transform_1(%arg0: i32, %arg1: i32, %arg2: i32) -> (i32, i32, i32) {
    %c1_i32 = arith.constant 1 : i32
    %0 = arith.muli %arg0, %c1_i32 : i32
    %1 = arith.addi %0, %arg2 : i32
    %c0_i32 = arith.constant 0 : i32
    %c0_i32_0 = arith.constant 0 : i32
    return %arg1, %1, %c0_i32 : i32, i32, i32
  }
  func.func @transform_2(%arg0: i32, %arg1: i32, %arg2: i32) -> (i32, i32, i32, i32) {
    %c0_i32 = arith.constant 0 : i32
    %c0_i32_0 = arith.constant 0 : i32
    %c0_i32_1 = arith.constant 0 : i32
    return %arg0, %arg1, %c0_i32, %c0_i32_0 : i32, i32, i32, i32
  }
}

module attributes {stable_mosaic.version = 11 : i64} {
  func.func @kernel(%arg0: i32, %arg1: i32, %arg2: i32, %arg3: memref<64x2xbf16, #tpu.memory_space<vmem>>, %arg4: memref<2x225x64xbf16, #tpu.memory_space<vmem>>, %arg5: memref<1x1x1x1xf32, #tpu.memory_space<vmem>>, %arg6: memref<225x1xf32, #tpu.memory_space<vmem>>) attributes {dimension_semantics = [#tpu.dimension_semantics<parallel>, #tpu.dimension_semantics<parallel>, #tpu.dimension_semantics<arbitrary>], iteration_bounds = array<i64: 1, 2, 1>, scalar_prefetch = 0 : i64, scratch_operands = 1 : i64, tpu.core_type = #tpu.core_type<tc>, window_params = [{pipeline_mode = #tpu.pipeline_mode<synchronous>, transform_indices = @transform_0, window_bounds = array<i64: 64, 2>}, {transform_indices = @transform_1, window_bounds = array<i64: 2, 225, 64>}, {transform_indices = @transform_2, window_bounds = array<i64: 1, 1, 1, 1>}]} {
    %c0 = arith.constant 0 : index
    %c0_0 = arith.constant 0 : index
    %c0_1 = arith.constant 0 : index
    %0 = vector.load %arg4[%c0, %c0_0, %c0_1] : memref<2x225x64xbf16, #tpu.memory_space<vmem>>, vector<1x225x64xbf16>
    %1 = vector.shape_cast %0 : vector<1x225x64xbf16> to vector<225x64xbf16>
    %c1 = arith.constant 1 : index
    %c0_2 = arith.constant 0 : index
    %c0_3 = arith.constant 0 : index
    %2 = vector.load %arg4[%c1, %c0_2, %c0_3] : memref<2x225x64xbf16, #tpu.memory_space<vmem>>, vector<1x225x64xbf16>
    %3 = vector.shape_cast %2 : vector<1x225x64xbf16> to vector<225x64xbf16>
    %c0_4 = arith.constant 0 : index
    %c0_5 = arith.constant 0 : index
    %4 = vector.load %arg3[%c0_4, %c0_5] : memref<64x2xbf16, #tpu.memory_space<vmem>>, vector<64x2xbf16>
    %5 = arith.mulf %1, %1 : vector<225x64xbf16>
    %cst = arith.constant dense<0.000000e+00> : vector<225x2xf32>
    %6 = tpu.matmul %5, %4, %cst {dimension_numbers = #tpu.dot_dimension_numbers<[1], [0], [0], [1], [0, 0, 1, 1], [], []>} : vector<225x64xbf16>, vector<64x2xbf16>, vector<225x2xf32> -> vector<225x2xf32>
    %7 = arith.mulf %3, %3 : vector<225x64xbf16>
    %cst_6 = arith.constant dense<0.000000e+00> : vector<225x2xf32>
    %8 = tpu.matmul %7, %4, %cst_6 {dimension_numbers = #tpu.dot_dimension_numbers<[1], [0], [0], [1], [0, 0, 1, 1], [], []>} : vector<225x64xbf16>, vector<64x2xbf16>, vector<225x2xf32> -> vector<225x2xf32>
    %9 = arith.mulf %1, %3 : vector<225x64xbf16>
    %cst_7 = arith.constant dense<0.000000e+00> : vector<225x2xf32>
    %10 = tpu.matmul %9, %4, %cst_7 {dimension_numbers = #tpu.dot_dimension_numbers<[1], [0], [0], [1], [0, 0, 1, 1], [], []>} : vector<225x64xbf16>, vector<64x2xbf16>, vector<225x2xf32> -> vector<225x2xf32>
    %11 = vector.extract_strided_slice %6 {offsets = [0, 0], sizes = [225, 1], strides = [1, 1]} : vector<225x2xf32> to vector<225x1xf32>
    %12 = math.sqrt %11 : vector<225x1xf32>
    %cst_8 = arith.constant 1.000000e-10 : f32
    %13 = vector.broadcast %cst_8 : f32 to vector<225x1xf32>
    %14 = arith.addf %12, %13 : vector<225x1xf32>
    %15 = tpu.reciprocal %14 {approx = true} : vector<225x1xf32> -> vector<225x1xf32>
    %16 = vector.extract_strided_slice %8 {offsets = [0, 0], sizes = [225, 1], strides = [1, 1]} : vector<225x2xf32> to vector<225x1xf32>
    %17 = math.sqrt %16 : vector<225x1xf32>
    %cst_9 = arith.constant 1.000000e-10 : f32
    %18 = vector.broadcast %cst_9 : f32 to vector<225x1xf32>
    %19 = arith.addf %17, %18 : vector<225x1xf32>
    %20 = tpu.reciprocal %19 {approx = true} : vector<225x1xf32> -> vector<225x1xf32>
    %21 = vector.extract_strided_slice %6 {offsets = [0, 1], sizes = [225, 1], strides = [1, 1]} : vector<225x2xf32> to vector<225x1xf32>
    %22 = arith.mulf %15, %15 : vector<225x1xf32>
    %23 = arith.mulf %21, %22 : vector<225x1xf32>
    %24 = vector.extract_strided_slice %10 {offsets = [0, 1], sizes = [225, 1], strides = [1, 1]} : vector<225x2xf32> to vector<225x1xf32>
    %cst_10 = arith.constant 2.000000e+00 : f32
    %25 = vector.broadcast %cst_10 : f32 to vector<225x1xf32>
    %26 = arith.mulf %25, %24 : vector<225x1xf32>
    %27 = arith.mulf %15, %20 : vector<225x1xf32>
    %28 = arith.mulf %26, %27 : vector<225x1xf32>
    %29 = arith.subf %23, %28 : vector<225x1xf32>
    %30 = vector.extract_strided_slice %8 {offsets = [0, 1], sizes = [225, 1], strides = [1, 1]} : vector<225x2xf32> to vector<225x1xf32>
    %31 = arith.mulf %20, %20 : vector<225x1xf32>
    %32 = arith.mulf %30, %31 : vector<225x1xf32>
    %33 = arith.addf %29, %32 : vector<225x1xf32>
    %c0_i32 = arith.constant 0 : i32
    %34 = arith.cmpi eq, %arg2, %c0_i32 : i32
    %35 = arith.extui %34 : i1 to i32
    %c0_i32_11 = arith.constant 0 : i32
    %36 = arith.cmpi ne, %35, %c0_i32_11 : i32
    scf.if %36 {
      %c0_16 = arith.constant 0 : index
      %c0_17 = arith.constant 0 : index
      %43 = vector.load %arg6[%c0_16, %c0_17] : memref<225x1xf32, #tpu.memory_space<vmem>>, vector<225x1xf32>
      tpu.vector_store %arg6[%c0_16, %c0_17], %33 {strides = array<i32>} : memref<225x1xf32, #tpu.memory_space<vmem>>, vector<225x1xf32>,
    } else {
    }
    %c0_i32_12 = arith.constant 0 : i32
    %37 = arith.cmpi sgt, %arg2, %c0_i32_12 : i32
    %38 = arith.extui %37 : i1 to i32
    %c0_i32_13 = arith.constant 0 : i32
    %39 = arith.cmpi ne, %38, %c0_i32_13 : i32
    scf.if %39 {
      %c0_16 = arith.constant 0 : index
      %c0_17 = arith.constant 0 : index
      %43 = vector.load %arg6[%c0_16, %c0_17] : memref<225x1xf32, #tpu.memory_space<vmem>>, vector<225x1xf32>
      %44 = arith.addf %43, %33 : vector<225x1xf32>
      %c0_18 = arith.constant 0 : index
      %c0_19 = arith.constant 0 : index
      %45 = vector.load %arg6[%c0_18, %c0_19] : memref<225x1xf32, #tpu.memory_space<vmem>>, vector<225x1xf32>
      tpu.vector_store %arg6[%c0_18, %c0_19], %44 {strides = array<i32>} : memref<225x1xf32, #tpu.memory_space<vmem>>, vector<225x1xf32>,
    } else {
    }
    %c0_i32_14 = arith.constant 0 : i32
    %40 = arith.cmpi eq, %arg2, %c0_i32_14 : i32
    %41 = arith.extui %40 : i1 to i32
    %c0_i32_15 = arith.constant 0 : i32
    %42 = arith.cmpi ne, %41, %c0_i32_15 : i32
    scf.if %42 {
      %c0_16 = arith.constant 0 : index
      %c0_17 = arith.constant 0 : index
      %43 = vector.load %arg6[%c0_16, %c0_17] : memref<225x1xf32, #tpu.memory_space<vmem>>, vector<225x1xf32>
      %cst_18 = arith.constant dense<0.000000e+00> : vector<1xf32>
      %44 = vector.multi_reduction <add>, %43, %cst_18 [0] : vector<225x1xf32> to vector<1xf32>
      %45 = vector.shape_cast %44 : vector<1xf32> to vector<1x1xf32>
      %cst_19 = arith.constant 0.00444444455 : f32
      %46 = vector.broadcast %cst_19 : f32 to vector<1x1xf32>
      %47 = arith.mulf %45, %46 : vector<1x1xf32>
      %48 = vector.shape_cast %47 : vector<1x1xf32> to vector<1x1x1x1xf32>
      %c0_20 = arith.constant 0 : index
      %c0_21 = arith.constant 0 : index
      %c0_22 = arith.constant 0 : index
      %c0_23 = arith.constant 0 : index
      %49 = vector.load %arg5[%c0_20, %c0_21, %c0_22, %c0_23] : memref<1x1x1x1xf32, #tpu.memory_space<vmem>>, vector<1x1x1x1xf32>
      tpu.vector_store %arg5[%c0_20, %c0_21, %c0_22, %c0_23], %48 {strides = array<i32>} : memref<1x1x1x1xf32, #tpu.memory_space<vmem>>, vector<1x1x1x1xf32>,
    } else {
    }
    return
  }
  func.func @transform_0(%arg0: i32, %arg1: i32, %arg2: i32) -> (i32, i32) {
    %c0_i32 = arith.constant 0 : i32
    %c0_i32_0 = arith.constant 0 : i32
    %c0_i32_1 = arith.constant 0 : i32
    return %c0_i32, %c0_i32_0 : i32, i32
  }
  func.func @transform_1(%arg0: i32, %arg1: i32, %arg2: i32) -> (i32, i32, i32) {
    %c1_i32 = arith.constant 1 : i32
    %0 = arith.muli %arg0, %c1_i32 : i32
    %1 = arith.addi %0, %arg2 : i32
    %c0_i32 = arith.constant 0 : i32
    %c0_i32_0 = arith.constant 0 : i32
    return %arg1, %1, %c0_i32 : i32, i32, i32
  }
  func.func @transform_2(%arg0: i32, %arg1: i32, %arg2: i32) -> (i32, i32, i32, i32) {
    %c0_i32 = arith.constant 0 : i32
    %c0_i32_0 = arith.constant 0 : i32
    %c0_i32_1 = arith.constant 0 : i32
    return %arg0, %arg1, %c0_i32, %c0_i32_0 : i32, i32, i32, i32
  }
}

</mosaic_0001>

<bundles_post_ra>
// kernel: _lambda_.8
= control target key start
LH: loop header
LB: loop body
LE: loop exit
PB: predicated region body
PF: predicated region fallthrough
CT: control target
= control target key end

     0   :  { %s908_s9 = smov 0   ;;  %s910_s10 = smov 0   ;;  %s1058_s0 = inlined_call_operand.vmem [shape: bf16[256,2], index: 0, kind: input, shape index: {}]   ;;  %s1059_s1 = inlined_call_operand.vmem [shape: bf16[4,9,256], index: 1, kind: input, shape index: {}]   ;;  %s1060_s2 = inlined_call_operand.vmem [shape: f32[1,2,1,1], index: 2, kind: output, shape index: {}]  }
   0x1   :  { %s912_s11 = smov 0  }
   0x2 LB: > { %s27_s12 = sadd.s32 1, %s885_s10  ;;  %p712_p0 = scmp.ge.s32.totalorder %s889_s11, 1  ;;  %s889_s11 = sphi %s912_s11, %s12_s11   ;;  %s885_s10 = sphi %s910_s10, %s1062_s10   ;;  %s881_s9 = sphi %s908_s9, %s1061_s9  }
   0x3   : > { %p29_p1 = scmp.ge.s32.totalorder %s27_s12, 2  ;;  %p147_p2 = scmp.lt.s32.totalorder %s889_s11, 3 }
   0x5   : > { %s1064_s12 = smov (%p29_p1, %s27_s12), 0  ;;  %p148_p3 = pnand %p712_p0, %p147_p2 }
   0x6   : > { %s713_s15 = sshll.u32 (!%p148_p3), %s881_s9, 1  ;;  %s891_s26 = smov (!%p148_p3), 1  }
   0x7   : > { %151 = sbr.rel (%p148_p3) target bundleno = 547 (0x223), region = 28  ;;  %p181_p4 = scmp.lt.s32.totalorder (!%p148_p3), %s713_s15, 3 }
   0x8   : > { %s892_s27 = smov (!%p148_p3), 127   ;;  %p195_p5 = scmp.lt.s32.totalorder (!%p148_p3), %s881_s9, 1 }
   0xc   : > { %v931_v0 = vld [vmem:[%s1058_s0 + $0x78] sm:$0xff]   ;;  %v944_v2 = vld [vmem:[%s1058_s0 + $0x70] sm:$0xff]   ;;  %v958_v4 = vld [vmem:[%s1058_s0 + $0x68] sm:$0xff]   ;;  %s1066_s15 = smov (!%p181_p4, %s713_s15), 3  ;;  %vm583_vm8 = vcmask 7168   ;;  %vm585_vm9 = vcmask 0  }
   0xd   : > { %v937_v1 = vld [vmem:[%s1058_s0 + $0x38] sm:$0xff]   ;;  %743 = vmatprep.subr.bf16.mxu0 %v931_v0  ;;  %765 = vmatprep.subr.bf16.mxu1 %v931_v0  ;;  %v951_v3 = vld [vmem:[%s1058_s0 + $0x30] sm:$0xff]   ;;  %v840_v5 = vld [vmem:[%s1058_s0 + $0x28] sm:$0xff]   ;;  %s742_s28 = sshll.u32 %s1066_s15, 4  ;;  %s1068_s9 = smov (!%p195_p5, %s881_s9), 1 }
   0xe   : > { %744 = vmatpush3.bf16.msra.mxu0 %v937_v1  ;;  %766 = vmatpush3.bf16.msra.mxu1 %v937_v1  ;;  %v841_v6 = vld [vmem:[%s1058_s0 + $0x60] sm:$0xff]   ;;  %v843_v8 = vld [vmem:[%s1058_s0 + $0x58] sm:$0xff]   ;;  %s189_s7 = scalar_lea.vmem %s1059_s1, %s742_s28  ;;  %v845_v10 = vld [vmem:[%s1058_s0 + $0x50] sm:$0xff]   ;;  %s199_s30 = scalar_lea.vmem %s1060_s2, %s1068_s9 }
   0xf   : > { %745 = vmatprep.subr.bf16.mxu0 %v944_v2  ;;  %767 = vmatprep.subr.bf16.mxu1 %v944_v2  ;;  %v842_v7 = vld [vmem:[%s1058_s0 + $0x20] sm:$0xff]   ;;  %v844_v9 = vld [vmem:[%s1058_s0 + $0x18] sm:$0xff]   ;;  %v202_v12 = vld [vmem:[%s189_s7 + $0x8] sm:$0x11] }
  0x10   : > { %v201_v11 = vld [vmem:[%s189_s7] sm:$0xff]  ;;  %v716_v13 = vld [vmem:[%s189_s7 + $0x10] sm:$0xff]  ;;  %v239_v15 = vmul.bf16 %v202_v12, %v202_v12  ;;  %v717_v16 = vld [vmem:[%s189_s7 + $0x18] sm:$0x11] }
  0x11   : > { %v238_v14 = vmul.bf16 %v201_v11, %v201_v11  ;;  %v387_v17 = vmul.bf16 %v716_v13, %v716_v13  ;;  %v388_v18 = vmul.bf16 %v717_v16, %v717_v16  ;;  %v846_v19 = vld [vmem:[%s1058_s0 + $0x10] sm:$0xff]   ;;  %v847_v21 = vld [vmem:[%s1058_s0 + $0x48] sm:$0xff]   ;;  %v849_v24 = vld [vmem:[%s1058_s0 + $0x40] sm:$0xff]   ;;  %v440_v26 = vmul.bf16 %v716_v13, %v201_v11 }
  0x12   : > { %746 = vmatpush3.bf16.msra.mxu0 %v951_v3  ;;  %768 = vmatpush3.bf16.msra.mxu1 %v951_v3  ;;  %v848_v23 = vld [vmem:[%s1058_s0 + $0x8] sm:$0xff]   ;;  %v850_v25 = vld [vmem:[%s1058_s0] sm:$0xff]   ;;  %v441_v27 = vmul.bf16 %v717_v16, %v202_v12 }
  0x13   : > { %747 = vmatprep.subr.bf16.mxu0 %v958_v4  ;;  %769 = vmatprep.subr.bf16.mxu1 %v958_v4  ;;  %v719_v20 = vcombine.high %v238_v14, %v239_v15  ;;  %v737_v22 = vcombine.high %v387_v17, %v388_v18  ;;  %v718_v28 = vcombine.low %v238_v14, %v239_v15 }
  0x14   : > { %v736_v29 = vcombine.low %v387_v17, %v388_v18  ;;  %v739_v30 = vcombine.high %v440_v26, %v441_v27  ;;  %v738_v31 = vcombine.low %v440_v26, %v441_v27 }
  0x15   : > { %378 = vmatprep.mubr.bf16.mxu0 %v719_v20  ;;  %431 = vmatprep.mubr.bf16.mxu1 %v737_v22 }
  0x16   : > { %748 = vmatpush3.bf16.msra.mxu0 %v840_v5  ;;  %770 = vmatpush3.bf16.msra.mxu1 %v840_v5 }
  0x17   : > { %749 = vmatprep.subr.bf16.mxu0 %v841_v6  ;;  %771 = vmatprep.subr.bf16.mxu1 %v841_v6 }
  0x1a   : > { %750 = vmatpush3.bf16.msra.mxu0 %v842_v7  ;;  %772 = vmatpush3.bf16.msra.mxu1 %v842_v7 }
  0x1b   : > { %751 = vmatprep.subr.bf16.mxu0 %v843_v8  ;;  %773 = vmatprep.subr.bf16.mxu1 %v843_v8 }
  0x1e   : > { %752 = vmatpush3.bf16.msra.mxu0 %v844_v9  ;;  %774 = vmatpush3.bf16.msra.mxu1 %v844_v9 }
  0x1f   : > { %753 = vmatprep.subr.bf16.mxu0 %v845_v10  ;;  %775 = vmatprep.subr.bf16.mxu1 %v845_v10 }
  0x22   : > { %754 = vmatpush3.bf16.msra.mxu0 %v846_v19  ;;  %776 = vmatpush3.bf16.msra.mxu1 %v846_v19 }
  0x23   : > { %755 = vmatprep.subr.bf16.mxu0 %v847_v21  ;;  %777 = vmatprep.subr.bf16.mxu1 %v847_v21 }
  0x26   : > { %756 = vmatpush3.bf16.msra.mxu0 %v848_v23  ;;  %778 = vmatpush3.bf16.msra.mxu1 %v848_v23 }
  0x27   : > { %757 = vmatprep.subr.bf16.mxu0 %v849_v24  ;;  %779 = vmatprep.subr.bf16.mxu1 %v849_v24 }
  0x2a   : > { %758 = vmatpush3.bf16.msra.mxu0 %v850_v25  ;;  %780 = vmatpush3.bf16.msra.mxu1 %v850_v25 }
  0x2b   : > { %787 = vmatprep.subr.bf16.mxu0 %v931_v0 }
  0x2d   : > { %379 = vmatmul.mubr.bf16.vlgmr.msra.gmra.mxu0 %v718_v28  ;;  %432 = vmatmul.mubr.bf16.vlgmr.msra.gmra.mxu1 %v736_v29 }
  0x2e   : > { %788 = vmatpush3.bf16.msra.mxu0 %v937_v1  ;;  %484 = vmatprep.mubr.bf16.mxu0 %v739_v30 }
  0x2f   : > { %789 = vmatprep.subr.bf16.mxu0 %v944_v2 }
  0x32   : > { %790 = vmatpush3.bf16.msra.mxu0 %v951_v3 }
  0x33   : > { %791 = vmatprep.subr.bf16.mxu0 %v958_v4 }
  0x36   : > { %792 = vmatpush3.bf16.msra.mxu0 %v840_v5 }
  0x37   : > { %793 = vmatprep.subr.bf16.mxu0 %v841_v6 }
  0x3a   : > { %794 = vmatpush3.bf16.msra.mxu0 %v842_v7 }
  0x3b   : > { %795 = vmatprep.subr.bf16.mxu0 %v843_v8 }
  0x3e   : > { %796 = vmatpush3.bf16.msra.mxu0 %v844_v9 }
  0x3f   : > { %797 = vmatprep.subr.bf16.mxu0 %v845_v10 }
  0x42   : > { %798 = vmatpush3.bf16.msra.mxu0 %v846_v19 }
  0x43   : > { %799 = vmatprep.subr.bf16.mxu0 %v847_v21 }
  0x46   : > { %800 = vmatpush3.bf16.msra.mxu0 %v848_v23 }
  0x47   : > { %801 = vmatprep.subr.bf16.mxu0 %v849_v24 }
  0x4a   : > { %802 = vmatpush3.bf16.msra.mxu0 %v850_v25 }
  0x4d   : > { %485 = vmatmul.mubr.bf16.vlgmr.msra.gmra.mxu0 %v738_v31 }
  0xed   : > { %v759_v32 = vpop.f32.mrf.mxu0  ;;  %v781_v33 = vpop.f32.mrf.mxu1 }
  0xef   : > { %v760_v34 = vpop.f32.mrf.mxu0  ;;  %v782_v35 = vpop.f32.mrf.mxu1 }
  0xf0   : > { %v1005_v36 = vadd.f32 %v760_v34, %v759_v32  ;;  %v1007_v37 = vadd.f32 %v782_v35, %v781_v33 }
  0xf1   : > { %v762_v38 = vpop.f32.mrf.mxu0  ;;  %v784_v39 = vpop.f32.mrf.mxu1 }
  0xf2   : > { %851 = vrsqrt.f32 %v1005_v36  ;;  %vm495_vm0 = vcmp.eq.f32.partialorder %v1005_v36, inf  ;;  %v498_v47 = vand.u32 2147483648, %v1005_v36  ;;  %vm497_vm1 = vcmp.eq.f32.partialorder %v1005_v36, 0.0 }
  0xf3   : > { %853 = vrsqrt.f32 %v1007_v37  ;;  %v763_v40 = vpop.f32.mrf.mxu0  ;;  %v785_v41 = vpop.f32.mrf.mxu1  ;;  %vm513_vm2 = vcmp.eq.f32.partialorder %v1007_v37, inf  ;;  %v516_v50 = vand.u32 2147483648, %v1007_v37  ;;  %vm515_vm3 = vcmp.eq.f32.partialorder %v1007_v37, 0.0 }
  0xf4   : > { %v1011_v42 = vadd.f32 %v763_v40, %v762_v38  ;;  %v1013_v43 = vadd.f32 %v785_v41, %v784_v39 }
  0xf6   : > { %855 = vrsqrt.f32 %v1011_v42  ;;  %vm502_vm4 = vcmp.eq.f32.partialorder %v1011_v42, inf  ;;  %vm504_vm5 = vcmp.eq.f32.partialorder %v1011_v42, 0.0  ;;  %v505_v60 = vand.u32 2147483648, %v1011_v42 }
  0xf7   : > { %857 = vrsqrt.f32 %v1013_v43  ;;  %vm520_vm6 = vcmp.eq.f32.partialorder %v1013_v43, inf  ;;  %v523_v62 = vand.u32 2147483648, %v1013_v43  ;;  %vm522_vm7 = vcmp.eq.f32.partialorder %v1013_v43, 0.0 }
  0xff   : > { %v852_v44 = vpop.eup %851 }
 0x100   : > { %v854_v45 = vpop.eup %853  ;;  %v494_v46 = vmul.f32 %v852_v44, %v1005_v36 }
 0x101   : > { %v512_v48 = vmul.f32 %v854_v45, %v1007_v37 }
 0x102   : > { %v496_v49 = vsel %vm495_vm0, %v1005_v36, %v494_v46 }
 0x103   : > { %v856_v51 = vpop.eup %855  ;;  %v499_v52 = vsel %vm497_vm1, %v498_v47, %v496_v49  ;;  %v514_v53 = vsel %vm513_vm2, %v1007_v37, %v512_v48 }
 0x104   : > { %v858_v54 = vpop.eup %857  ;;  %v501_v55 = vmul.f32 %v856_v51, %v1011_v42  ;;  %v507_v56 = vadd.f32 1e-10, %v499_v52  ;;  %v517_v57 = vsel %vm515_vm3, %v516_v50, %v514_v53 }
 0x105   : > { %v519_v58 = vmul.f32 %v858_v54, %v1013_v43  ;;  %v525_v59 = vadd.f32 1e-10, %v517_v57 }
 0x106   : > { %859 = vrcp.f32 %v507_v56  ;;  %v503_v61 = vsel %vm502_vm4, %v1011_v42, %v501_v55 }
 0x107   : > { %861 = vrcp.f32 %v525_v59  ;;  %v506_v63 = vsel %vm504_vm5, %v505_v60, %v503_v61  ;;  %v521_v0 = vsel %vm520_vm6, %v1013_v43, %v519_v58 }
 0x108   : > { %v508_v1 = vadd.f32 1e-10, %v506_v63  ;;  %v524_v2 = vsel %vm522_vm7, %v523_v62, %v521_v0 }
 0x109   : > { %v526_v3 = vadd.f32 1e-10, %v524_v2 }
 0x10a   : > { %863 = vrcp.f32 %v508_v1 }
 0x10b   : > { %865 = vrcp.f32 %v526_v3 }
 0x10d   : > { %v803_v14 = vpop.f32.mrf.mxu0 }
 0x10f   : > { %v804_v15 = vpop.f32.mrf.mxu0 }
 0x110   : > { %v805_v17 = vadd.f32 %v804_v15, %v803_v14 }
 0x111   : > { %v806_v16 = vpop.f32.mrf.mxu0 }
 0x112   : > { %v541_v21 = vmul.f32 2.0, %v805_v17 }
 0x113   : > { %v860_v4 = vpop.eup %859  ;;  %v807_v18 = vpop.f32.mrf.mxu0 }
 0x114   : > { %v862_v5 = vpop.eup %861  ;;  %v529_v6 = vmul.f32 %v860_v4, %v860_v4  ;;  %v808_v19 = vadd.f32 %v807_v18, %v806_v16 }
 0x115   : > { %v543_v7 = vmul.f32 %v862_v5, %v860_v4  ;;  %v557_v12 = vmul.f32 %v862_v5, %v862_v5 }
 0x116   : > { %533 = vrot.lane.b32.xlu0 %v529_v6, %s891_s26  ;;  %v542_v23 = vmul.f32 2.0, %v808_v19 }
 0x117   : > { %v864_v8 = vpop.eup %863  ;;  %547 = vrot.lane.b32.xlu1 %v543_v7, %s891_s26 }
 0x118   : > { %v866_v9 = vpop.eup %865  ;;  %v530_v10 = vmul.f32 %v864_v8, %v864_v8 }
 0x119   : > { %v544_v11 = vmul.f32 %v866_v9, %v864_v8  ;;  %v558_v13 = vmul.f32 %v866_v9, %v866_v9 }
 0x11a   : > { %535 = vrot.lane.b32.xlu0 %v530_v10, %s891_s26 }
 0x11b   : > { %549 = vrot.lane.b32.xlu1 %v544_v11, %s891_s26 }
 0x11e   : > { %561 = vrot.lane.b32.xlu0 %v557_v12, %s891_s26 }
 0x11f   : > { %563 = vrot.lane.b32.xlu1 %v558_v13, %s891_s26 }
 0x188   : > { %v534_v20 = vpop.permute.xlu0 %533 }
 0x189   : > { %v548_v22 = vpop.permute.xlu1 %547  ;;  %v539_v26 = vmul.f32 %v1005_v36, %v534_v20 }
 0x18a   : > { %v553_v25 = vmul.f32 %v548_v22, %v541_v21 }
 0x18c   : > { %v536_v24 = vpop.permute.xlu0 %535  ;;  %v555_v31 = vsub.f32 %v539_v26, %v553_v25 }
 0x18d   : > { %v550_v27 = vpop.permute.xlu1 %549  ;;  %v540_v29 = vmul.f32 %v1011_v42, %v536_v24 }
 0x18e   : > { %v554_v28 = vmul.f32 %v550_v27, %v542_v23 }
 0x190   : > { %v562_v30 = vpop.permute.xlu0 %561  ;;  %v556_v34 = vsub.f32 %v540_v29, %v554_v28 }
 0x191   : > { %v564_v32 = vpop.permute.xlu1 %563  ;;  %v567_v33 = vmul.f32 %v1007_v37, %v562_v30 }
 0x192   : > { %v568_v35 = vmul.f32 %v1013_v43, %v564_v32 }
 0x193   : > { %v569_v38 = vadd.f32 %v567_v33, %v555_v31 }
 0x194   : > { %v570_v39 = vadd.f32 %v568_v35, %v556_v34 }
 0x195   : > { %577 = vrot.lane.b32.xlu0 %v569_v38, %s892_s27 }
 0x196   : > { %579 = vrot.lane.b32.xlu1 %v570_v39, %s892_s27 }
 0x207   : > { %v578_v36 = vpop.permute.xlu0 %577 }
 0x208   : > { %v580_v40 = vpop.permute.xlu1 %579  ;;  %584 = vst.msk [vmem:[#allocation2] sm:$0xff] %vm583_vm8, %v578_v36 }
 0x209   : > { %586 = vst.msk [vmem:[#allocation2 + $0x8] sm:$0x1] %vm585_vm9, %v580_v40 }
 0x20f   : > { %v610_v41 = vld [vmem:[#allocation2] sm:$0xff] }
 0x210   : > { %v611_v42 = vld [vmem:[#allocation2 + $0x8] sm:$0x1]  ;;  %v613_v37 = vsel %vm583_vm8, %v610_v41, 0.0 }
 0x211   : > { %v615_v44 = vsel %vm585_vm9, %v611_v42, 0.0 }
 0x212   : > { %v616_v43 = vadd.f32 %v615_v44, %v613_v37 }
 0x214   : > { %v617_v45 = vrot.slane %v616_v43, 4 }
 0x216   : > { %v618_v46 = vadd.f32 %v617_v45, %v616_v43 }
 0x218   : > { %v619_v47 = vrot.slane %v618_v46, 2 }
 0x21a   : > { %v620_v48 = vadd.f32 %v619_v47, %v618_v46 }
 0x21c   : > { %v621_v49 = vrot.slane %v620_v48, 1 }
 0x21e   : > { %v622_v50 = vadd.f32 %v621_v49, %v620_v48 }
 0x220   : > { %v623_v51 = vmul.f32 0.11111111, %v622_v50 }
 0x222   : > { %624 = vst.msk [vmem:[%s199_s30] sm:$0x1] %vm585_vm9, %v623_v51 }
 0x223 PF: > { %s12_s11 = sadd.s32 1, %s889_s11   ;;  %s1061_s9 = smov %s885_s10 }
 0x224   : > { %p9_p6 = scmp.ge.s32.totalorder %s12_s11, 4   ;;  %s1062_s10 = smov %s1064_s12 }
 0x226   :  { %11 = sbr.rel (!%p9_p6) target bundleno = 2 (0x2), region = 71 }

// kernel: _lambda_.7
= control target key start
LH: loop header
LB: loop body
LE: loop exit
PB: predicated region body
PF: predicated region fallthrough
CT: control target
= control target key end

     0   :  { %s1234_s9 = smov 0   ;;  %s1236_s10 = smov 0   ;;  %s1557_s0 = inlined_call_operand.vmem [shape: bf16[384,2], index: 0, kind: input, shape index: {}]   ;;  %s1558_s1 = inlined_call_operand.vmem [shape: bf16[4,9,384], index: 1, kind: input, shape index: {}]   ;;  %s1559_s2 = inlined_call_operand.vmem [shape: f32[1,2,1,1], index: 2, kind: output, shape index: {}]  }
   0x1   :  { %s1238_s11 = smov 0  }
   0x2 LB: > { %s27_s12 = sadd.s32 1, %s1209_s10  ;;  %p927_p0 = scmp.ge.s32.totalorder %s1213_s11, 1  ;;  %s1213_s11 = sphi %s1238_s11, %s12_s11   ;;  %s1209_s10 = sphi %s1236_s10, %s1561_s10   ;;  %s1205_s9 = sphi %s1234_s9, %s1560_s9  }
   0x3   : > { %p29_p1 = scmp.ge.s32.totalorder %s27_s12, 2  ;;  %p147_p2 = scmp.lt.s32.totalorder %s1213_s11, 3 }
   0x5   : > { %s1563_s12 = smov (%p29_p1, %s27_s12), 0  ;;  %p148_p3 = pnand %p927_p0, %p147_p2 }
   0x6   : > { %s928_s27 = sshll.u32 (!%p148_p3), %s1205_s9, 1  ;;  %s1217_s18 = smov (!%p148_p3), 1  }
   0x7   : > { %151 = sbr.rel (%p148_p3) target bundleno = 581 (0x245), region = 28  ;;  %p181_p4 = scmp.lt.s32.totalorder (!%p148_p3), %s928_s27, 3 }
   0x8   : > { %s1218_s19 = smov (!%p148_p3), 127   ;;  %p195_p5 = scmp.lt.s32.totalorder (!%p148_p3), %s1205_s9, 1 }
   0xc   : > { %v1257_v0 = vld [vmem:[%s1557_s0 + $0x78] sm:$0xff]   ;;  %v1215_v1 = vmov 0.0   ;;  %vm1216_vm0 = vmmov 0   ;;  %v1277_v4 = vld [vmem:[%s1557_s0 + $0x70] sm:$0xff]   ;;  %v1295_v7 = vld [vmem:[%s1557_s0 + $0x68] sm:$0xff]   ;;  %s1565_s27 = smov (!%p181_p4, %s928_s27), 3 }
   0xd   : > { %1062 = vmatprep.subr.bf16.mxu1 %v1215_v1  ;;  %v1263_v2 = vld [vmem:[%s1557_s0 + $0xb8] sm:$0xff]   ;;  %969 = vmatprep.subr.bf16.mxu0 %v1257_v0  ;;  %v1284_v5 = vld [vmem:[%s1557_s0 + $0xb0] sm:$0xff]   ;;  %v1302_v8 = vld [vmem:[%s1557_s0 + $0xa8] sm:$0xff]   ;;  %s1122_s22 = smul.u32 24, %s1565_s27  ;;  %vm798_vm9 = vcmask 7168   ;;  %vm800_vm10 = vcmask 0  }
   0xe   : > { %v1269_v3 = vld [vmem:[%s1557_s0 + $0x38] sm:$0xff]   ;;  %1078 = vmatprep.mubr.msk.bf16.mxu1 %vm1216_vm0, %v1215_v1  ;;  %1063 = vmatpush3.bf16.msra.mxu1 %v1263_v2  ;;  %v1290_v6 = vld [vmem:[%s1557_s0 + $0x30] sm:$0xff]   ;;  %v1309_v9 = vld [vmem:[%s1557_s0 + $0x28] sm:$0xff]   ;;  %s1567_s9 = smov (!%p195_p5, %s1205_s9), 1 }
   0xf   : > { %970 = vmatpush3.bf16.msra.mxu0 %v1269_v3  ;;  %1064 = vmatprep.subr.bf16.mxu1 %v1215_v1  ;;  %v1315_v10 = vld [vmem:[%s1557_s0 + $0x60] sm:$0xff]   ;;  %v1334_v13 = vld [vmem:[%s1557_s0 + $0x58] sm:$0xff]   ;;  %v1353_v16 = vld [vmem:[%s1557_s0 + $0x50] sm:$0xff]   ;;  %s189_s3 = scalar_lea.vmem %s1558_s1, %s1122_s22  ;;  %s199_s22 = scalar_lea.vmem %s1559_s2, %s1567_s9 }
  0x10   : > { %971 = vmatprep.subr.bf16.mxu0 %v1277_v4  ;;  %v1321_v11 = vld [vmem:[%s1557_s0 + $0xa0] sm:$0xff]   ;;  %v1340_v14 = vld [vmem:[%s1557_s0 + $0x98] sm:$0xff]   ;;  %v1359_v17 = vld [vmem:[%s1557_s0 + $0x90] sm:$0xff]  }
  0x11   : > { %v1328_v12 = vld [vmem:[%s1557_s0 + $0x20] sm:$0xff]   ;;  %v1347_v15 = vld [vmem:[%s1557_s0 + $0x18] sm:$0xff]   ;;  %v1366_v18 = vld [vmem:[%s1557_s0 + $0x10] sm:$0xff]  }
  0x12   : > { %1065 = vmatpush3.bf16.msra.mxu1 %v1284_v5  ;;  %v1372_v19 = vld [vmem:[%s1557_s0 + $0x48] sm:$0xff]   ;;  %v1390_v22 = vld [vmem:[%s189_s3] sm:$0xff]  ;;  %v204_v28 = vld [vmem:[%s189_s3 + $0x14] sm:$0x1] }
  0x13   : > { %972 = vmatpush3.bf16.msra.mxu0 %v1290_v6  ;;  %1066 = vmatprep.subr.bf16.mxu1 %v1215_v1  ;;  %v1381_v20 = vld [vmem:[%s1557_s0 + $0x88] sm:$0xff]   ;;  %v1398_v24 = vld [vmem:[%s1557_s0 + $0x40] sm:$0xff]   ;;  %v258_v25 = vmul.bf16 %v1390_v22, %v1390_v22  ;;  %v261_v32 = vmul.bf16 %v204_v28, %v204_v28  ;;  %v930_v34 = vld [vmem:[%s189_s3 + $0x18] sm:$0xff] }
  0x14   : > { %973 = vmatprep.subr.bf16.mxu0 %v1295_v7  ;;  %v1388_v21 = vld [vmem:[%s1557_s0 + $0x8] sm:$0xff]   ;;  %v1404_v29 = vld [vmem:[%s189_s3 + $0x20] sm:$0xf]  ;;  %v504_v41 = vmul.bf16 %v930_v34, %v930_v34  ;;  %v606_v48 = vmul.bf16 %v930_v34, %v1390_v22 }
  0x15   : > { %v1392_v23 = vld [vmem:[%s189_s3 + $0xc] sm:$0x11]  ;;  %v202_v27 = vld [vmem:[%s189_s3 + $0x8] sm:$0xf]  ;;  %v1410_v33 = vld [vmem:[%s1557_s0 + $0x80] sm:$0xff]   ;;  %v505_v46 = vmul.bf16 %v1404_v29, %v1404_v29 }
  0x16   : > { %1067 = vmatpush3.bf16.msra.mxu1 %v1302_v8  ;;  %v260_v26 = vmul.bf16 %v1392_v23, %v1392_v23  ;;  %v933_v30 = vld [vmem:[%s189_s3 + $0x2c] sm:$0x1]  ;;  %v259_v31 = vmul.bf16 %v202_v27, %v202_v27  ;;  %v932_v35 = vld [vmem:[%s189_s3 + $0x24] sm:$0x11]  ;;  %v607_v37 = vmul.bf16 %v1404_v29, %v202_v27 }
  0x17   : > { %974 = vmatpush3.bf16.msra.mxu0 %v1309_v9  ;;  %1068 = vmatprep.subr.bf16.mxu1 %v1215_v1  ;;  %v609_v38 = vmul.bf16 %v933_v30, %v204_v28  ;;  %v1418_v39 = vld [vmem:[%s1557_s0] sm:$0xff]   ;;  %v506_v42 = vmul.bf16 %v932_v35, %v932_v35  ;;  %v507_v47 = vmul.bf16 %v933_v30, %v933_v30 }
  0x18   : > { %975 = vmatprep.subr.bf16.mxu0 %v1315_v10  ;;  %v935_v36 = vcombine.high %v258_v25, %v260_v26  ;;  %v936_v40 = vcombine.low %v259_v31, %v261_v32  ;;  %v934_v44 = vcombine.low %v258_v25, %v260_v26  ;;  %v608_v49 = vmul.bf16 %v932_v35, %v1392_v23 }
  0x19   : > { %v1421_v43 = vcombine.low %v607_v37, %v609_v38  ;;  %v962_v45 = vcombine.high %v504_v41, %v506_v42  ;;  %v963_v50 = vcombine.low %v505_v46, %v507_v47  ;;  %v961_v51 = vcombine.low %v504_v41, %v506_v42 }
  0x1a   : > { %1069 = vmatpush3.bf16.msra.mxu1 %v1321_v11  ;;  %454 = vmatprep.mubr.bf16.mxu0 %v935_v36  ;;  %v965_v52 = vcombine.high %v606_v48, %v608_v49  ;;  %v964_v53 = vcombine.low %v606_v48, %v608_v49 }
  0x1b   : > { %976 = vmatpush3.bf16.msra.mxu0 %v1328_v12  ;;  %1070 = vmatprep.subr.bf16.mxu1 %v1215_v1 }
  0x1c   : > { %977 = vmatprep.subr.bf16.mxu0 %v1334_v13 }
  0x1e   : > { %1071 = vmatpush3.bf16.msra.mxu1 %v1340_v14 }
  0x1f   : > { %978 = vmatpush3.bf16.msra.mxu0 %v1347_v15  ;;  %1072 = vmatprep.subr.bf16.mxu1 %v1215_v1 }
  0x20   : > { %979 = vmatprep.subr.bf16.mxu0 %v1353_v16 }
  0x22   : > { %1073 = vmatpush3.bf16.msra.mxu1 %v1359_v17 }
  0x23   : > { %980 = vmatpush3.bf16.msra.mxu0 %v1366_v18  ;;  %1074 = vmatprep.subr.bf16.mxu1 %v1215_v1 }
  0x24   : > { %981 = vmatprep.subr.bf16.mxu0 %v1372_v19 }
  0x26   : > { %1075 = vmatpush3.bf16.msra.mxu1 %v1381_v20 }
  0x27   : > { %982 = vmatpush3.bf16.msra.mxu0 %v1388_v21  ;;  %1076 = vmatprep.subr.bf16.mxu1 %v1215_v1 }
  0x28   : > { %983 = vmatprep.subr.bf16.mxu0 %v1398_v24 }
  0x2a   : > { %1077 = vmatpush3.bf16.msra.mxu1 %v1410_v33 }
  0x2b   : > { %984 = vmatpush3.bf16.msra.mxu0 %v1418_v39  ;;  %1082 = vmatprep.subr.bf16.mxu1 %v1215_v1 }
  0x2c   : > { %1000 = vmatprep.subr.bf16.mxu0 %v1257_v0 }
  0x2d   : > { %1079 = vmatmul.mubr.bf16.vlgmr.msra.gmra.mxu1 %v936_v40 }
  0x2e   : > { %455 = vmatmul.mubr.bf16.vlgmr.msra.gmra.mxu0 %v934_v44  ;;  %1083 = vmatpush3.bf16.msra.mxu1 %v1263_v2 }
  0x2f   : > { %1001 = vmatpush3.bf16.msra.mxu0 %v1269_v3  ;;  %1084 = vmatprep.subr.bf16.mxu1 %v1215_v1 }
  0x30   : > { %1002 = vmatprep.subr.bf16.mxu0 %v1277_v4  ;;  %1098 = vmatprep.mubr.msk.bf16.mxu1 %vm1216_vm0, %v1215_v1 }
  0x31   : > { %556 = vmatprep.mubr.bf16.mxu0 %v962_v45 }
  0x32   : > { %1085 = vmatpush3.bf16.msra.mxu1 %v1284_v5 }
  0x33   : > { %1003 = vmatpush3.bf16.msra.mxu0 %v1290_v6  ;;  %1086 = vmatprep.subr.bf16.mxu1 %v1215_v1 }
  0x34   : > { %1004 = vmatprep.subr.bf16.mxu0 %v1295_v7 }
  0x36   : > { %1087 = vmatpush3.bf16.msra.mxu1 %v1302_v8 }
  0x37   : > { %1005 = vmatpush3.bf16.msra.mxu0 %v1309_v9  ;;  %1088 = vmatprep.subr.bf16.mxu1 %v1215_v1 }
  0x38   : > { %1006 = vmatprep.subr.bf16.mxu0 %v1315_v10 }
  0x3a   : > { %1089 = vmatpush3.bf16.msra.mxu1 %v1321_v11 }
  0x3b   : > { %1007 = vmatpush3.bf16.msra.mxu0 %v1328_v12  ;;  %1090 = vmatprep.subr.bf16.mxu1 %v1215_v1 }
  0x3c   : > { %1008 = vmatprep.subr.bf16.mxu0 %v1334_v13 }
  0x3e   : > { %1091 = vmatpush3.bf16.msra.mxu1 %v1340_v14 }
  0x3f   : > { %1009 = vmatpush3.bf16.msra.mxu0 %v1347_v15  ;;  %1092 = vmatprep.subr.bf16.mxu1 %v1215_v1 }
  0x40   : > { %1010 = vmatprep.subr.bf16.mxu0 %v1353_v16 }
  0x42   : > { %1093 = vmatpush3.bf16.msra.mxu1 %v1359_v17 }
  0x43   : > { %1011 = vmatpush3.bf16.msra.mxu0 %v1366_v18  ;;  %1094 = vmatprep.subr.bf16.mxu1 %v1215_v1 }
  0x44   : > { %1012 = vmatprep.subr.bf16.mxu0 %v1372_v19 }
  0x46   : > { %1095 = vmatpush3.bf16.msra.mxu1 %v1381_v20 }
  0x47   : > { %1013 = vmatpush3.bf16.msra.mxu0 %v1388_v21  ;;  %1096 = vmatprep.subr.bf16.mxu1 %v1215_v1 }
  0x48   : > { %1014 = vmatprep.subr.bf16.mxu0 %v1398_v24 }
  0x4a   : > { %1097 = vmatpush3.bf16.msra.mxu1 %v1410_v33 }
  0x4b   : > { %1015 = vmatpush3.bf16.msra.mxu0 %v1418_v39  ;;  %1102 = vmatprep.subr.bf16.mxu1 %v1215_v1 }
  0x4c   : > { %1031 = vmatprep.subr.bf16.mxu0 %v1257_v0 }
  0x4d   : > { %1099 = vmatmul.mubr.bf16.vlgmr.msra.gmra.mxu1 %v963_v50 }
  0x4e   : > { %557 = vmatmul.mubr.bf16.vlgmr.msra.gmra.mxu0 %v961_v51  ;;  %1103 = vmatpush3.bf16.msra.mxu1 %v1263_v2 }
  0x4f   : > { %1032 = vmatpush3.bf16.msra.mxu0 %v1269_v3  ;;  %1104 = vmatprep.subr.bf16.mxu1 %v1215_v1 }
  0x50   : > { %1033 = vmatprep.subr.bf16.mxu0 %v1277_v4  ;;  %658 = vmatprep.mubr.bf16.mxu0 %v965_v52 }
  0x51   : > { %1118 = vmatprep.mubr.msk.bf16.mxu1 %vm1216_vm0, %v1215_v1 }
  0x52   : > { %1105 = vmatpush3.bf16.msra.mxu1 %v1284_v5 }
  0x53   : > { %1034 = vmatpush3.bf16.msra.mxu0 %v1290_v6  ;;  %1106 = vmatprep.subr.bf16.mxu1 %v1215_v1 }
  0x54   : > { %1035 = vmatprep.subr.bf16.mxu0 %v1295_v7 }
  0x56   : > { %1107 = vmatpush3.bf16.msra.mxu1 %v1302_v8 }
  0x57   : > { %1036 = vmatpush3.bf16.msra.mxu0 %v1309_v9  ;;  %1108 = vmatprep.subr.bf16.mxu1 %v1215_v1 }
  0x58   : > { %1037 = vmatprep.subr.bf16.mxu0 %v1315_v10 }
  0x5a   : > { %1109 = vmatpush3.bf16.msra.mxu1 %v1321_v11 }
  0x5b   : > { %1038 = vmatpush3.bf16.msra.mxu0 %v1328_v12  ;;  %1110 = vmatprep.subr.bf16.mxu1 %v1215_v1 }
  0x5c   : > { %1039 = vmatprep.subr.bf16.mxu0 %v1334_v13 }
  0x5e   : > { %1111 = vmatpush3.bf16.msra.mxu1 %v1340_v14 }
  0x5f   : > { %1040 = vmatpush3.bf16.msra.mxu0 %v1347_v15  ;;  %1112 = vmatprep.subr.bf16.mxu1 %v1215_v1 }
  0x60   : > { %1041 = vmatprep.subr.bf16.mxu0 %v1353_v16 }
  0x62   : > { %1113 = vmatpush3.bf16.msra.mxu1 %v1359_v17 }
  0x63   : > { %1042 = vmatpush3.bf16.msra.mxu0 %v1366_v18  ;;  %1114 = vmatprep.subr.bf16.mxu1 %v1215_v1 }
  0x64   : > { %1043 = vmatprep.subr.bf16.mxu0 %v1372_v19 }
  0x66   : > { %1115 = vmatpush3.bf16.msra.mxu1 %v1381_v20 }
  0x67   : > { %1044 = vmatpush3.bf16.msra.mxu0 %v1388_v21  ;;  %1116 = vmatprep.subr.bf16.mxu1 %v1215_v1 }
  0x68   : > { %1045 = vmatprep.subr.bf16.mxu0 %v1398_v24 }
  0x6a   : > { %1117 = vmatpush3.bf16.msra.mxu1 %v1410_v33 }
  0x6b   : > { %1046 = vmatpush3.bf16.msra.mxu0 %v1418_v39 }
  0x6d   : > { %1119 = vmatmul.mubr.bf16.vlgmr.msra.gmra.mxu1 %v1421_v43 }
  0x6e   : > { %659 = vmatmul.mubr.bf16.vlgmr.msra.gmra.mxu0 %v964_v53 }
  0xed   : > { %v497_v54 = vpop.f32.mrf.mxu1 }
  0xee   : > { %v985_v55 = vpop.f32.mrf.mxu0 }
  0xef   : > { %v1080_v56 = vpop.f32.mrf.mxu1 }
  0xf0   : > { %v986_v57 = vpop.f32.mrf.mxu0 }
  0xf1   : > { %v987_v58 = vadd.f32 %v986_v57, %v985_v55  ;;  %v500_v59 = vpop.f32.mrf.mxu1 }
  0xf2   : > { %v988_v60 = vpop.f32.mrf.mxu0 }
  0xf3   : > { %v1498_v61 = vadd.f32 %v987_v58, %v497_v54  ;;  %v1081_v62 = vpop.f32.mrf.mxu1 }
  0xf4   : > { %v989_v63 = vpop.f32.mrf.mxu0 }
  0xf5   : > { %1175 = vrsqrt.f32 %v1498_v61  ;;  %v990_v0 = vadd.f32 %v989_v63, %v988_v60  ;;  %vm710_vm1 = vcmp.eq.f32.partialorder %v1498_v61, inf  ;;  %v713_v4 = vand.u32 2147483648, %v1498_v61 }
  0xf6   : > { %vm712_vm2 = vcmp.eq.f32.partialorder %v1498_v61, 0.0 }
  0xf7   : > { %v1501_v1 = vadd.f32 %v990_v0, %v500_v59 }
  0xf9   : > { %1177 = vrsqrt.f32 %v1501_v1  ;;  %vm717_vm3 = vcmp.eq.f32.partialorder %v1501_v1, inf  ;;  %v720_v10 = vand.u32 2147483648, %v1501_v1  ;;  %vm719_vm4 = vcmp.eq.f32.partialorder %v1501_v1, 0.0 }
 0x102   : > { %v1176_v2 = vpop.eup %1175 }
 0x103   : > { %v709_v3 = vmul.f32 %v1176_v2, %v1498_v61 }
 0x105   : > { %v711_v5 = vsel %vm710_vm1, %v1498_v61, %v709_v3 }
 0x106   : > { %v1178_v6 = vpop.eup %1177  ;;  %v714_v7 = vsel %vm712_vm2, %v713_v4, %v711_v5 }
 0x107   : > { %v722_v8 = vadd.f32 1e-10, %v714_v7  ;;  %v716_v9 = vmul.f32 %v1178_v6, %v1501_v1 }
 0x109   : > { %1179 = vrcp.f32 %v722_v8  ;;  %v718_v11 = vsel %vm717_vm3, %v1501_v1, %v716_v9 }
 0x10a   : > { %v721_v12 = vsel %vm719_vm4, %v720_v10, %v718_v11 }
 0x10b   : > { %v723_v13 = vadd.f32 1e-10, %v721_v12 }
 0x10d   : > { %v599_v14 = vpop.f32.mrf.mxu1  ;;  %1181 = vrcp.f32 %v723_v13 }
 0x10e   : > { %v1016_v15 = vpop.f32.mrf.mxu0 }
 0x10f   : > { %v1100_v16 = vpop.f32.mrf.mxu1 }
 0x110   : > { %v1017_v17 = vpop.f32.mrf.mxu0 }
 0x111   : > { %v1018_v18 = vadd.f32 %v1017_v17, %v1016_v15  ;;  %v602_v19 = vpop.f32.mrf.mxu1 }
 0x112   : > { %v1019_v20 = vpop.f32.mrf.mxu0 }
 0x113   : > { %v1514_v21 = vadd.f32 %v1018_v18, %v599_v14  ;;  %v1101_v22 = vpop.f32.mrf.mxu1 }
 0x114   : > { %v1020_v23 = vpop.f32.mrf.mxu0 }
 0x115   : > { %1183 = vrsqrt.f32 %v1514_v21  ;;  %v1021_v24 = vadd.f32 %v1020_v23, %v1019_v20  ;;  %vm728_vm5 = vcmp.eq.f32.partialorder %v1514_v21, inf  ;;  %v731_v32 = vand.u32 2147483648, %v1514_v21 }
 0x116   : > { %v1180_v25 = vpop.eup %1179  ;;  %vm730_vm6 = vcmp.eq.f32.partialorder %v1514_v21, 0.0 }
 0x117   : > { %v1517_v26 = vadd.f32 %v1021_v24, %v602_v19  ;;  %v744_v27 = vmul.f32 %v1180_v25, %v1180_v25 }
 0x119   : > { %1185 = vrsqrt.f32 %v1517_v26  ;;  %748 = vrot.lane.b32.xlu0 %v744_v27, %s1217_s18  ;;  %vm735_vm7 = vcmp.eq.f32.partialorder %v1517_v26, inf  ;;  %v738_v38 = vand.u32 2147483648, %v1517_v26  ;;  %vm737_vm8 = vcmp.eq.f32.partialorder %v1517_v26, 0.0 }
 0x11a   : > { %v1182_v28 = vpop.eup %1181 }
 0x11b   : > { %v745_v29 = vmul.f32 %v1182_v28, %v1182_v28 }
 0x11d   : > { %750 = vrot.lane.b32.xlu0 %v745_v29, %s1217_s18 }
 0x122   : > { %v1184_v30 = vpop.eup %1183 }
 0x123   : > { %v727_v31 = vmul.f32 %v1184_v30, %v1514_v21 }
 0x125   : > { %v729_v33 = vsel %vm728_vm5, %v1514_v21, %v727_v31 }
 0x126   : > { %v1186_v34 = vpop.eup %1185  ;;  %v732_v35 = vsel %vm730_vm6, %v731_v32, %v729_v33 }
 0x127   : > { %v740_v36 = vadd.f32 1e-10, %v732_v35  ;;  %v734_v37 = vmul.f32 %v1186_v34, %v1517_v26 }
 0x129   : > { %1187 = vrcp.f32 %v740_v36  ;;  %v736_v39 = vsel %vm735_vm7, %v1517_v26, %v734_v37 }
 0x12a   : > { %v739_v40 = vsel %vm737_vm8, %v738_v38, %v736_v39 }
 0x12b   : > { %v741_v41 = vadd.f32 1e-10, %v739_v40 }
 0x12d   : > { %1189 = vrcp.f32 %v741_v41  ;;  %v701_v42 = vpop.f32.mrf.mxu1 }
 0x12e   : > { %v1047_v52 = vpop.f32.mrf.mxu0 }
 0x12f   : > { %v1120_v43 = vpop.f32.mrf.mxu1 }
 0x130   : > { %v1048_v53 = vpop.f32.mrf.mxu0 }
 0x131   : > { %v704_v44 = vpop.f32.mrf.mxu1  ;;  %v1049_v55 = vadd.f32 %v1048_v53, %v1047_v52 }
 0x132   : > { %v1050_v54 = vpop.f32.mrf.mxu0 }
 0x133   : > { %v1121_v45 = vpop.f32.mrf.mxu1  ;;  %v702_v58 = vadd.f32 %v1049_v55, %v701_v42 }
 0x134   : > { %v1051_v57 = vpop.f32.mrf.mxu0 }
 0x135   : > { %v1052_v59 = vadd.f32 %v1051_v57, %v1050_v54  ;;  %v756_v62 = vmul.f32 2.0, %v702_v58 }
 0x136   : > { %v1188_v46 = vpop.eup %1187 }
 0x137   : > { %v758_v47 = vmul.f32 %v1188_v46, %v1180_v25  ;;  %v772_v48 = vmul.f32 %v1188_v46, %v1188_v46  ;;  %v705_v63 = vadd.f32 %v1052_v59, %v704_v44 }
 0x139   : > { %762 = vrot.lane.b32.xlu1 %v758_v47, %s1217_s18  ;;  %776 = vrot.lane.b32.xlu0 %v772_v48, %s1217_s18  ;;  %v757_v5 = vmul.f32 2.0, %v705_v63 }
 0x13a   : > { %v1190_v49 = vpop.eup %1189 }
 0x13b   : > { %v759_v50 = vmul.f32 %v1190_v49, %v1182_v28  ;;  %v773_v51 = vmul.f32 %v1190_v49, %v1190_v49 }
 0x13d   : > { %764 = vrot.lane.b32.xlu1 %v759_v50, %s1217_s18 }
 0x141   : > { %778 = vrot.lane.b32.xlu1 %v773_v51, %s1217_s18 }
 0x18b   : > { %v749_v56 = vpop.permute.xlu0 %748 }
 0x18c   : > { %v754_v3 = vmul.f32 %v749_v56, %v1498_v61 }
 0x18f   : > { %v751_v60 = vpop.permute.xlu0 %750 }
 0x190   : > { %v755_v11 = vmul.f32 %v751_v60, %v1501_v1 }
 0x1ab   : > { %v763_v0 = vpop.permute.xlu1 %762  ;;  %v777_v2 = vpop.permute.xlu0 %776 }
 0x1ac   : > { %v768_v4 = vmul.f32 %v763_v0, %v756_v62  ;;  %v782_v7 = vmul.f32 %v777_v2, %v1514_v21 }
 0x1ae   : > { %v770_v6 = vsub.f32 %v754_v3, %v768_v4 }
 0x1af   : > { %v765_v8 = vpop.permute.xlu1 %764 }
 0x1b0   : > { %v784_v9 = vadd.f32 %v782_v7, %v770_v6  ;;  %v769_v10 = vmul.f32 %v765_v8, %v757_v5 }
 0x1b2   : > { %792 = vrot.lane.b32.xlu0 %v784_v9, %s1218_s19  ;;  %v771_v13 = vsub.f32 %v755_v11, %v769_v10 }
 0x1b3   : > { %v779_v12 = vpop.permute.xlu1 %778 }
 0x1b4   : > { %v783_v14 = vmul.f32 %v779_v12, %v1517_v26 }
 0x1b6   : > { %v785_v15 = vadd.f32 %v783_v14, %v771_v13 }
 0x1b8   : > { %794 = vrot.lane.b32.xlu1 %v785_v15, %s1218_s19 }
 0x224   : > { %v793_v61 = vpop.permute.xlu0 %792 }
 0x225   : > { %799 = vst.msk [vmem:[#allocation2] sm:$0xff] %vm798_vm9, %v793_v61 }
 0x22a   : > { %v795_v16 = vpop.permute.xlu1 %794 }
 0x22b   : > { %801 = vst.msk [vmem:[#allocation2 + $0x8] sm:$0x1] %vm800_vm10, %v795_v16 }
 0x22c   : > { %v825_v17 = vld [vmem:[#allocation2] sm:$0xff] }
 0x22d   : > { %v828_v1 = vsel %vm798_vm9, %v825_v17, 0.0 }
 0x232   : > { %v826_v18 = vld [vmem:[#allocation2 + $0x8] sm:$0x1] }
 0x233   : > { %v830_v19 = vsel %vm800_vm10, %v826_v18, 0.0 }
 0x234   : > { %v831_v20 = vadd.f32 %v830_v19, %v828_v1 }
 0x236   : > { %v832_v21 = vrot.slane %v831_v20, 4 }
 0x238   : > { %v833_v22 = vadd.f32 %v832_v21, %v831_v20 }
 0x23a   : > { %v834_v23 = vrot.slane %v833_v22, 2 }
 0x23c   : > { %v835_v24 = vadd.f32 %v834_v23, %v833_v22 }
 0x23e   : > { %v836_v25 = vrot.slane %v835_v24, 1 }
 0x240   : > { %v837_v26 = vadd.f32 %v836_v25, %v835_v24 }
 0x242   : > { %v838_v27 = vmul.f32 0.11111111, %v837_v26 }
 0x244   : > { %839 = vst.msk [vmem:[%s199_s22] sm:$0x1] %vm800_vm10, %v838_v27 }
 0x245 PF: > { %s12_s11 = sadd.s32 1, %s1213_s11   ;;  %s1560_s9 = smov %s1209_s10 }
 0x246   : > { %p9_p6 = scmp.ge.s32.totalorder %s12_s11, 4   ;;  %s1561_s10 = smov %s1563_s12 }
 0x248   :  { %11 = sbr.rel (!%p9_p6) target bundleno = 2 (0x2), region = 71 }

// kernel: _lambda_.6
= control target key start
LH: loop header
LB: loop body
LE: loop exit
PB: predicated region body
PF: predicated region fallthrough
CT: control target
= control target key end

     0   :  { %s1372_s9 = smov 0   ;;  %s1374_s10 = smov 0   ;;  %s1850_s0 = inlined_call_operand.vmem [shape: bf16[192,2], index: 0, kind: input, shape index: {}]   ;;  %s1851_s1 = inlined_call_operand.vmem [shape: bf16[4,49,192], index: 1, kind: input, shape index: {}]   ;;  %s1852_s2 = inlined_call_operand.vmem [shape: f32[1,2,1,1], index: 2, kind: output, shape index: {}]  }
   0x1   :  { %s1376_s11 = smov 0  }
   0x2 LB: > { %s27_s12 = sadd.s32 1, %s1348_s10  ;;  %p1150_p0 = scmp.ge.s32.totalorder %s1352_s11, 1  ;;  %s1352_s11 = sphi %s1376_s11, %s12_s11   ;;  %s1348_s10 = sphi %s1374_s10, %s1854_s10   ;;  %s1344_s9 = sphi %s1372_s9, %s1853_s9  }
   0x3   : > { %p29_p1 = scmp.ge.s32.totalorder %s27_s12, 2  ;;  %p147_p2 = scmp.lt.s32.totalorder %s1352_s11, 3 }
   0x5   : > { %s1856_s12 = smov (%p29_p1, %s27_s12), 0  ;;  %p148_p3 = pnand %p1150_p0, %p147_p2 }
   0x6   : > { %s1151_s15 = sshll.u32 (!%p148_p3), %s1344_s9, 1  ;;  %s1355_s18 = smov (!%p148_p3), 1  }
   0x7   : > { %151 = sbr.rel (%p148_p3) target bundleno = 595 (0x253), region = 28  ;;  %p181_p4 = scmp.lt.s32.totalorder (!%p148_p3), %s1151_s15, 3 }
   0x8   : > { %s1356_s19 = smov (!%p148_p3), 127   ;;  %p195_p5 = scmp.lt.s32.totalorder (!%p148_p3), %s1344_s9, 1 }
   0xc   : > { %v1395_v0 = vld [vmem:[%s1850_s0 + $0x38] sm:$0xff]   ;;  %v1354_v1 = vmov 0   ;;  %v1405_v2 = vld [vmem:[%s1850_s0 + $0x30] sm:$0xff]   ;;  %s1858_s15 = smov (!%p181_p4, %s1151_s15), 3  ;;  %v1414_v3 = vld [vmem:[%s1850_s0 + $0x28] sm:$0xff]   ;;  %vm352_vm0 = vcmask 523264  }
   0xd   : > { %365 = vmatprep.subr.bf16.mxu0 %v1354_v1  ;;  %481 = vmatprep.subr.bf16.mxu1 %v1354_v1  ;;  %s1234_s20 = smul.u32 56, %s1858_s15  ;;  %v1428_v4 = vld [vmem:[%s1850_s0 + $0x20] sm:$0xff]   ;;  %v1461_v12 = vld [vmem:[%s1850_s0 + $0x18] sm:$0xff]   ;;  %v1479_v16 = vld [vmem:[%s1850_s0 + $0x10] sm:$0xff]   ;;  %s1860_s9 = smov (!%p195_p5, %s1344_s9), 1 }
   0xe   : > { %366 = vmatpush1.bf16.msra.mxu0 %v1395_v0  ;;  %482 = vmatpush1.bf16.msra.mxu1 %v1395_v0  ;;  %v1489_v17 = vld [vmem:[%s1850_s0 + $0x8] sm:$0xff]   ;;  %v1498_v18 = vld [vmem:[%s1850_s0] sm:$0xff]   ;;  %v1507_v19 = vld [vmem:[%s1850_s0 + $0x58] sm:$0xff]   ;;  %s199_s22 = scalar_lea.vmem %s1852_s2, %s1860_s9 }
   0xf   : > { %367 = vmatprep.subr.bf16.mxu0 %v1354_v1  ;;  %483 = vmatprep.subr.bf16.mxu1 %v1354_v1  ;;  %s1421_s23 = scalar_lea.vmem %s1851_s1, %s1234_s20  ;;  %v1516_v20 = vld [vmem:[%s1850_s0 + $0x50] sm:$0xff]   ;;  %v1525_v21 = vld [vmem:[%s1850_s0 + $0x48] sm:$0xff]   ;;  %v1548_v27 = vld [vmem:[%s1850_s0 + $0x40] sm:$0xff]  }
  0x10   : > { %v1433_v5 = vld [vmem:[%s1421_s23] sm:$0xff]  ;;  %v1436_v6 = vld [vmem:[%s1421_s23 + $0x8] sm:$0xff]  ;;  %v1439_v7 = vld [vmem:[%s1421_s23 + $0x38] sm:$0xff] }
  0x11   : > { %v1443_v8 = vmul.bf16 %v1433_v5, %v1433_v5  ;;  %v1447_v9 = vmul.bf16 %v1436_v6, %v1436_v6  ;;  %v1450_v10 = vld [vmem:[%s1421_s23 + $0x40] sm:$0xff]  ;;  %v1454_v11 = vmul.bf16 %v1439_v7, %v1439_v7  ;;  %v1528_v22 = vld [vmem:[%s1421_s23 + $0x10] sm:$0xff]  ;;  %v1533_v23 = vld [vmem:[%s1421_s23 + $0x18] sm:$0xff]  ;;  %v545_v55 = vmul.bf16 %v1439_v7, %v1433_v5 }
  0x12   : > { %368 = vmatpush1.bf16.msra.mxu0 %v1405_v2  ;;  %484 = vmatpush1.bf16.msra.mxu1 %v1405_v2  ;;  %v1465_v13 = vmul.bf16 %v1450_v10, %v1450_v10  ;;  %v1536_v24 = vld [vmem:[%s1421_s23 + $0x48] sm:$0xff]  ;;  %v1539_v25 = vld [vmem:[%s1421_s23 + $0x50] sm:$0xff]  ;;  %v242_v26 = vmul.bf16 %v1528_v22, %v1528_v22  ;;  %v243_v28 = vmul.bf16 %v1533_v23, %v1533_v23  ;;  %v205_v35 = vld [vmem:[%s1421_s23 + $0x20] sm:$0xff] }
  0x13   : > { %369 = vmatprep.subr.bf16.mxu0 %v1354_v1  ;;  %485 = vmatprep.subr.bf16.mxu1 %v1354_v1  ;;  %v1161_v14 = vcombine.high %v1443_v8, %v1447_v9  ;;  %v431_v29 = vmul.bf16 %v1536_v24, %v1536_v24  ;;  %v432_v30 = vmul.bf16 %v1539_v25, %v1539_v25  ;;  %v206_v36 = vld [vmem:[%s1421_s23 + $0x28] sm:$0xff]  ;;  %v1157_v37 = vld [vmem:[%s1421_s23 + $0x58] sm:$0xff]  ;;  %v1158_v38 = vld [vmem:[%s1421_s23 + $0x60] sm:$0xff] }
  0x14   : > { %v1185_v15 = vcombine.high %v1454_v11, %v1465_v13  ;;  %v1160_v31 = vcombine.low %v1443_v8, %v1447_v9  ;;  %v1184_v32 = vcombine.low %v1454_v11, %v1465_v13  ;;  %v1163_v33 = vcombine.high %v242_v26, %v243_v28  ;;  %v1577_v47 = vld [vmem:[%s1421_s23 + $0x30] sm:$0x11]  ;;  %v1580_v48 = vld [vmem:[%s1421_s23 + $0x68] sm:$0x11] }
  0x15   : > { %1180 = vmatprep.mubr.msk.bf16.mxu0 %vm352_vm0, %v1161_v14  ;;  %v1187_v34 = vcombine.high %v431_v29, %v432_v30  ;;  %v244_v39 = vmul.bf16 %v205_v35, %v205_v35  ;;  %v245_v40 = vmul.bf16 %v206_v36, %v206_v36  ;;  %v433_v41 = vmul.bf16 %v1157_v37, %v1157_v37 }
  0x16   : > { %370 = vmatpush1.bf16.msra.mxu0 %v1414_v3  ;;  %486 = vmatpush1.bf16.msra.mxu1 %v1414_v3  ;;  %v434_v42 = vmul.bf16 %v1158_v38, %v1158_v38  ;;  %v1162_v43 = vcombine.low %v242_v26, %v243_v28  ;;  %v1186_v44 = vcombine.low %v431_v29, %v432_v30 }
  0x17   : > { %371 = vmatprep.subr.bf16.mxu0 %v1354_v1  ;;  %487 = vmatprep.subr.bf16.mxu1 %v1354_v1  ;;  %v1165_v45 = vcombine.high %v244_v39, %v245_v40  ;;  %v246_v49 = vmul.bf16 %v1577_v47, %v1577_v47  ;;  %v435_v50 = vmul.bf16 %v1580_v48, %v1580_v48 }
  0x18   : > { %1192 = vmatprep.mubr.msk.bf16.mxu1 %vm352_vm0, %v1185_v15  ;;  %v1189_v46 = vcombine.high %v433_v41, %v434_v42  ;;  %v1164_v51 = vcombine.low %v244_v39, %v245_v40  ;;  %v1188_v52 = vcombine.low %v433_v41, %v434_v42  ;;  %v546_v56 = vmul.bf16 %v1450_v10, %v1436_v6 }
  0x19   : > { %v1167_v53 = vcombine.high %v246_v49, %v246_v49  ;;  %v1191_v54 = vcombine.high %v435_v50, %v435_v50  ;;  %v549_v57 = vmul.bf16 %v1157_v37, %v205_v35  ;;  %v550_v58 = vmul.bf16 %v1158_v38, %v206_v36 }
  0x1a   : > { %372 = vmatpush1.bf16.msra.mxu0 %v1428_v4  ;;  %488 = vmatpush1.bf16.msra.mxu1 %v1428_v4  ;;  %v1166_v59 = vcombine.low %v246_v49, %v246_v49  ;;  %v1190_v60 = vcombine.low %v435_v50, %v435_v50  ;;  %v1197_v61 = vcombine.high %v545_v55, %v546_v56 }
  0x1b   : > { %373 = vmatprep.subr.bf16.mxu0 %v1354_v1  ;;  %489 = vmatprep.subr.bf16.mxu1 %v1354_v1  ;;  %v1201_v62 = vcombine.high %v549_v57, %v550_v58  ;;  %v547_v63 = vmul.bf16 %v1536_v24, %v1528_v22 }
  0x1e   : > { %374 = vmatpush1.bf16.msra.mxu0 %v1461_v12  ;;  %490 = vmatpush1.bf16.msra.mxu1 %v1461_v12 }
  0x1f   : > { %375 = vmatprep.subr.bf16.mxu0 %v1354_v1  ;;  %491 = vmatprep.subr.bf16.mxu1 %v1354_v1 }
  0x22   : > { %376 = vmatpush1.bf16.msra.mxu0 %v1479_v16  ;;  %492 = vmatpush1.bf16.msra.mxu1 %v1479_v16 }
  0x23   : > { %377 = vmatprep.subr.bf16.mxu0 %v1354_v1  ;;  %493 = vmatprep.subr.bf16.mxu1 %v1354_v1 }
  0x26   : > { %378 = vmatpush1.bf16.msra.mxu0 %v1489_v17  ;;  %494 = vmatpush1.bf16.msra.mxu1 %v1489_v17 }
  0x27   : > { %379 = vmatprep.subr.bf16.mxu0 %v1354_v1  ;;  %495 = vmatprep.subr.bf16.mxu1 %v1354_v1 }
  0x2a   : > { %380 = vmatpush1.bf16.msra.mxu0 %v1498_v18  ;;  %496 = vmatpush1.bf16.msra.mxu1 %v1498_v18 }
  0x2b   : > { %389 = vmatprep.subr.bf16.mxu0 %v1354_v1  ;;  %505 = vmatprep.subr.bf16.mxu1 %v1354_v1 }
  0x2e   : > { %390 = vmatpush2.bf16.msra.mxu0 %v1507_v19  ;;  %506 = vmatpush2.bf16.msra.mxu1 %v1507_v19 }
  0x2f   : > { %391 = vmatprep.subr.bf16.mxu0 %v1354_v1  ;;  %507 = vmatprep.subr.bf16.mxu1 %v1354_v1 }
  0x32   : > { %392 = vmatpush2.bf16.msra.mxu0 %v1516_v20  ;;  %508 = vmatpush2.bf16.msra.mxu1 %v1516_v20 }
  0x33   : > { %393 = vmatprep.subr.bf16.mxu0 %v1354_v1  ;;  %509 = vmatprep.subr.bf16.mxu1 %v1354_v1 }
  0x36   : > { %394 = vmatpush2.bf16.msra.mxu0 %v1525_v21  ;;  %510 = vmatpush2.bf16.msra.mxu1 %v1525_v21 }
  0x37   : > { %395 = vmatprep.subr.bf16.mxu0 %v1354_v1  ;;  %511 = vmatprep.subr.bf16.mxu1 %v1354_v1 }
  0x3a   : > { %396 = vmatpush2.bf16.msra.mxu0 %v1548_v27  ;;  %512 = vmatpush2.bf16.msra.mxu1 %v1548_v27 }
  0x3b   : > { %597 = vmatprep.subr.bf16.mxu0 %v1354_v1  ;;  %1210 = vmatprep.subr.bf16.mxu1 %v1354_v1 }
  0x3d   : > { %398 = vmatmul.mubr.bf16.vlgmr.msra.gmra.mxu0 %v1160_v31  ;;  %514 = vmatmul.mubr.bf16.vlgmr.msra.gmra.mxu1 %v1184_v32 }
  0x3e   : > { %1181 = vmatprep.mubr.msk.bf16.mxu0 %vm352_vm0, %v1163_v33  ;;  %1193 = vmatprep.mubr.msk.bf16.mxu1 %vm352_vm0, %v1187_v34 }
  0x3f   : > { %598 = vmatpush1.bf16.msra.mxu0 %v1395_v0  ;;  %1222 = vmatpush1.bf16.msra.mxu1 %v1395_v0  ;;  %v548_v0 = vmul.bf16 %v1539_v25, %v1533_v23 }
  0x40   : > { %599 = vmatprep.subr.bf16.mxu0 %v1354_v1  ;;  %1211 = vmatprep.subr.bf16.mxu1 %v1354_v1 }
  0x41   : > { %v1199_v5 = vcombine.high %v547_v63, %v548_v0  ;;  %v1198_v7 = vcombine.low %v547_v63, %v548_v0 }
  0x43   : > { %600 = vmatpush1.bf16.msra.mxu0 %v1405_v2  ;;  %1223 = vmatpush1.bf16.msra.mxu1 %v1405_v2  ;;  %v551_v2 = vmul.bf16 %v1580_v48, %v1577_v47 }
  0x44   : > { %601 = vmatprep.subr.bf16.mxu0 %v1354_v1  ;;  %1212 = vmatprep.subr.bf16.mxu1 %v1354_v1 }
  0x45   : > { %406 = vmatmul.mubr.bf16.gmra.mxu0 %v1162_v43  ;;  %522 = vmatmul.mubr.bf16.gmra.mxu1 %v1186_v44  ;;  %v1203_v6 = vcombine.high %v551_v2, %v551_v2  ;;  %v1202_v8 = vcombine.low %v551_v2, %v551_v2 }
  0x46   : > { %1182 = vmatprep.mubr.msk.bf16.mxu0 %vm352_vm0, %v1165_v45  ;;  %1194 = vmatprep.mubr.msk.bf16.mxu1 %vm352_vm0, %v1189_v46 }
  0x47   : > { %602 = vmatpush1.bf16.msra.mxu0 %v1414_v3  ;;  %1224 = vmatpush1.bf16.msra.mxu1 %v1414_v3  ;;  %v1196_v3 = vcombine.low %v545_v55, %v546_v56 }
  0x48   : > { %603 = vmatprep.subr.bf16.mxu0 %v1354_v1  ;;  %1213 = vmatprep.subr.bf16.mxu1 %v1354_v1 }
  0x4b   : > { %604 = vmatpush1.bf16.msra.mxu0 %v1428_v4  ;;  %1225 = vmatpush1.bf16.msra.mxu1 %v1428_v4  ;;  %v1200_v4 = vcombine.low %v549_v57, %v550_v58 }
  0x4c   : > { %605 = vmatprep.subr.bf16.mxu0 %v1354_v1  ;;  %1214 = vmatprep.subr.bf16.mxu1 %v1354_v1 }
  0x4d   : > { %414 = vmatmul.mubr.bf16.gmra.mxu0 %v1164_v51  ;;  %530 = vmatmul.mubr.bf16.gmra.mxu1 %v1188_v52 }
  0x4e   : > { %1183 = vmatprep.mubr.msk.bf16.mxu0 %vm352_vm0, %v1167_v53  ;;  %1195 = vmatprep.mubr.msk.bf16.mxu1 %vm352_vm0, %v1191_v54 }
  0x4f   : > { %606 = vmatpush1.bf16.msra.mxu0 %v1461_v12  ;;  %1226 = vmatpush1.bf16.msra.mxu1 %v1461_v12 }
  0x50   : > { %607 = vmatprep.subr.bf16.mxu0 %v1354_v1  ;;  %1215 = vmatprep.subr.bf16.mxu1 %v1354_v1 }
  0x53   : > { %608 = vmatpush1.bf16.msra.mxu0 %v1479_v16  ;;  %1227 = vmatpush1.bf16.msra.mxu1 %v1479_v16 }
  0x54   : > { %609 = vmatprep.subr.bf16.mxu0 %v1354_v1  ;;  %1216 = vmatprep.subr.bf16.mxu1 %v1354_v1 }
  0x55   : > { %422 = vmatmul.mubr.bf16.gmra.mxu0 %v1166_v59  ;;  %538 = vmatmul.mubr.bf16.gmra.mxu1 %v1190_v60 }
  0x56   : > { %1204 = vmatprep.mubr.msk.bf16.mxu0 %vm352_vm0, %v1197_v61  ;;  %1206 = vmatprep.mubr.msk.bf16.mxu1 %vm352_vm0, %v1201_v62 }
  0x57   : > { %610 = vmatpush1.bf16.msra.mxu0 %v1489_v17  ;;  %1228 = vmatpush1.bf16.msra.mxu1 %v1489_v17 }
  0x58   : > { %611 = vmatprep.subr.bf16.mxu0 %v1354_v1  ;;  %1217 = vmatprep.subr.bf16.mxu1 %v1354_v1 }
  0x5b   : > { %612 = vmatpush1.bf16.msra.mxu0 %v1498_v18  ;;  %1229 = vmatpush1.bf16.msra.mxu1 %v1498_v18 }
  0x5c   : > { %621 = vmatprep.subr.bf16.mxu0 %v1354_v1  ;;  %1218 = vmatprep.subr.bf16.mxu1 %v1354_v1 }
  0x5f   : > { %622 = vmatpush2.bf16.msra.mxu0 %v1507_v19  ;;  %1230 = vmatpush2.bf16.msra.mxu1 %v1507_v19 }
  0x60   : > { %623 = vmatprep.subr.bf16.mxu0 %v1354_v1  ;;  %1219 = vmatprep.subr.bf16.mxu1 %v1354_v1 }
  0x63   : > { %624 = vmatpush2.bf16.msra.mxu0 %v1516_v20  ;;  %1231 = vmatpush2.bf16.msra.mxu1 %v1516_v20 }
  0x64   : > { %625 = vmatprep.subr.bf16.mxu0 %v1354_v1  ;;  %1220 = vmatprep.subr.bf16.mxu1 %v1354_v1 }
  0x67   : > { %626 = vmatpush2.bf16.msra.mxu0 %v1525_v21  ;;  %1232 = vmatpush2.bf16.msra.mxu1 %v1525_v21 }
  0x68   : > { %627 = vmatprep.subr.bf16.mxu0 %v1354_v1  ;;  %1221 = vmatprep.subr.bf16.mxu1 %v1354_v1 }
  0x6b   : > { %628 = vmatpush2.bf16.msra.mxu0 %v1548_v27  ;;  %1233 = vmatpush2.bf16.msra.mxu1 %v1548_v27 }
  0x6e   : > { %630 = vmatmul.mubr.bf16.vlgmr.msra.gmra.mxu0 %v1196_v3  ;;  %646 = vmatmul.mubr.bf16.vlgmr.msra.gmra.mxu1 %v1200_v4 }
  0x6f   : > { %1205 = vmatprep.mubr.msk.bf16.mxu0 %vm352_vm0, %v1199_v5  ;;  %1207 = vmatprep.mubr.msk.bf16.mxu1 %vm352_vm0, %v1203_v6 }
  0x76   : > { %638 = vmatmul.mubr.bf16.gmra.mxu0 %v1198_v7  ;;  %654 = vmatmul.mubr.bf16.gmra.mxu1 %v1202_v8 }
  0xfd   : > { %v1646_v9 = vpop.f32.mrf.mxu0  ;;  %v1648_v1 = vpop.f32.mrf.mxu1 }
  0xfe   : > { %1274 = vrsqrt.f32 %v1646_v9  ;;  %vm663_vm1 = vcmp.eq.f32.partialorder %v1646_v9, inf  ;;  %v666_v36 = vand.u32 2147483648, %v1646_v9  ;;  %vm665_vm3 = vcmp.eq.f32.partialorder %v1646_v9, 0.0 }
  0xff   : > { %v401_v10 = vpop.f32.mrf.mxu0  ;;  %v517_v11 = vpop.f32.mrf.mxu1  ;;  %1276 = vrsqrt.f32 %v1648_v1  ;;  %vm726_vm5 = vcmp.eq.f32.partialorder %v1648_v1, inf  ;;  %v729_v51 = vand.u32 2147483648, %v1648_v1  ;;  %vm728_vm8 = vcmp.eq.f32.partialorder %v1648_v1, 0.0 }
 0x101   : > { %v1652_v12 = vpop.f32.mrf.mxu0  ;;  %v1654_v13 = vpop.f32.mrf.mxu1 }
 0x102   : > { %1278 = vrsqrt.f32 %v1652_v12  ;;  %vm670_vm2 = vcmp.eq.f32.partialorder %v1652_v12, inf  ;;  %v673_v41 = vand.u32 2147483648, %v1652_v12  ;;  %vm733_vm4 = vcmp.eq.f32.partialorder %v1654_v13, inf }
 0x103   : > { %1280 = vrsqrt.f32 %v1654_v13  ;;  %v404_v14 = vpop.f32.mrf.mxu0  ;;  %v520_v15 = vpop.f32.mrf.mxu1  ;;  %vm672_vm6 = vcmp.eq.f32.partialorder %v1652_v12, 0.0  ;;  %v736_v49 = vand.u32 2147483648, %v1654_v13  ;;  %vm735_vm7 = vcmp.eq.f32.partialorder %v1654_v13, 0.0 }
 0x105   : > { %v1658_v16 = vpop.f32.mrf.mxu0  ;;  %v1660_v17 = vpop.f32.mrf.mxu1 }
 0x106   : > { %1282 = vrsqrt.f32 %v1658_v16  ;;  %vm677_vm9 = vcmp.eq.f32.partialorder %v1658_v16, inf  ;;  %v680_v6 = vand.u32 2147483648, %v1658_v16  ;;  %vm740_vm10 = vcmp.eq.f32.partialorder %v1660_v17, inf }
 0x107   : > { %v409_v18 = vpop.f32.mrf.mxu0  ;;  %v525_v19 = vpop.f32.mrf.mxu1  ;;  %1284 = vrsqrt.f32 %v1660_v17  ;;  %vm679_vm11 = vcmp.eq.f32.partialorder %v1658_v16, 0.0  ;;  %vm742_vm12 = vcmp.eq.f32.partialorder %v1660_v17, 0.0 }
 0x108   : > { %v743_v19 = vand.u32 2147483648, %v1660_v17 }
 0x109   : > { %v1664_v20 = vpop.f32.mrf.mxu0  ;;  %v1666_v21 = vpop.f32.mrf.mxu1 }
 0x10a   : > { %1286 = vrsqrt.f32 %v1664_v20  ;;  %vm684_vm13 = vcmp.eq.f32.partialorder %v1664_v20, inf  ;;  %vm747_vm14 = vcmp.eq.f32.partialorder %v1666_v21, inf  ;;  %vm686_vm15 = vcmp.eq.f32.partialorder %v1664_v20, 0.0 }
 0x10b   : > { %v1275_v22 = vpop.eup %1274  ;;  %v412_v23 = vpop.f32.mrf.mxu0  ;;  %1288 = vrsqrt.f32 %v1666_v21  ;;  %vm749_vm0 = vcmp.eq.f32.partialorder %v1666_v21, 0.0 }
 0x10c   : > { %v528_v24 = vpop.f32.mrf.mxu1  ;;  %v662_v25 = vmul.f32 %v1275_v22, %v1646_v9  ;;  %v1277_v26 = vpop.eup %1276 }
 0x10d   : > { %v1671_v27 = vpop.f32.mrf.mxu0  ;;  %v725_v34 = vmul.f32 %v1277_v26, %v1648_v1  ;;  %v687_v26 = vand.u32 2147483648, %v1664_v20 }
 0x10e   : > { %v1673_v28 = vpop.f32.mrf.mxu1  ;;  %v664_v33 = vsel %vm663_vm1, %v1646_v9, %v662_v25  ;;  %1290 = vrsqrt.f32 %v1671_v27  ;;  %vm691_vm1 = vcmp.eq.f32.partialorder %v1671_v27, inf }
 0x10f   : > { %v1279_v29 = vpop.eup %1278  ;;  %v417_v30 = vpop.f32.mrf.mxu0  ;;  %1292 = vrsqrt.f32 %v1673_v28  ;;  %v667_v46 = vsel %vm665_vm3, %v666_v36, %v664_v33  ;;  %v727_v47 = vsel %vm726_vm5, %v1648_v1, %v725_v34  ;;  %vm693_vm3 = vcmp.eq.f32.partialorder %v1671_v27, 0.0 }
 0x110   : > { %v533_v31 = vpop.f32.mrf.mxu1  ;;  %v1281_v32 = vpop.eup %1280  ;;  %v669_v35 = vmul.f32 %v1279_v29, %v1652_v12  ;;  %v710_v56 = vadd.f32 1e-10, %v667_v46  ;;  %v730_v60 = vsel %vm728_vm8, %v729_v51, %v727_v47  ;;  %v750_v30 = vand.u32 2147483648, %v1666_v21 }
 0x111   : > { %v732_v37 = vmul.f32 %v1281_v32, %v1654_v13  ;;  %v1684_v38 = vpop.f32.mrf.mxu0  ;;  %v773_v5 = vadd.f32 1e-10, %v730_v60  ;;  %v757_v46 = vand.u32 2147483648, %v1673_v28 }
 0x112   : > { %v1686_v39 = vpop.f32.mrf.mxu1  ;;  %v671_v40 = vsel %vm670_vm2, %v1652_v12, %v669_v35  ;;  %1294 = vrsqrt.f32 %v1684_v38  ;;  %vm754_vm2 = vcmp.eq.f32.partialorder %v1673_v28, inf  ;;  %vm698_vm5 = vcmp.eq.f32.partialorder %v1684_v38, inf }
 0x113   : > { %v1283_v42 = vpop.eup %1282  ;;  %v734_v43 = vsel %vm733_vm4, %v1654_v13, %v732_v37  ;;  %v420_v44 = vpop.f32.mrf.mxu0  ;;  %v674_v48 = vsel %vm672_vm6, %v673_v41, %v671_v40  ;;  %1296 = vrsqrt.f32 %v1686_v39  ;;  %vm756_vm4 = vcmp.eq.f32.partialorder %v1673_v28, 0.0 }
 0x114   : > { %v536_v45 = vpop.f32.mrf.mxu1  ;;  %v1285_v50 = vpop.eup %1284  ;;  %v737_v54 = vsel %vm735_vm7, %v736_v49, %v734_v43  ;;  %v676_v55 = vmul.f32 %v1283_v42, %v1658_v16  ;;  %v711_v57 = vadd.f32 1e-10, %v674_v48  ;;  %vm761_vm6 = vcmp.eq.f32.partialorder %v1686_v39, inf }
 0x115   : > { %v1699_v52 = vpop.f32.mrf.mxu0  ;;  %v739_v62 = vmul.f32 %v1285_v50, %v1660_v17  ;;  %v774_v0 = vadd.f32 1e-10, %v737_v54  ;;  %v694_v45 = vand.u32 2147483648, %v1671_v27  ;;  %vm700_vm7 = vcmp.eq.f32.partialorder %v1684_v38, 0.0 }
 0x116   : > { %v1701_v53 = vpop.f32.mrf.mxu1  ;;  %1298 = vrsqrt.f32 %v1699_v52  ;;  %v678_v4 = vsel %vm677_vm9, %v1658_v16, %v676_v55  ;;  %vm763_vm8 = vcmp.eq.f32.partialorder %v1686_v39, 0.0  ;;  %vm705_vm9 = vcmp.eq.f32.partialorder %v1699_v52, inf }
 0x117   : > { %v425_v58 = vpop.f32.mrf.mxu0  ;;  %v1287_v61 = vpop.eup %1286  ;;  %1300 = vrcp.f32 %v710_v56  ;;  %v741_v11 = vsel %vm740_vm10, %v1660_v17, %v739_v62  ;;  %v681_v18 = vsel %vm679_vm11, %v680_v6, %v678_v4  ;;  %vm768_vm10 = vcmp.eq.f32.partialorder %v1701_v53, inf }
 0x118   : > { %v541_v59 = vpop.f32.mrf.mxu1  ;;  %v1289_v63 = vpop.eup %1288  ;;  %v683_v7 = vmul.f32 %v1287_v61, %v1664_v20  ;;  %1302 = vrcp.f32 %v711_v57  ;;  %v744_v23 = vsel %vm742_vm12, %v743_v19, %v741_v11  ;;  %v712_v25 = vadd.f32 1e-10, %v681_v18 }
 0x119   : > { %v426_v2 = vpop.f32.mrf.mxu0  ;;  %v746_v14 = vmul.f32 %v1289_v63, %v1666_v21  ;;  %1304 = vrcp.f32 %v773_v5  ;;  %v775_v33 = vadd.f32 1e-10, %v744_v23  ;;  %v701_v58 = vand.u32 2147483648, %v1684_v38 }
 0x11a   : > { %v542_v3 = vpop.f32.mrf.mxu1  ;;  %1306 = vrcp.f32 %v774_v0  ;;  %v685_v24 = vsel %vm684_vm13, %v1664_v20, %v683_v7  ;;  %v764_v5 = vand.u32 2147483648, %v1686_v39  ;;  %vm707_vm11 = vcmp.eq.f32.partialorder %v1699_v52, 0.0 }
 0x11b   : > { %v427_v8 = vpop.f32.mrf.mxu0  ;;  %v1291_v15 = vpop.eup %1290  ;;  %1308 = vrsqrt.f32 %v1701_v53  ;;  %v748_v29 = vsel %vm747_vm14, %v1666_v21, %v746_v14  ;;  %v688_v34 = vsel %vm686_vm15, %v687_v26, %v685_v24  ;;  %vm770_vm12 = vcmp.eq.f32.partialorder %v1701_v53, 0.0 }
 0x11c   : > { %v543_v10 = vpop.f32.mrf.mxu1  ;;  %v1293_v22 = vpop.eup %1292  ;;  %v690_v31 = vmul.f32 %v1291_v15, %v1671_v27  ;;  %v751_v35 = vsel %vm749_vm0, %v750_v30, %v748_v29  ;;  %1310 = vrcp.f32 %v712_v25  ;;  %v713_v40 = vadd.f32 1e-10, %v688_v34 }
 0x11d   : > { %v753_v32 = vmul.f32 %v1293_v22, %v1673_v28  ;;  %v776_v44 = vadd.f32 1e-10, %v751_v35  ;;  %1312 = vrcp.f32 %v775_v33  ;;  %v708_v22 = vand.u32 2147483648, %v1699_v52 }
 0x11e   : > { %v692_v41 = vsel %vm691_vm1, %v1671_v27, %v690_v31  ;;  %1314 = vrcp.f32 %v713_v40  ;;  %v771_v31 = vand.u32 2147483648, %v1701_v53  ;;  %vm966_vm13 = vcmask 7168  }
 0x11f   : > { %v1295_v36 = vpop.eup %1294  ;;  %v755_v42 = vsel %vm754_vm2, %v1673_v28, %v753_v32  ;;  %v695_v50 = vsel %vm693_vm3, %v694_v45, %v692_v41  ;;  %1316 = vrcp.f32 %v776_v44  ;;  %vm973_vm14 = vcmask 0  }
 0x120   : > { %v1297_v37 = vpop.eup %1296  ;;  %v697_v48 = vmul.f32 %v1295_v36, %v1684_v38  ;;  %v758_v51 = vsel %vm756_vm4, %v757_v46, %v755_v42  ;;  %v714_v61 = vadd.f32 1e-10, %v695_v50 }
 0x121   : > { %v760_v54 = vmul.f32 %v1297_v37, %v1686_v39  ;;  %v777_v62 = vadd.f32 1e-10, %v758_v51 }
 0x122   : > { %v699_v63 = vsel %vm698_vm5, %v1684_v38, %v697_v48  ;;  %1318 = vrcp.f32 %v714_v61 }
 0x123   : > { %v1299_v43 = vpop.eup %1298  ;;  %v762_v0 = vsel %vm761_vm6, %v1686_v39, %v760_v54  ;;  %v702_v6 = vsel %vm700_vm7, %v701_v58, %v699_v63  ;;  %1320 = vrcp.f32 %v777_v62 }
 0x124   : > { %v1301_v47 = vpop.eup %1300  ;;  %v704_v2 = vmul.f32 %v1299_v43, %v1699_v52  ;;  %v765_v10 = vsel %vm763_vm8, %v764_v5, %v762_v0  ;;  %v715_v19 = vadd.f32 1e-10, %v702_v6 }
 0x125   : > { %v1303_v49 = vpop.eup %1302  ;;  %v787_v55 = vmul.f32 %v1301_v47, %v1301_v47  ;;  %v778_v23 = vadd.f32 1e-10, %v765_v10 }
 0x126   : > { %v1305_v56 = vpop.eup %1304  ;;  %v706_v11 = vsel %vm705_vm9, %v1699_v52, %v704_v2  ;;  %v788_v14 = vmul.f32 %v1303_v49, %v1303_v49  ;;  %1322 = vrcp.f32 %v715_v19 }
 0x127   : > { %v1307_v57 = vpop.eup %1306  ;;  %v836_v59 = vmul.f32 %v1305_v56, %v1301_v47  ;;  %801 = vrot.lane.b32.xlu0 %v787_v55, %s1355_s18  ;;  %v885_v3 = vmul.f32 %v1305_v56, %v1305_v56  ;;  %v709_v30 = vsel %vm707_vm11, %v708_v22, %v706_v11  ;;  %1324 = vrcp.f32 %v778_v23 }
 0x128   : > { %v1309_v60 = vpop.eup %1308  ;;  %v837_v4 = vmul.f32 %v1307_v57, %v1303_v49  ;;  %v886_v25 = vmul.f32 %v1307_v57, %v1307_v57  ;;  %v716_v40 = vadd.f32 1e-10, %v709_v30 }
 0x129   : > { %850 = vrot.lane.b32.xlu1 %v836_v59, %s1355_s18  ;;  %v767_v7 = vmul.f32 %v1309_v60, %v1701_v53  ;;  %v1311_v18 = vpop.eup %1310 }
 0x12a   : > { %v1313_v29 = vpop.eup %1312  ;;  %v789_v33 = vmul.f32 %v1311_v18, %v1311_v18  ;;  %1326 = vrcp.f32 %v716_v40 }
 0x12b   : > { %899 = vrot.lane.b32.xlu0 %v885_v3, %s1355_s18  ;;  %v769_v24 = vsel %vm768_vm10, %v1701_v53, %v767_v7  ;;  %v1315_v37 = vpop.eup %1314  ;;  %v838_v41 = vmul.f32 %v1313_v29, %v1311_v18  ;;  %v887_v45 = vmul.f32 %v1313_v29, %v1313_v29 }
 0x12c   : > { %v772_v35 = vsel %vm770_vm12, %v771_v31, %v769_v24  ;;  %v1317_v43 = vpop.eup %1316  ;;  %v790_v54 = vmul.f32 %v1315_v37, %v1315_v37 }
 0x12d   : > { %852 = vrot.lane.b32.xlu1 %v837_v4, %s1355_s18  ;;  %v779_v44 = vadd.f32 1e-10, %v772_v35  ;;  %v839_v48 = vmul.f32 %v1317_v43, %v1315_v37  ;;  %v888_v58 = vmul.f32 %v1317_v43, %v1317_v43 }
 0x12e   : > { %v1753_v8 = vpop.f32.mrf.mxu0  ;;  %v1766_v32 = vpop.f32.mrf.mxu1 }
 0x12f   : > { %803 = vrot.lane.b32.xlu0 %v788_v14, %s1355_s18  ;;  %v1319_v51 = vpop.eup %1318  ;;  %1328 = vrcp.f32 %v779_v44  ;;  %v829_v18 = vmul.f32 2.0, %v1753_v8 }
 0x130   : > { %v633_v15 = vpop.f32.mrf.mxu0  ;;  %v649_v36 = vpop.f32.mrf.mxu1  ;;  %v791_v63 = vmul.f32 %v1319_v51, %v1319_v51 }
 0x131   : > { %901 = vrot.lane.b32.xlu1 %v886_v25, %s1355_s18  ;;  %v1321_v57 = vpop.eup %1320 }
 0x132   : > { %v1763_v26 = vpop.f32.mrf.mxu0  ;;  %v1774_v47 = vpop.f32.mrf.mxu1  ;;  %v840_v60 = vmul.f32 %v1321_v57, %v1319_v51  ;;  %v889_v3 = vmul.f32 %v1321_v57, %v1321_v57 }
 0x133   : > { %805 = vrot.lane.b32.xlu0 %v789_v33, %s1355_s18  ;;  %v1323_v62 = vpop.eup %1322  ;;  %v830_v30 = vmul.f32 2.0, %v1763_v26 }
 0x134   : > { %v636_v34 = vpop.f32.mrf.mxu0  ;;  %v652_v50 = vpop.f32.mrf.mxu1  ;;  %v792_v6 = vmul.f32 %v1323_v62, %v1323_v62 }
 0x135   : > { %854 = vrot.lane.b32.xlu1 %v838_v41, %s1355_s18  ;;  %v1325_v2 = vpop.eup %1324 }
 0x136   : > { %v1771_v42 = vpop.f32.mrf.mxu0  ;;  %v1780_v56 = vpop.f32.mrf.mxu1  ;;  %v841_v4 = vmul.f32 %v1325_v2, %v1323_v62  ;;  %v890_v14 = vmul.f32 %v1325_v2, %v1325_v2 }
 0x137   : > { %903 = vrot.lane.b32.xlu0 %v887_v45, %s1355_s18  ;;  %v1327_v5 = vpop.eup %1326  ;;  %v831_v41 = vmul.f32 2.0, %v1771_v42 }
 0x138   : > { %v641_v46 = vpop.f32.mrf.mxu0  ;;  %v657_v59 = vpop.f32.mrf.mxu1  ;;  %v793_v10 = vmul.f32 %v1327_v5, %v1327_v5 }
 0x139   : > { %856 = vrot.lane.b32.xlu1 %v839_v48, %s1355_s18 }
 0x13a   : > { %v1777_v49 = vpop.f32.mrf.mxu0  ;;  %v658_v61 = vpop.f32.mrf.mxu1 }
 0x13b   : > { %807 = vrot.lane.b32.xlu0 %v790_v54, %s1355_s18 }
 0x13c   : > { %v644_v55 = vpop.f32.mrf.mxu0  ;;  %v659_v0 = vpop.f32.mrf.mxu1 }
 0x13d   : > { %905 = vrot.lane.b32.xlu1 %v888_v58, %s1355_s18  ;;  %v1329_v7 = vpop.eup %1328 }
 0x13e   : > { %v842_v11 = vmul.f32 %v1329_v7, %v1327_v5  ;;  %v891_v15 = vmul.f32 %v1329_v7, %v1329_v7 }
 0x13f   : > { %858 = vrot.lane.b32.xlu0 %v840_v60, %s1355_s18 }
 0x141   : > { %809 = vrot.lane.b32.xlu1 %v791_v63, %s1355_s18 }
 0x143   : > { %907 = vrot.lane.b32.xlu0 %v889_v3, %s1355_s18 }
 0x145   : > { %860 = vrot.lane.b32.xlu1 %v841_v4, %s1355_s18 }
 0x147   : > { %811 = vrot.lane.b32.xlu0 %v792_v6, %s1355_s18 }
 0x149   : > { %813 = vrot.lane.b32.xlu1 %v793_v10, %s1355_s18 }
 0x14b   : > { %862 = vrot.lane.b32.xlu0 %v842_v11, %s1355_s18 }
 0x14d   : > { %909 = vrot.lane.b32.xlu1 %v890_v14, %s1355_s18 }
 0x14f   : > { %911 = vrot.lane.b32.xlu0 %v891_v15, %s1355_s18 }
 0x199   : > { %v802_v19 = vpop.permute.xlu0 %801 }
 0x19a   : > { %v822_v22 = vmul.f32 %v802_v19, %v1646_v9 }
 0x19b   : > { %v851_v23 = vpop.permute.xlu1 %850 }
 0x19c   : > { %v871_v24 = vmul.f32 %v851_v23, %v829_v18 }
 0x19d   : > { %v900_v25 = vpop.permute.xlu0 %899 }
 0x19e   : > { %v878_v29 = vsub.f32 %v822_v22, %v871_v24  ;;  %v920_v31 = vmul.f32 %v900_v25, %v1648_v1 }
 0x19f   : > { %v853_v33 = vpop.permute.xlu1 %852 }
 0x1a0   : > { %v927_v34 = vadd.f32 %v920_v31, %v878_v29  ;;  %v872_v36 = vmul.f32 %v853_v33, %v830_v30 }
 0x1a1   : > { %v804_v35 = vpop.permute.xlu0 %803 }
 0x1a2   : > { %v823_v37 = vmul.f32 %v804_v35, %v1652_v12  ;;  %945 = vrot.lane.b32.xlu1 %v927_v34, %s1356_s19  ;;  %v832_v12 = vmul.f32 2.0, %v1777_v49 }
 0x1a3   : > { %v902_v8 = vpop.permute.xlu1 %901 }
 0x1a4   : > { %v921_v9 = vmul.f32 %v902_v8, %v1654_v13  ;;  %v879_v40 = vsub.f32 %v823_v37, %v872_v36 }
 0x1a5   : > { %v806_v43 = vpop.permute.xlu0 %805 }
 0x1a6   : > { %v824_v26 = vmul.f32 %v806_v43, %v1658_v16  ;;  %v928_v44 = vadd.f32 %v921_v9, %v879_v40  ;;  %v833_v16 = vmul.f32 2.0, %v1766_v32  ;;  %v834_v32 = vmul.f32 2.0, %v1774_v47 }
 0x1a7   : > { %v855_v1 = vpop.permute.xlu1 %854 }
 0x1a8   : > { %v873_v45 = vmul.f32 %v855_v1, %v831_v41  ;;  %947 = vrot.lane.b32.xlu0 %v928_v44, %s1356_s19 }
 0x1a9   : > { %v904_v46 = vpop.permute.xlu0 %903 }
 0x1aa   : > { %v880_v48 = vsub.f32 %v824_v26, %v873_v45  ;;  %v922_v50 = vmul.f32 %v904_v46, %v1660_v17 }
 0x1ab   : > { %v857_v51 = vpop.permute.xlu1 %856 }
 0x1ac   : > { %v929_v54 = vadd.f32 %v922_v50, %v880_v48  ;;  %v874_v55 = vmul.f32 %v857_v51, %v832_v12 }
 0x1ad   : > { %v808_v13 = vpop.permute.xlu0 %807 }
 0x1ae   : > { %v825_v42 = vmul.f32 %v808_v13, %v1664_v20  ;;  %949 = vrot.lane.b32.xlu1 %v929_v54, %s1356_s19 }
 0x1af   : > { %v906_v57 = vpop.permute.xlu1 %905 }
 0x1b0   : > { %v923_v58 = vmul.f32 %v906_v57, %v1666_v21  ;;  %v881_v59 = vsub.f32 %v825_v42, %v874_v55  ;;  %v835_v21 = vmul.f32 2.0, %v1780_v56 }
 0x1b1   : > { %v859_v60 = vpop.permute.xlu0 %858 }
 0x1b2   : > { %v875_v61 = vmul.f32 %v859_v60, %v833_v16  ;;  %v930_v62 = vadd.f32 %v923_v58, %v881_v59 }
 0x1b3   : > { %v810_v49 = vpop.permute.xlu1 %809 }
 0x1b4   : > { %v826_v17 = vmul.f32 %v810_v49, %v1671_v27  ;;  %951 = vrot.lane.b32.xlu0 %v930_v62, %s1356_s19 }
 0x1b5   : > { %v908_v63 = vpop.permute.xlu0 %907 }
 0x1b6   : > { %v882_v0 = vsub.f32 %v826_v17, %v875_v61  ;;  %v924_v20 = vmul.f32 %v908_v63, %v1673_v28 }
 0x1b7   : > { %v861_v2 = vpop.permute.xlu1 %860 }
 0x1b8   : > { %v931_v3 = vadd.f32 %v924_v20, %v882_v0  ;;  %v876_v27 = vmul.f32 %v861_v2, %v834_v32 }
 0x1b9   : > { %v812_v4 = vpop.permute.xlu0 %811 }
 0x1ba   : > { %953 = vrot.lane.b32.xlu1 %v931_v3, %s1356_s19  ;;  %v827_v6 = vmul.f32 %v812_v4, %v1684_v38 }
 0x1bb   : > { %v814_v5 = vpop.permute.xlu1 %813 }
 0x1bc   : > { %v883_v14 = vsub.f32 %v827_v6, %v876_v27  ;;  %v828_v15 = vmul.f32 %v814_v5, %v1699_v52 }
 0x1bd   : > { %v863_v7 = vpop.permute.xlu0 %862 }
 0x1be   : > { %v877_v10 = vmul.f32 %v863_v7, %v835_v21 }
 0x1bf   : > { %v910_v11 = vpop.permute.xlu1 %909 }
 0x1c0   : > { %v925_v28 = vmul.f32 %v910_v11, %v1686_v39  ;;  %v884_v19 = vsub.f32 %v828_v15, %v877_v10 }
 0x1c1   : > { %v912_v18 = vpop.permute.xlu0 %911 }
 0x1c2   : > { %v932_v22 = vadd.f32 %v925_v28, %v883_v14  ;;  %v926_v47 = vmul.f32 %v912_v18, %v1701_v53 }
 0x1c4   : > { %v933_v56 = vadd.f32 %v926_v47, %v884_v19  ;;  %955 = vrot.lane.b32.xlu0 %v932_v22, %s1356_s19 }
 0x1c6   : > { %957 = vrot.lane.b32.xlu1 %v933_v56, %s1356_s19 }
 0x214   : > { %v946_v38 = vpop.permute.xlu1 %945 }
 0x215   : > { %967 = vst.msk [vmem:[#allocation2] sm:$0xff] %vm966_vm13, %v946_v38 }
 0x21a   : > { %v948_v23 = vpop.permute.xlu0 %947 }
 0x21b   : > { %968 = vst.msk [vmem:[#allocation2 + $0x8] sm:$0xff] %vm966_vm13, %v948_v23 }
 0x21c   : > { %v1033_v25 = vld [vmem:[#allocation2] sm:$0xff] }
 0x21d   : > { %v1041_v34 = vsel %vm966_vm13, %v1033_v25, 0.0 }
 0x220   : > { %v950_v52 = vpop.permute.xlu1 %949 }
 0x221   : > { %969 = vst.msk [vmem:[#allocation2 + $0x10] sm:$0xff] %vm966_vm13, %v950_v52 }
 0x222   : > { %v1034_v53 = vld [vmem:[#allocation2 + $0x8] sm:$0xff] }
 0x223   : > { %v1042_v30 = vsel %vm966_vm13, %v1034_v53, 0.0 }
 0x224   : > { %v1043_v37 = vadd.f32 %v1042_v30, %v1041_v34 }
 0x226   : > { %v952_v39 = vpop.permute.xlu0 %951 }
 0x227   : > { %970 = vst.msk [vmem:[#allocation2 + $0x18] sm:$0xff] %vm966_vm13, %v952_v39 }
 0x228   : > { %v1035_v29 = vld [vmem:[#allocation2 + $0x10] sm:$0xff] }
 0x229   : > { %v1044_v35 = vsel %vm966_vm13, %v1035_v29, 0.0 }
 0x22a   : > { %v1045_v40 = vadd.f32 %v1044_v35, %v1043_v37 }
 0x22c   : > { %v954_v24 = vpop.permute.xlu1 %953 }
 0x22d   : > { %971 = vst.msk [vmem:[#allocation2 + $0x20] sm:$0xff] %vm966_vm13, %v954_v24 }
 0x22e   : > { %v1036_v33 = vld [vmem:[#allocation2 + $0x18] sm:$0xff] }
 0x22f   : > { %v1046_v9 = vsel %vm966_vm13, %v1036_v33, 0.0 }
 0x230   : > { %v1047_v43 = vadd.f32 %v1046_v9, %v1045_v40 }
 0x234   : > { %v1037_v36 = vld [vmem:[#allocation2 + $0x20] sm:$0xff] }
 0x235   : > { %v1048_v41 = vsel %vm966_vm13, %v1037_v36, 0.0 }
 0x236   : > { %v956_v31 = vpop.permute.xlu0 %955  ;;  %v1049_v44 = vadd.f32 %v1048_v41, %v1047_v43 }
 0x237   : > { %972 = vst.msk [vmem:[#allocation2 + $0x28] sm:$0xff] %vm966_vm13, %v956_v31 }
 0x238   : > { %v958_v8 = vpop.permute.xlu1 %957 }
 0x239   : > { %974 = vst.msk [vmem:[#allocation2 + $0x30] sm:$0x1] %vm973_vm14, %v958_v8 }
 0x23e   : > { %v1038_v26 = vld [vmem:[#allocation2 + $0x28] sm:$0xff] }
 0x23f   : > { %v1050_v1 = vsel %vm966_vm13, %v1038_v26, 0.0 }
 0x240   : > { %v1039_v45 = vld [vmem:[#allocation2 + $0x30] sm:$0x1]  ;;  %v1051_v46 = vadd.f32 %v1050_v1, %v1049_v44 }
 0x241   : > { %v1053_v48 = vsel %vm973_vm14, %v1039_v45, 0.0 }
 0x242   : > { %v1054_v12 = vadd.f32 %v1053_v48, %v1051_v46 }
 0x244   : > { %v1055_v50 = vrot.slane %v1054_v12, 4 }
 0x246   : > { %v1056_v51 = vadd.f32 %v1055_v50, %v1054_v12 }
 0x248   : > { %v1057_v54 = vrot.slane %v1056_v51, 2 }
 0x24a   : > { %v1058_v13 = vadd.f32 %v1057_v54, %v1056_v51 }
 0x24c   : > { %v1059_v55 = vrot.slane %v1058_v13, 1 }
 0x24e   : > { %v1060_v42 = vadd.f32 %v1059_v55, %v1058_v13 }
 0x250   : > { %v1061_v16 = vmul.f32 0.020408163, %v1060_v42 }
 0x252   : > { %1062 = vst.msk [vmem:[%s199_s22] sm:$0x1] %vm973_vm14, %v1061_v16 }
 0x253 PF: > { %s12_s11 = sadd.s32 1, %s1352_s11   ;;  %s1853_s9 = smov %s1348_s10 }
 0x254   : > { %p9_p6 = scmp.ge.s32.totalorder %s12_s11, 4   ;;  %s1854_s10 = smov %s1856_s12 }
 0x256   :  { %11 = sbr.rel (!%p9_p6) target bundleno = 2 (0x2), region = 71 }

// kernel: _lambda_.5
= control target key start
LH: loop header
LB: loop body
LE: loop exit
PB: predicated region body
PF: predicated region fallthrough
CT: control target
= control target key end

     0   :  { %s3566_s9 = smov 0   ;;  %s3568_s10 = smov 0   ;;  %s5226_s0 = inlined_call_operand.vmem [shape: bf16[64,2], index: 0, kind: input, shape index: {}]   ;;  %s5227_s1 = inlined_call_operand.vmem [shape: bf16[4,225,64], index: 1, kind: input, shape index: {}]   ;;  %s5228_s2 = inlined_call_operand.vmem [shape: f32[1,2,1,1], index: 2, kind: output, shape index: {}]  }
   0x1   :  { %s3570_s11 = smov 0  }
   0x2 LB: > { %s27_s12 = sadd.s32 1, %s3541_s10  ;;  %p2861_p0 = scmp.ge.s32.totalorder %s3545_s11, 1  ;;  %s3545_s11 = sphi %s3570_s11, %s12_s11   ;;  %s3541_s10 = sphi %s3568_s10, %s5421_s10   ;;  %s3537_s9 = sphi %s3566_s9, %s5420_s9  }
   0x3   : > { %p29_p1 = scmp.ge.s32.totalorder %s27_s12, 2  ;;  %p146_p2 = scmp.lt.s32.totalorder %s3545_s11, 3 }
   0x5   : > { %s5423_s12 = smov (%p29_p1, %s27_s12), 0  ;;  %p147_p3 = pnand %p2861_p0, %p146_p2 }
   0x7   : > { %150 = sbr.rel (%p147_p3) target bundleno = 714 (0x2ca), region = 28 }
   0xc   : > { %v3287_v0 = vld [vmem:[%s5226_s0 + $0x18] sm:$0xff]   ;;  %v3547_v1 = vmov 0.0   ;;  %v3594_v2 = vld [vmem:[%s5226_s0 + $0x10] sm:$0xff]   ;;  %s2862_s17 = sshll.u32 %s3537_s9, 1  ;;  %vm3548_vm0 = vmmov 0   ;;  %v3608_v3 = vld [vmem:[%s5226_s0 + $0x8] sm:$0xff]  }
   0xd   : > { %3046 = vmatprep.subr.bf16.mxu0 %v3547_v1  ;;  %3250 = vmatprep.subr.bf16.mxu1 %v3547_v1  ;;  %p179_p4 = scmp.lt.s32.totalorder %s2862_s17, 3  ;;  %v3615_v4 = vld [vmem:[%s5226_s0] sm:$0xff]   ;;  %vm391_vm1 = vcmask 523264   ;;  %s3549_s26 = smov 1  }
   0xe   : > { %3047 = vmatpush3.bf16.msra.mxu0 %v3287_v0  ;;  %3254 = vmatpush3.bf16.msra.mxu1 %v3287_v0  ;;  %s3550_s27 = smov 127   ;;  %p192_p5 = scmp.lt.s32.totalorder %s3537_s9, 1 }
   0xf   : > { %3048 = vmatprep.subr.bf16.mxu0 %v3547_v1  ;;  %3251 = vmatprep.subr.bf16.mxu1 %v3547_v1  ;;  %s5425_s17 = smov (!%p179_p4, %s2862_s17), 3 }
  0x10   : > { %3054 = vmatprep.mubr.msk.bf16.mxu0 %vm3548_vm0, %v3547_v1  ;;  %3086 = vmatprep.mubr.msk.bf16.mxu1 %vm3548_vm0, %v3547_v1  ;;  %s3258_s20 = smul.u32 116, %s5425_s17  ;;  %s5427_s9 = smov (!%p192_p5, %s3537_s9), 1 }
  0x11   : > { %s196_s30 = scalar_lea.vmem %s5228_s2, %s5427_s9 }
  0x12   : > { %3049 = vmatpush3.bf16.msra.mxu0 %v3594_v2  ;;  %3255 = vmatpush3.bf16.msra.mxu1 %v3594_v2  ;;  %s3620_s25 = scalar_lea.vmem %s5227_s1, %s3258_s20 }
  0x13   : > { %3050 = vmatprep.subr.bf16.mxu0 %v3547_v1  ;;  %3252 = vmatprep.subr.bf16.mxu1 %v3547_v1  ;;  %v198_v5 = vld [vmem:[%s3620_s25] sm:$0xf]  ;;  %v199_v6 = vld [vmem:[%s3620_s25 + $0x4] sm:$0xf]  ;;  %v3627_v7 = vld [vmem:[%s3620_s25 + $0x74] sm:$0xf] }
  0x14   : > { %v3632_v8 = vld [vmem:[%s3620_s25 + $0x78] sm:$0xf]  ;;  %v265_v9 = vmul.bf16 %v198_v5, %v198_v5  ;;  %v266_v10 = vmul.bf16 %v199_v6, %v199_v6  ;;  %v3635_v11 = vld [vmem:[%s3620_s25 + $0x40] sm:$0xf]  ;;  %v3638_v12 = vld [vmem:[%s3620_s25 + $0x44] sm:$0xf]  ;;  %v888_v13 = vmul.bf16 %v3627_v7, %v198_v5 }
  0x15   : > { %v889_v14 = vmul.bf16 %v3632_v8, %v199_v6  ;;  %v281_v15 = vmul.bf16 %v3635_v11, %v3635_v11  ;;  %v282_v17 = vmul.bf16 %v3638_v12, %v3638_v12  ;;  %v3647_v18 = vld [vmem:[%s3620_s25 + $0x8] sm:$0xf]  ;;  %v3654_v20 = vld [vmem:[%s3620_s25 + $0xc] sm:$0xf]  ;;  %v3680_v30 = vld [vmem:[%s3620_s25 + $0x10] sm:$0xf] }
  0x16   : > { %3051 = vmatpush3.bf16.msra.mxu0 %v3608_v3  ;;  %3256 = vmatpush3.bf16.msra.mxu1 %v3608_v3  ;;  %v2893_v16 = vcombine.low %v265_v9, %v266_v10  ;;  %v3657_v21 = vld [vmem:[%s3620_s25 + $0x48] sm:$0xf]  ;;  %v3660_v22 = vld [vmem:[%s3620_s25 + $0x4c] sm:$0xf]  ;;  %v267_v24 = vmul.bf16 %v3647_v18, %v3647_v18  ;;  %v268_v25 = vmul.bf16 %v3654_v20, %v3654_v20  ;;  %v3684_v31 = vld [vmem:[%s3620_s25 + $0x14] sm:$0xf] }
  0x17   : > { %3052 = vmatprep.subr.bf16.mxu0 %v3547_v1  ;;  %3253 = vmatprep.subr.bf16.mxu1 %v3547_v1  ;;  %v3651_v19 = vcombine.low %v888_v13, %v889_v14  ;;  %v2901_v23 = vcombine.low %v281_v15, %v282_v17  ;;  %v283_v26 = vmul.bf16 %v3657_v21, %v3657_v21  ;;  %v3687_v32 = vld [vmem:[%s3620_s25 + $0x50] sm:$0xf]  ;;  %v3690_v33 = vld [vmem:[%s3620_s25 + $0x54] sm:$0xf]  ;;  %v3712_v40 = vld [vmem:[%s3620_s25 + $0x18] sm:$0xf] }
  0x18   : > { %v284_v27 = vmul.bf16 %v3660_v22, %v3660_v22  ;;  %v2894_v28 = vcombine.low %v267_v24, %v268_v25  ;;  %v269_v34 = vmul.bf16 %v3680_v30, %v3680_v30  ;;  %v270_v35 = vmul.bf16 %v3684_v31, %v3684_v31  ;;  %v3716_v41 = vld [vmem:[%s3620_s25 + $0x1c] sm:$0xf]  ;;  %v3719_v42 = vld [vmem:[%s3620_s25 + $0x58] sm:$0xf]  ;;  %v3743_v50 = vld [vmem:[%s3620_s25 + $0x20] sm:$0xf] }
  0x19   : > { %v285_v36 = vmul.bf16 %v3687_v32, %v3687_v32  ;;  %v286_v37 = vmul.bf16 %v3690_v33, %v3690_v33  ;;  %v3722_v43 = vld [vmem:[%s3620_s25 + $0x5c] sm:$0xf]  ;;  %v271_v44 = vmul.bf16 %v3712_v40, %v3712_v40  ;;  %v272_v45 = vmul.bf16 %v3716_v41, %v3716_v41  ;;  %v3746_v51 = vld [vmem:[%s3620_s25 + $0x24] sm:$0xf]  ;;  %v3749_v52 = vld [vmem:[%s3620_s25 + $0x60] sm:$0xf] }
  0x1a   : > { %3053 = vmatpush3.bf16.msra.mxu0 %v3615_v4  ;;  %3257 = vmatpush3.bf16.msra.mxu1 %v3615_v4  ;;  %v2902_v29 = vcombine.low %v283_v26, %v284_v27  ;;  %v2895_v38 = vcombine.low %v269_v34, %v270_v35  ;;  %v287_v46 = vmul.bf16 %v3719_v42, %v3719_v42  ;;  %v3752_v53 = vld [vmem:[%s3620_s25 + $0x64] sm:$0xf]  ;;  %v3769_v60 = vld [vmem:[%s3620_s25 + $0x28] sm:$0xf]  ;;  %v3772_v61 = vld [vmem:[%s3620_s25 + $0x2c] sm:$0xf] }
  0x1b   : > { %3114 = vmatprep.subr.bf16.mxu1 %v3547_v1  ;;  %3182 = vmatprep.subr.bf16.mxu0 %v3547_v1  ;;  %v2903_v39 = vcombine.low %v285_v36, %v286_v37  ;;  %v288_v47 = vmul.bf16 %v3722_v43, %v3722_v43  ;;  %v2896_v48 = vcombine.low %v271_v44, %v272_v45  ;;  %v3775_v62 = vld [vmem:[%s3620_s25 + $0x68] sm:$0xf]  ;;  %v3778_v63 = vld [vmem:[%s3620_s25 + $0x6c] sm:$0xf]  ;;  %v3795_v9 = vld [vmem:[%s3620_s25 + $0x30] sm:$0xf] }
  0x1c   : > { %v273_v54 = vmul.bf16 %v3743_v50, %v3743_v50  ;;  %v274_v55 = vmul.bf16 %v3746_v51, %v3746_v51  ;;  %v289_v56 = vmul.bf16 %v3749_v52, %v3749_v52  ;;  %v290_v57 = vmul.bf16 %v3752_v53, %v3752_v53  ;;  %v3798_v10 = vld [vmem:[%s3620_s25 + $0x34] sm:$0xf]  ;;  %v3801_v13 = vld [vmem:[%s3620_s25 + $0x70] sm:$0x1]  ;;  %v3816_v24 = vld [vmem:[%s3620_s25 + $0x38] sm:$0xf] }
  0x1d   : > { %3055 = vmatmul.mubr.msk.bf16.vlgmr.msra.gmra.mxu0 %vm391_vm1, %v2893_v16  ;;  %3087 = vmatmul.mubr.msk.bf16.vlgmr.msra.gmra.mxu1 %vm391_vm1, %v2901_v23  ;;  %v2904_v49 = vcombine.low %v287_v46, %v288_v47  ;;  %v277_v14 = vmul.bf16 %v3795_v9, %v3795_v9  ;;  %v278_v15 = vmul.bf16 %v3798_v10, %v3798_v10  ;;  %v3819_v25 = vld [vmem:[%s3620_s25 + $0x3c] sm:$0xf]  ;;  %v2867_v35 = vld [vmem:[%s3620_s25 + $0x80] sm:$0xf]  ;;  %v2869_v44 = vld [vmem:[%s3620_s25 + $0x88] sm:$0xf] }
  0x1e   : > { %3115 = vmatpush3.bf16.msra.mxu1 %v3287_v0  ;;  %3058 = vmatprep.mubr.msk.bf16.mxu0 %vm3548_vm0, %v3547_v1  ;;  %v2897_v58 = vcombine.low %v273_v54, %v274_v55  ;;  %v2905_v59 = vcombine.low %v289_v56, %v290_v57  ;;  %v293_v16 = vmul.bf16 %v3801_v13, %v3801_v13  ;;  %v2866_v34 = vld [vmem:[%s3620_s25 + $0x7c] sm:$0xf]  ;;  %v3861_v57 = vld [vmem:[%s3620_s25 + $0x98] sm:$0xf] }
  0x1f   : > { %3090 = vmatprep.mubr.msk.bf16.mxu1 %vm3548_vm0, %v3547_v1  ;;  %3116 = vmatprep.subr.bf16.mxu1 %v3547_v1  ;;  %v2899_v17 = vcombine.low %v277_v14, %v278_v15  ;;  %v589_v26 = vmul.bf16 %v3627_v7, %v3627_v7  ;;  %v590_v27 = vmul.bf16 %v3632_v8, %v3632_v8 }
  0x20   : > { %3183 = vmatpush3.bf16.msra.mxu0 %v3287_v0  ;;  %v275_v0 = vmul.bf16 %v3769_v60, %v3769_v60  ;;  %v2907_v23 = vcombine.low %v293_v16, %v293_v16  ;;  %v591_v36 = vmul.bf16 %v2866_v34, %v2866_v34  ;;  %v592_v37 = vmul.bf16 %v2867_v35, %v2867_v35 }
  0x21   : > { %3184 = vmatprep.subr.bf16.mxu0 %v3547_v1  ;;  %v2927_v7 = vcombine.low %v589_v26, %v590_v27  ;;  %v594_v46 = vmul.bf16 %v2869_v44, %v2869_v44  ;;  %v893_v16 = vmul.bf16 %v2869_v44, %v3684_v31  ;;  %v3907_v31 = vld [vmem:[%s3620_s25 + $0xac] sm:$0xf]  ;;  %v3933_v44 = vld [vmem:[%s3620_s25 + $0xbc] sm:$0xf] }
  0x22   : > { %3117 = vmatpush3.bf16.msra.mxu1 %v3594_v2 }
  0x23   : > { %3118 = vmatprep.subr.bf16.mxu1 %v3547_v1 }
  0x24   : > { %3185 = vmatpush3.bf16.msra.mxu0 %v3594_v2  ;;  %v276_v2 = vmul.bf16 %v3772_v61, %v3772_v61 }
  0x25   : > { %3059 = vmatmul.mubr.msk.bf16.gmra.mxu0 %vm391_vm1, %v2894_v28  ;;  %3091 = vmatmul.mubr.msk.bf16.gmra.mxu1 %vm391_vm1, %v2902_v29  ;;  %v279_v28 = vmul.bf16 %v3816_v24, %v3816_v24  ;;  %v280_v29 = vmul.bf16 %v3819_v25, %v3819_v25 }
  0x26   : > { %3062 = vmatprep.mubr.msk.bf16.mxu0 %vm3548_vm0, %v3547_v1  ;;  %3094 = vmatprep.mubr.msk.bf16.mxu1 %vm3548_vm0, %v3547_v1  ;;  %v2898_v5 = vcombine.low %v275_v0, %v276_v2  ;;  %v890_v2 = vmul.bf16 %v2866_v34, %v3647_v18 }
  0x27   : > { %3119 = vmatpush3.bf16.msra.mxu1 %v3608_v3  ;;  %3186 = vmatprep.subr.bf16.mxu0 %v3547_v1  ;;  %v2900_v8 = vcombine.low %v279_v28, %v280_v29  ;;  %v3910_v29 = vld [vmem:[%s3620_s25 + $0xb0] sm:$0xf] }
  0x28   : > { %3120 = vmatprep.subr.bf16.mxu1 %v3547_v1  ;;  %3187 = vmatpush3.bf16.msra.mxu0 %v3608_v3  ;;  %v291_v3 = vmul.bf16 %v3775_v62, %v3775_v62 }
  0x29   : > { %3188 = vmatprep.subr.bf16.mxu0 %v3547_v1 }
  0x2b   : > { %3121 = vmatpush3.bf16.msra.mxu1 %v3615_v4 }
  0x2c   : > { %3189 = vmatpush3.bf16.msra.mxu0 %v3615_v4  ;;  %v292_v4 = vmul.bf16 %v3778_v63, %v3778_v63 }
  0x2d   : > { %3063 = vmatmul.mubr.msk.bf16.gmra.mxu0 %vm391_vm1, %v2895_v38  ;;  %3095 = vmatmul.mubr.msk.bf16.gmra.mxu1 %vm391_vm1, %v2903_v39  ;;  %v2928_v38 = vcombine.low %v591_v36, %v592_v37  ;;  %v2868_v39 = vld [vmem:[%s3620_s25 + $0x84] sm:$0xf]  ;;  %v3923_v36 = vld [vmem:[%s3620_s25 + $0xb8] sm:$0xf] }
  0x2e   : > { %3066 = vmatprep.mubr.msk.bf16.mxu0 %vm3548_vm0, %v3547_v1  ;;  %3098 = vmatprep.mubr.msk.bf16.mxu1 %vm3548_vm0, %v3547_v1  ;;  %v2906_v6 = vcombine.low %v291_v3, %v292_v4  ;;  %v593_v45 = vmul.bf16 %v2868_v39, %v2868_v39  ;;  %v891_v3 = vmul.bf16 %v2867_v35, %v3654_v20  ;;  %v3873_v4 = vld [vmem:[%s3620_s25 + $0x9c] sm:$0xf]  ;;  %v3920_v35 = vld [vmem:[%s3620_s25 + $0xb4] sm:$0xf] }
  0x2f   : > { %v599_v14 = vmul.bf16 %v3873_v4, %v3873_v4  ;;  %v892_v20 = vmul.bf16 %v2868_v39, %v3680_v30  ;;  %v605_v37 = vmul.bf16 %v3920_v35, %v3920_v35 }
  0x30   : > { %v2929_v47 = vcombine.low %v593_v45, %v594_v46  ;;  %v3936_v45 = vld [vmem:[%s3620_s25 + $0xc0] sm:$0xf] }
  0x31   : > { %v2959_v26 = vcombine.low %v892_v20, %v893_v16  ;;  %v3983_v20 = vld [vmem:[%s3620_s25 + $0xd8] sm:$0xf] }
  0x35   : > { %3067 = vmatmul.mubr.msk.bf16.gmra.mxu0 %vm391_vm1, %v2896_v48  ;;  %3099 = vmatmul.mubr.msk.bf16.gmra.mxu1 %vm391_vm1, %v2904_v49  ;;  %v2870_v48 = vld [vmem:[%s3620_s25 + $0x8c] sm:$0xf]  ;;  %v2871_v49 = vld [vmem:[%s3620_s25 + $0x90] sm:$0xf] }
  0x36   : > { %3070 = vmatprep.mubr.msk.bf16.mxu0 %vm3548_vm0, %v3547_v1  ;;  %3102 = vmatprep.mubr.msk.bf16.mxu1 %vm3548_vm0, %v3547_v1  ;;  %v595_v54 = vmul.bf16 %v2870_v48, %v2870_v48  ;;  %v596_v55 = vmul.bf16 %v2871_v49, %v2871_v49  ;;  %v894_v46 = vmul.bf16 %v2870_v48, %v3712_v40  ;;  %v3954_v48 = vld [vmem:[%s3620_s25 + $0xc8] sm:$0xf] }
  0x38   : > { %v2930_v56 = vcombine.low %v595_v54, %v596_v55  ;;  %v607_v55 = vmul.bf16 %v3933_v44, %v3933_v44 }
  0x3d   : > { %3071 = vmatmul.mubr.msk.bf16.gmra.mxu0 %vm391_vm1, %v2897_v58  ;;  %3103 = vmatmul.mubr.msk.bf16.gmra.mxu1 %vm391_vm1, %v2905_v59  ;;  %v598_v59 = vmul.bf16 %v3861_v57, %v3861_v57 }
  0x3e   : > { %3074 = vmatprep.mubr.msk.bf16.mxu0 %vm3548_vm0, %v3547_v1  ;;  %3106 = vmatprep.mubr.msk.bf16.mxu1 %vm3548_vm0, %v3547_v1 }
  0x45   : > { %3075 = vmatmul.mubr.msk.bf16.gmra.mxu0 %vm391_vm1, %v2898_v5  ;;  %3107 = vmatmul.mubr.msk.bf16.gmra.mxu1 %vm391_vm1, %v2906_v6  ;;  %v3876_v5 = vld [vmem:[%s3620_s25 + $0xa0] sm:$0xf]  ;;  %v2958_v6 = vcombine.low %v890_v2, %v891_v3 }
  0x46   : > { %3078 = vmatprep.mubr.msk.bf16.mxu0 %vm3548_vm0, %v3547_v1  ;;  %3110 = vmatprep.mubr.msk.bf16.mxu1 %vm3548_vm0, %v3547_v1  ;;  %v600_v15 = vmul.bf16 %v3876_v5, %v3876_v5 }
  0x48   : > { %v2932_v18 = vcombine.low %v599_v14, %v600_v15  ;;  %v898_v14 = vmul.bf16 %v3873_v4, %v3769_v60  ;;  %v899_v15 = vmul.bf16 %v3876_v5, %v3772_v61  ;;  %v4000_v5 = vld [vmem:[%s3620_s25 + $0xdc] sm:$0xf] }
  0x4a   : > { %v2962_v16 = vcombine.low %v898_v14, %v899_v15 }
  0x4d   : > { %3079 = vmatmul.mubr.msk.bf16.gmra.mxu0 %vm391_vm1, %v2899_v17  ;;  %3111 = vmatmul.mubr.msk.bf16.gmra.mxu1 %vm391_vm1, %v2907_v23  ;;  %v3891_v17 = vld [vmem:[%s3620_s25 + $0xa4] sm:$0xf]  ;;  %v3894_v23 = vld [vmem:[%s3620_s25 + $0xa8] sm:$0xf] }
  0x4e   : > { %3082 = vmatprep.mubr.msk.bf16.mxu0 %vm3548_vm0, %v3547_v1  ;;  %3122 = vmatprep.mubr.msk.bf16.mxu1 %vm3548_vm0, %v3547_v1  ;;  %v601_v27 = vmul.bf16 %v3891_v17, %v3891_v17  ;;  %v602_v28 = vmul.bf16 %v3894_v23, %v3894_v23  ;;  %v900_v61 = vmul.bf16 %v3891_v17, %v3795_v9 }
  0x4f   : > { %v901_v4 = vmul.bf16 %v3894_v23, %v3798_v10  ;;  %v902_v9 = vmul.bf16 %v3907_v31, %v3816_v24  ;;  %v903_v10 = vmul.bf16 %v3910_v29, %v3819_v25  ;;  %v4020_v23 = vld [vmem:[%s3620_s25 + $0xe4] sm:$0x1]  ;;  %v904_v24 = vmul.bf16 %v3920_v35, %v3635_v11 }
  0x50   : > { %v2933_v30 = vcombine.low %v601_v27, %v602_v28  ;;  %v614_v27 = vmul.bf16 %v3983_v20, %v3983_v20  ;;  %v4003_v28 = vld [vmem:[%s3620_s25 + $0xe0] sm:$0xf]  ;;  %v905_v25 = vmul.bf16 %v3923_v36, %v3638_v12  ;;  %v909_v12 = vmul.bf16 %v3954_v48, %v3690_v33 }
  0x55   : > { %3083 = vmatmul.mubr.msk.bf16.gmra.mxu0 %vm391_vm1, %v2900_v8  ;;  %3123 = vmatmul.mubr.msk.bf16.vlgmr.msra.gmra.mxu1 %vm391_vm1, %v2927_v7  ;;  %v603_v7 = vmul.bf16 %v3907_v31, %v3907_v31  ;;  %v604_v8 = vmul.bf16 %v3910_v29, %v3910_v29  ;;  %v2965_v29 = vcombine.low %v904_v24, %v905_v25 }
  0x56   : > { %3126 = vmatprep.mubr.msk.bf16.mxu1 %vm3548_vm0, %v3547_v1  ;;  %3190 = vmatprep.mubr.msk.bf16.mxu0 %vm3548_vm0, %v3547_v1 }
  0x57   : > { %v2934_v34 = vcombine.low %v603_v7, %v604_v8  ;;  %v615_v7 = vmul.bf16 %v4000_v5, %v4000_v5  ;;  %v616_v8 = vmul.bf16 %v4003_v28, %v4003_v28 }
  0x59   : > { %v2940_v17 = vcombine.low %v615_v7, %v616_v8 }
  0x5d   : > { %3127 = vmatmul.mubr.msk.bf16.gmra.mxu1 %vm391_vm1, %v2928_v38  ;;  %3191 = vmatmul.mubr.msk.bf16.vlgmr.msra.gmra.mxu0 %vm391_vm1, %v3651_v19  ;;  %v3858_v19 = vld [vmem:[%s3620_s25 + $0x94] sm:$0xf]  ;;  %v606_v38 = vmul.bf16 %v3923_v36, %v3923_v36 }
  0x5e   : > { %3130 = vmatprep.mubr.msk.bf16.mxu1 %vm3548_vm0, %v3547_v1  ;;  %3194 = vmatprep.mubr.msk.bf16.mxu0 %vm3548_vm0, %v3547_v1  ;;  %v597_v58 = vmul.bf16 %v3858_v19, %v3858_v19 }
  0x5f   : > { %v2935_v39 = vcombine.low %v605_v37, %v606_v38  ;;  %v617_v37 = vmul.bf16 %v4020_v23, %v4020_v23  ;;  %v906_v38 = vmul.bf16 %v3933_v44, %v3657_v21 }
  0x60   : > { %v2931_v0 = vcombine.low %v597_v58, %v598_v59  ;;  %v897_v58 = vmul.bf16 %v3861_v57, %v3746_v51  ;;  %v2886_v51 = vld [vmem:[%s3620_s25 + $0xcc] sm:$0xf] }
  0x61   : > { %v611_v57 = vmul.bf16 %v2886_v51, %v2886_v51  ;;  %v2941_v31 = vcombine.low %v617_v37, %v617_v37  ;;  %v910_v21 = vmul.bf16 %v2886_v51, %v3719_v42  ;;  %v913_v42 = vmul.bf16 %v3983_v20, %v3752_v53 }
  0x62   : > { %v915_v53 = vmul.bf16 %v4003_v28, %v3778_v63 }
  0x65   : > { %3131 = vmatmul.mubr.msk.bf16.gmra.mxu1 %vm391_vm1, %v2929_v47  ;;  %3195 = vmatmul.mubr.msk.bf16.gmra.mxu0 %vm391_vm1, %v2958_v6  ;;  %v895_v47 = vmul.bf16 %v2871_v49, %v3716_v41  ;;  %v3951_v41 = vld [vmem:[%s3620_s25 + $0xc4] sm:$0xf]  ;;  %v896_v49 = vmul.bf16 %v3858_v19, %v3743_v50  ;;  %v2887_v19 = vld [vmem:[%s3620_s25 + $0xd0] sm:$0xf] }
  0x66   : > { %3134 = vmatprep.mubr.msk.bf16.mxu1 %vm3548_vm0, %v3547_v1  ;;  %3198 = vmatprep.mubr.msk.bf16.mxu0 %vm3548_vm0, %v3547_v1  ;;  %v609_v59 = vmul.bf16 %v3951_v41, %v3951_v41  ;;  %v612_v3 = vmul.bf16 %v2887_v19, %v2887_v19  ;;  %v908_v11 = vmul.bf16 %v3951_v41, %v3687_v32 }
  0x67   : > { %v2960_v54 = vcombine.low %v894_v46, %v895_v47  ;;  %v2961_v2 = vcombine.low %v896_v49, %v897_v58 }
  0x68   : > { %v2938_v6 = vcombine.low %v611_v57, %v612_v3  ;;  %v2967_v35 = vcombine.low %v908_v11, %v909_v12 }
  0x6d   : > { %3135 = vmatmul.mubr.msk.bf16.gmra.mxu1 %vm391_vm1, %v2930_v56  ;;  %3199 = vmatmul.mubr.msk.bf16.gmra.mxu0 %vm391_vm1, %v2959_v26  ;;  %v608_v56 = vmul.bf16 %v3936_v45, %v3936_v45 }
  0x6e   : > { %3138 = vmatprep.mubr.msk.bf16.mxu1 %vm3548_vm0, %v3547_v1  ;;  %3202 = vmatprep.mubr.msk.bf16.mxu0 %vm3548_vm0, %v3547_v1 }
  0x6f   : > { %v2936_v40 = vcombine.low %v607_v55, %v608_v56 }
  0x75   : > { %3139 = vmatmul.mubr.msk.bf16.gmra.mxu1 %vm391_vm1, %v2931_v0  ;;  %3203 = vmatmul.mubr.msk.bf16.gmra.mxu0 %vm391_vm1, %v2960_v54  ;;  %v610_v0 = vmul.bf16 %v3954_v48, %v3954_v48 }
  0x76   : > { %3142 = vmatprep.mubr.msk.bf16.mxu1 %vm3548_vm0, %v3547_v1  ;;  %3206 = vmatprep.mubr.msk.bf16.mxu0 %vm3548_vm0, %v3547_v1 }
  0x77   : > { %v2937_v50 = vcombine.low %v609_v59, %v610_v0 }
  0x7d   : > { %3143 = vmatmul.mubr.msk.bf16.gmra.mxu1 %vm391_vm1, %v2932_v18  ;;  %3207 = vmatmul.mubr.msk.bf16.gmra.mxu0 %vm391_vm1, %v2961_v2  ;;  %v3980_v18 = vld [vmem:[%s3620_s25 + $0xd4] sm:$0xf] }
  0x7e   : > { %3146 = vmatprep.mubr.msk.bf16.mxu1 %vm3548_vm0, %v3547_v1  ;;  %3210 = vmatprep.mubr.msk.bf16.mxu0 %vm3548_vm0, %v3547_v1  ;;  %v613_v26 = vmul.bf16 %v3980_v18, %v3980_v18  ;;  %v912_v47 = vmul.bf16 %v3980_v18, %v3749_v52  ;;  %v914_v52 = vmul.bf16 %v4000_v5, %v3775_v62 }
  0x80   : > { %v2939_v60 = vcombine.low %v613_v26, %v614_v27  ;;  %v2970_v51 = vcombine.low %v914_v52, %v915_v53 }
  0x85   : > { %3147 = vmatmul.mubr.msk.bf16.gmra.mxu1 %vm391_vm1, %v2933_v30  ;;  %3211 = vmatmul.mubr.msk.bf16.gmra.mxu0 %vm391_vm1, %v2962_v16  ;;  %v2963_v30 = vcombine.low %v900_v61, %v901_v4 }
  0x86   : > { %3150 = vmatprep.mubr.msk.bf16.mxu1 %vm3548_vm0, %v3547_v1  ;;  %3214 = vmatprep.mubr.msk.bf16.mxu0 %vm3548_vm0, %v3547_v1 }
  0x8d   : > { %3151 = vmatmul.mubr.msk.bf16.gmra.mxu1 %vm391_vm1, %v2934_v34  ;;  %3215 = vmatmul.mubr.msk.bf16.gmra.mxu0 %vm391_vm1, %v2963_v30  ;;  %v2964_v34 = vcombine.low %v902_v9, %v903_v10 }
  0x8e   : > { %3154 = vmatprep.mubr.msk.bf16.mxu1 %vm3548_vm0, %v3547_v1  ;;  %3218 = vmatprep.mubr.msk.bf16.mxu0 %vm3548_vm0, %v3547_v1 }
  0x95   : > { %3155 = vmatmul.mubr.msk.bf16.gmra.mxu1 %vm391_vm1, %v2935_v39  ;;  %3219 = vmatmul.mubr.msk.bf16.gmra.mxu0 %vm391_vm1, %v2964_v34  ;;  %v907_v39 = vmul.bf16 %v3936_v45, %v3660_v22  ;;  %v911_v22 = vmul.bf16 %v2887_v19, %v3722_v43 }
  0x96   : > { %3158 = vmatprep.mubr.msk.bf16.mxu1 %vm3548_vm0, %v3547_v1  ;;  %3222 = vmatprep.mubr.msk.bf16.mxu0 %vm3548_vm0, %v3547_v1 }
  0x97   : > { %v2966_v46 = vcombine.low %v906_v38, %v907_v39  ;;  %v2968_v36 = vcombine.low %v910_v21, %v911_v22 }
  0x9d   : > { %3159 = vmatmul.mubr.msk.bf16.gmra.mxu1 %vm391_vm1, %v2936_v40  ;;  %3223 = vmatmul.mubr.msk.bf16.gmra.mxu0 %vm391_vm1, %v2965_v29  ;;  %v2969_v40 = vcombine.low %v912_v47, %v913_v42 }
  0x9e   : > { %3162 = vmatprep.mubr.msk.bf16.mxu1 %vm3548_vm0, %v3547_v1  ;;  %3226 = vmatprep.mubr.msk.bf16.mxu0 %vm3548_vm0, %v3547_v1 }
  0xa5   : > { %3163 = vmatmul.mubr.msk.bf16.gmra.mxu1 %vm391_vm1, %v2937_v50  ;;  %3227 = vmatmul.mubr.msk.bf16.gmra.mxu0 %vm391_vm1, %v2966_v46 }
  0xa6   : > { %3166 = vmatprep.mubr.msk.bf16.mxu1 %vm3548_vm0, %v3547_v1  ;;  %3230 = vmatprep.mubr.msk.bf16.mxu0 %vm3548_vm0, %v3547_v1 }
  0xad   : > { %3167 = vmatmul.mubr.msk.bf16.gmra.mxu1 %vm391_vm1, %v2938_v6  ;;  %3231 = vmatmul.mubr.msk.bf16.gmra.mxu0 %vm391_vm1, %v2967_v35 }
  0xae   : > { %3170 = vmatprep.mubr.msk.bf16.mxu1 %vm3548_vm0, %v3547_v1  ;;  %3234 = vmatprep.mubr.msk.bf16.mxu0 %vm3548_vm0, %v3547_v1 }
  0xb5   : > { %3171 = vmatmul.mubr.msk.bf16.gmra.mxu1 %vm391_vm1, %v2939_v60  ;;  %3235 = vmatmul.mubr.msk.bf16.gmra.mxu0 %vm391_vm1, %v2968_v36 }
  0xb6   : > { %3174 = vmatprep.mubr.msk.bf16.mxu1 %vm3548_vm0, %v3547_v1  ;;  %3238 = vmatprep.mubr.msk.bf16.mxu0 %vm3548_vm0, %v3547_v1 }
  0xbd   : > { %3175 = vmatmul.mubr.msk.bf16.gmra.mxu1 %vm391_vm1, %v2940_v17  ;;  %3239 = vmatmul.mubr.msk.bf16.gmra.mxu0 %vm391_vm1, %v2969_v40 }
  0xbe   : > { %3178 = vmatprep.mubr.msk.bf16.mxu1 %vm3548_vm0, %v3547_v1  ;;  %3242 = vmatprep.mubr.msk.bf16.mxu0 %vm3548_vm0, %v3547_v1 }
  0xc5   : > { %3179 = vmatmul.mubr.msk.bf16.gmra.mxu1 %vm391_vm1, %v2941_v31  ;;  %3243 = vmatmul.mubr.msk.bf16.gmra.mxu0 %vm391_vm1, %v2970_v51 }
  0xc6   : > { %3246 = vmatprep.mubr.msk.bf16.mxu0 %vm3548_vm0, %v3547_v1 }
  0xdd   : > { %v4054_v44 = vpop.f32.mrf.mxu0  ;;  %v4056_v45 = vpop.f32.mrf.mxu1 }
  0xde   : > { %5283 = vst [vmem:[#allocation3_spill] sm:$0xff] %v4056_v45  ;;  %3291 = vrsqrt.f32 %v4056_v45  ;;  %vm1301_vm2 = vcmp.eq.f32.partialorder %v4056_v45, inf  ;;  %vm1189_vm3 = vcmp.eq.f32.partialorder %v4054_v44, inf  ;;  %vm1191_vm4 = vcmp.eq.f32.partialorder %v4054_v44, 0.0 }
  0xdf   : > { %v3056_v32 = vpop.f32.mrf.mxu0  ;;  %v3088_v33 = vpop.f32.mrf.mxu1  ;;  %3293 = vrsqrt.f32 %v4054_v44  ;;  %v1192_v10 = vand.u32 2147483648, %v4054_v44  ;;  %v1304_v17 = vand.u32 2147483648, %v4056_v45  ;;  %vm1303_vm5 = vcmp.eq.f32.partialorder %v4056_v45, 0.0 }
  0xe1   : > { %v4065_v54 = vpop.f32.mrf.mxu0  ;;  %v4067_v43 = vpop.f32.mrf.mxu1 }
  0xe2   : > { %5284 = vst [vmem:[#allocation4_spill] sm:$0xff] %v4067_v43  ;;  %3295 = vrsqrt.f32 %v4065_v54  ;;  %vm1196_vm6 = vcmp.eq.f32.partialorder %v4065_v54, inf  ;;  %vm1198_vm7 = vcmp.eq.f32.partialorder %v4065_v54, 0.0  ;;  %v1199_v31 = vand.u32 2147483648, %v4065_v54 }
  0xe3   : > { %v3057_v55 = vpop.f32.mrf.mxu0  ;;  %v3089_v56 = vpop.f32.mrf.mxu1  ;;  %3297 = vrsqrt.f32 %v4067_v43  ;;  %vm1308_vm8 = vcmp.eq.f32.partialorder %v4067_v43, inf  ;;  %vm1310_vm9 = vcmp.eq.f32.partialorder %v4067_v43, 0.0  ;;  %v1311_v11 = vand.u32 2147483648, %v4067_v43 }
  0xe5   : > { %v4069_v41 = vpop.f32.mrf.mxu0  ;;  %v4071_v48 = vpop.f32.mrf.mxu1 }
  0xe6   : > { %5285 = vst [vmem:[#allocation5_spill] sm:$0xff] %v4071_v48  ;;  %3299 = vrsqrt.f32 %v4069_v41  ;;  %vm1203_vm10 = vcmp.eq.f32.partialorder %v4069_v41, inf  ;;  %vm1205_vm11 = vcmp.eq.f32.partialorder %v4069_v41, 0.0  ;;  %v1206_v36 = vand.u32 2147483648, %v4069_v41 }
  0xe7   : > { %v3060_v49 = vpop.f32.mrf.mxu0  ;;  %v3092_v58 = vpop.f32.mrf.mxu1  ;;  %3301 = vrsqrt.f32 %v4071_v48  ;;  %vm1315_vm12 = vcmp.eq.f32.partialorder %v4071_v48, inf  ;;  %v1318_v42 = vand.u32 2147483648, %v4071_v48  ;;  %vm1317_vm15 = vcmp.eq.f32.partialorder %v4071_v48, 0.0 }
  0xe9   : > { %v4081_v59 = vpop.f32.mrf.mxu0  ;;  %v4083_v0 = vpop.f32.mrf.mxu1 }
  0xea   : > { %5286 = vst [vmem:[#allocation6_spill] sm:$0xff] %v4081_v59  ;;  %5287 = vst [vmem:[#allocation7_spill] sm:$0xff] %v4083_v0  ;;  %3303 = vrsqrt.f32 %v4081_v59  ;;  %vm1210_vm13 = vcmp.eq.f32.partialorder %v4081_v59, inf  ;;  %v1213_v40 = vand.u32 2147483648, %v4081_v59  ;;  %vm1322_vm14 = vcmp.eq.f32.partialorder %v4083_v0, inf }
  0xeb   : > { %v3061_v2 = vpop.f32.mrf.mxu0  ;;  %v3093_v50 = vpop.f32.mrf.mxu1  ;;  %3305 = vrsqrt.f32 %v4083_v0  ;;  %vm1212_vm0 = vcmp.eq.f32.partialorder %v4081_v59, 0.0 }
  0xec   : > { %v3292_v18 = vpop.eup %3291  ;;  %v1325_v2 = vand.u32 2147483648, %v4083_v0 }
  0xed   : > { %v4087_v19 = vpop.f32.mrf.mxu0  ;;  %v4089_v57 = vpop.f32.mrf.mxu1  ;;  %v1300_v27 = vmul.f32 %v3292_v18, %v4056_v45 }
  0xee   : > { %5288 = vst [vmem:[#allocation8_spill] sm:$0xff] %v4087_v19  ;;  %5289 = vst [vmem:[#allocation9_spill] sm:$0xff] %v4089_v57  ;;  %v3294_v60 = vpop.eup %3293  ;;  %3307 = vrsqrt.f32 %v4087_v19 }
  0xef   : > { %v3064_v62 = vpop.f32.mrf.mxu0  ;;  %v3096_v3 = vpop.f32.mrf.mxu1  ;;  %3309 = vrsqrt.f32 %v4089_v57  ;;  %v1188_v7 = vmul.f32 %v3294_v60, %v4054_v44  ;;  %v1302_v8 = vsel %vm1301_vm2, %v4056_v45, %v1300_v27  ;;  %vm1324_vm2 = vcmp.eq.f32.partialorder %v4083_v0, 0.0 }
  0xf0   : > { %v3296_v5 = vpop.eup %3295  ;;  %v1305_v39 = vsel %vm1303_vm5, %v1304_v17, %v1302_v8  ;;  %vm1219_vm5 = vcmp.eq.f32.partialorder %v4087_v19, 0.0  ;;  %v1332_v8 = vand.u32 2147483648, %v4089_v57 }
  0xf1   : > { %v4096_v63 = vpop.f32.mrf.mxu0  ;;  %v4098_v6 = vpop.f32.mrf.mxu1  ;;  %v1195_v34 = vmul.f32 %v3296_v5, %v4065_v54  ;;  %v1190_v46 = vsel %vm1189_vm3, %v4054_v44, %v1188_v7  ;;  %v1406_v55 = vadd.f32 1e-10, %v1305_v39  ;;  %vm1217_vm3 = vcmp.eq.f32.partialorder %v4087_v19, inf }
  0xf2   : > { %5290 = vst [vmem:[#allocation10_spill] sm:$0xff] %v4096_v63  ;;  %5291 = vst [vmem:[#allocation11_spill] sm:$0xff] %v4098_v6  ;;  %v3298_v9 = vpop.eup %3297  ;;  %3311 = vrsqrt.f32 %v4096_v63  ;;  %v1193_v49 = vsel %vm1191_vm4, %v1192_v10, %v1190_v46  ;;  %v1220_v5 = vand.u32 2147483648, %v4087_v19  ;;  %vm1329_vm4 = vcmp.eq.f32.partialorder %v4089_v57, inf }
  0xf3   : > { %v3065_v14 = vpop.f32.mrf.mxu0  ;;  %v3097_v15 = vpop.f32.mrf.mxu1  ;;  %3313 = vrsqrt.f32 %v4098_v6  ;;  %v1197_v35 = vsel %vm1196_vm6, %v4065_v54, %v1195_v34  ;;  %v1307_v21 = vmul.f32 %v3298_v9, %v4067_v43  ;;  %vm1331_vm6 = vcmp.eq.f32.partialorder %v4089_v57, 0.0 }
  0xf4   : > { %v3300_v25 = vpop.eup %3299  ;;  %v1200_v53 = vsel %vm1198_vm7, %v1199_v31, %v1197_v35  ;;  %v4188_v9 = vmul.bf16 %v4020_v23, %v3801_v13  ;;  %vm1224_vm7 = vcmp.eq.f32.partialorder %v4096_v63, inf }
  0xf5   : > { %v4102_v20 = vpop.f32.mrf.mxu0  ;;  %v4104_v16 = vpop.f32.mrf.mxu1  ;;  %v1202_v22 = vmul.f32 %v3300_v25, %v4069_v41  ;;  %v1309_v50 = vsel %vm1308_vm8, %v4067_v43, %v1307_v21  ;;  %v1391_v60 = vadd.f32 1e-10, %v1200_v53  ;;  %vm1226_vm8 = vcmp.eq.f32.partialorder %v4096_v63, 0.0 }
  0xf6   : > { %5292 = vst [vmem:[#allocation12_spill] sm:$0xff] %v4102_v20  ;;  %5293 = vst [vmem:[#allocation13_spill] sm:$0xff] %v4104_v16  ;;  %v3302_v12 = vpop.eup %3301  ;;  %3315 = vrsqrt.f32 %v4102_v20  ;;  %v1312_v7 = vsel %vm1310_vm9, %v1311_v11, %v1309_v50  ;;  %v1227_v11 = vand.u32 2147483648, %v4096_v63  ;;  %vm1336_vm9 = vcmp.eq.f32.partialorder %v4098_v6, inf }
  0xf7   : > { %v3068_v1 = vpop.f32.mrf.mxu0  ;;  %v3100_v26 = vpop.f32.mrf.mxu1  ;;  %3317 = vrsqrt.f32 %v4104_v16  ;;  %v1204_v51 = vsel %vm1203_vm10, %v4069_v41, %v1202_v22  ;;  %v1314_v62 = vmul.f32 %v3302_v12, %v4071_v48  ;;  %v1407_v46 = vadd.f32 1e-10, %v1312_v7 }
  0xf8   : > { %v3304_v47 = vpop.eup %3303  ;;  %v1390_v26 = vadd.f32 1e-10, %v1193_v49  ;;  %v1207_v10 = vsel %vm1205_vm11, %v1206_v36, %v1204_v51  ;;  %vm1338_vm10 = vcmp.eq.f32.partialorder %v4098_v6, 0.0  ;;  %vm1231_vm11 = vcmp.eq.f32.partialorder %v4102_v20, inf }
  0xf9   : > { %v4109_v61 = vpop.f32.mrf.mxu0  ;;  %v4111_v4 = vpop.f32.mrf.mxu1  ;;  %v1209_v18 = vmul.f32 %v3304_v47, %v4081_v59  ;;  %v1316_v17 = vsel %vm1315_vm12, %v4071_v48, %v1314_v62  ;;  %v1392_v21 = vadd.f32 1e-10, %v1207_v10  ;;  %v1234_v53 = vand.u32 2147483648, %v4102_v20 }
  0xfa   : > { %5294 = vst [vmem:[#allocation14_spill] sm:$0xff] %v4109_v61  ;;  %5295 = vst [vmem:[#allocation15_spill] sm:$0xff] %v4111_v4  ;;  %v3306_v56 = vpop.eup %3305  ;;  %3319 = vrsqrt.f32 %v4109_v61  ;;  %v1319_v22 = vsel %vm1317_vm15, %v1318_v42, %v1316_v17  ;;  %vm1343_vm12 = vcmp.eq.f32.partialorder %v4104_v16, inf  ;;  %vm1350_vm15 = vcmp.eq.f32.partialorder %v4111_v4, inf }
  0xfb   : > { %v3069_v28 = vpop.f32.mrf.mxu0  ;;  %v3101_v30 = vpop.f32.mrf.mxu1  ;;  %v1321_v1 = vmul.f32 %v3306_v56, %v4083_v0  ;;  %3321 = vrcp.f32 %v1406_v55  ;;  %v1211_v13 = vsel %vm1210_vm13, %v4081_v59, %v1209_v18  ;;  %v1408_v62 = vadd.f32 1e-10, %v1319_v22 }
  0xfc   : > { %v3308_v15 = vpop.eup %3307  ;;  %3323 = vrsqrt.f32 %v4111_v4  ;;  %v1214_v36 = vsel %vm1212_vm0, %v1213_v40, %v1211_v13  ;;  %v1339_v40 = vand.u32 2147483648, %v4098_v6  ;;  %v1241_v18 = vand.u32 2147483648, %v4109_v61 }
  0xfd   : > { %v4123_v37 = vpop.f32.mrf.mxu0  ;;  %v4125_v24 = vpop.f32.mrf.mxu1  ;;  %3325 = vrcp.f32 %v1390_v26  ;;  %v1216_v34 = vmul.f32 %v3308_v15, %v4087_v19  ;;  %v1323_v23 = vsel %vm1322_vm14, %v4083_v0, %v1321_v1  ;;  %v1346_v15 = vand.u32 2147483648, %v4104_v16 }
  0xfe   : > { %5296 = vst [vmem:[#allocation16_spill] sm:$0xff] %v4123_v37  ;;  %5297 = vst [vmem:[#allocation17_spill] sm:$0xff] %v4125_v24  ;;  %v3310_v27 = vpop.eup %3309  ;;  %3327 = vrsqrt.f32 %v4123_v37  ;;  %v1326_v47 = vsel %vm1324_vm2, %v1325_v2, %v1323_v23  ;;  %v1393_v26 = vadd.f32 1e-10, %v1214_v36  ;;  %vm1233_vm13 = vcmp.eq.f32.partialorder %v4102_v20, 0.0 }
  0xff   : > { %v3072_v29 = vpop.f32.mrf.mxu0  ;;  %v3104_v38 = vpop.f32.mrf.mxu1  ;;  %3329 = vrsqrt.f32 %v4125_v24  ;;  %v1218_v55 = vsel %vm1217_vm3, %v4087_v19, %v1216_v34  ;;  %vm1238_vm14 = vcmp.eq.f32.partialorder %v4109_v61, inf  ;;  %vm1345_vm0 = vcmp.eq.f32.partialorder %v4104_v16, 0.0 }
 0x100   : > { %v3312_v29 = vpop.eup %3311  ;;  %v1328_v38 = vmul.f32 %v3310_v27, %v4089_v57  ;;  %3331 = vrcp.f32 %v1391_v60  ;;  %v1409_v27 = vadd.f32 1e-10, %v1326_v47  ;;  %v1221_v60 = vsel %vm1219_vm5, %v1220_v5, %v1218_v55 }
 0x101   : > { %v4144_v32 = vpop.f32.mrf.mxu0  ;;  %v4146_v33 = vpop.f32.mrf.mxu1  ;;  %v1223_v42 = vmul.f32 %v3312_v29, %v4096_v63  ;;  %v1353_v29 = vand.u32 2147483648, %v4111_v4  ;;  %v1248_v13 = vand.u32 2147483648, %v4123_v37  ;;  %vm1240_vm2 = vcmp.eq.f32.partialorder %v4109_v61, 0.0 }
 0x102   : > { %5298 = vst [vmem:[#allocation18_spill] sm:$0xff] %v4144_v32  ;;  %5299 = vst [vmem:[#allocation19_spill] sm:$0xff] %v4146_v33  ;;  %v3314_v39 = vpop.eup %3313  ;;  %3333 = vrsqrt.f32 %v4146_v33  ;;  %vm1245_vm3 = vcmp.eq.f32.partialorder %v4123_v37, inf  ;;  %vm1357_vm5 = vcmp.eq.f32.partialorder %v4125_v24, inf }
 0x103   : > { %v3073_v58 = vpop.f32.mrf.mxu0  ;;  %v3105_v52 = vpop.f32.mrf.mxu1  ;;  %v1225_v17 = vsel %vm1224_vm7, %v4096_v63, %v1223_v42  ;;  %vm1364_vm7 = vcmp.eq.f32.partialorder %v4146_v33, inf }
 0x104   : > { %v1330_v58 = vsel %vm1329_vm4, %v4089_v57, %v1328_v38  ;;  %v1335_v52 = vmul.f32 %v3314_v39, %v4098_v6  ;;  %v3316_v51 = vpop.eup %3315  ;;  %v1228_v22 = vsel %vm1226_vm8, %v1227_v11, %v1225_v17  ;;  %vm1352_vm4 = vcmp.eq.f32.partialorder %v4111_v4, 0.0 }
 0x105   : > { %v4172_v3 = vpop.f32.mrf.mxu0  ;;  %v4174_v14 = vpop.f32.mrf.mxu1  ;;  %vm1359_vm8 = vcmp.eq.f32.partialorder %v4125_v24, 0.0 }
 0x106   : > { %5300 = vst [vmem:[#allocation20_spill] sm:$0xff] %v4172_v3  ;;  %5301 = vst [vmem:[#allocation21_spill] sm:$0xff] %v4174_v14  ;;  %3335 = vrsqrt.f32 %v4172_v3  ;;  %v3318_v1 = vpop.eup %3317  ;;  %v1337_v34 = vsel %vm1336_vm9, %v4098_v6, %v1335_v52  ;;  %vm1366_vm9 = vcmp.eq.f32.partialorder %v4146_v33, 0.0 }
 0x107   : > { %v3076_v28 = vpop.f32.mrf.mxu0  ;;  %v3108_v30 = vpop.f32.mrf.mxu1  ;;  %3337 = vrcp.f32 %v1407_v46  ;;  %v1394_v46 = vadd.f32 1e-10, %v1221_v60  ;;  %v1340_v36 = vsel %vm1338_vm10, %v1339_v40, %v1337_v34  ;;  %v1342_v47 = vmul.f32 %v3318_v1, %v4104_v16 }
 0x108   : > { %3339 = vrcp.f32 %v1392_v21  ;;  %v1333_v28 = vsel %vm1331_vm6, %v1332_v8, %v1330_v58  ;;  %v3320_v10 = vpop.eup %3319  ;;  %v1230_v8 = vmul.f32 %v3316_v51, %v4102_v20  ;;  %vm1247_vm6 = vcmp.eq.f32.partialorder %v4123_v37, 0.0 }
 0x109   : > { %v4197_v25 = vpop.f32.mrf.mxu0  ;;  %v4199_v31 = vpop.f32.mrf.mxu1  ;;  %3341 = vrsqrt.f32 %v4144_v32  ;;  %v1237_v52 = vmul.f32 %v3320_v10, %v4109_v61  ;;  %v1411_v10 = vadd.f32 1e-10, %v1340_v36  ;;  %v1344_v17 = vsel %vm1343_vm12, %v4104_v16, %v1342_v47 }
 0x10a   : > { %5302 = vst [vmem:[#allocation22_spill] sm:$0xff] %v4197_v25  ;;  %5303 = vst [vmem:[#allocation23_spill] sm:$0xff] %v4199_v31  ;;  %v4258_v5 = vpop.eup %3321  ;;  %3343 = vrsqrt.f32 %v4174_v14  ;;  %v1367_v36 = vand.u32 2147483648, %v4146_v33  ;;  %vm1259_vm10 = vcmp.eq.f32.partialorder %v4172_v3, inf  ;;  %vm1261_vm12 = vcmp.eq.f32.partialorder %v4172_v3, 0.0 }
 0x10b   : > { %v3077_v12 = vpop.f32.mrf.mxu0  ;;  %v3109_v35 = vpop.f32.mrf.mxu1  ;;  %3345 = vrsqrt.f32 %v4199_v31 }
 0x10c   : > { %v3324_v39 = vpop.eup %3323  ;;  %v1410_v12 = vadd.f32 1e-10, %v1333_v28  ;;  %v1725_v35 = vmul.f32 %v4258_v5, %v4258_v5  ;;  %3347 = vrcp.f32 %v1409_v27 }
 0x10d   : > { %v4226_v56 = vpop.f32.mrf.mxu0  ;;  %v4228_v49 = vpop.f32.mrf.mxu1  ;;  %3349 = vrcp.f32 %v1408_v62  ;;  %v1349_v51 = vmul.f32 %v3324_v39, %v4111_v4  ;;  %v1239_v39 = vsel %vm1238_vm14, %v4109_v61, %v1237_v52  ;;  %v1347_v52 = vsel %vm1345_vm0, %v1346_v15, %v1344_v17 }
 0x10e   : > { %5304 = vst [vmem:[#allocation24_spill] sm:$0xff] %v4226_v56  ;;  %5305 = vst [vmem:[#allocation25_spill] sm:$0xff] %v4228_v49  ;;  %v4270_v21 = vpop.eup %3325  ;;  %1799 = vrot.lane.b32.xlu1 %v1725_v35, %s3549_s26  ;;  %3351 = vrsqrt.f32 %v4226_v56  ;;  %v1412_v17 = vadd.f32 1e-10, %v1347_v52  ;;  %vm1371_vm14 = vcmp.eq.f32.partialorder %v4174_v14, inf  ;;  %vm1373_vm0 = vcmp.eq.f32.partialorder %v4174_v14, 0.0 }
 0x10f   : > { %v3080_v2 = vpop.f32.mrf.mxu0  ;;  %v3112_v50 = vpop.f32.mrf.mxu1  ;;  %v1709_v11 = vmul.f32 %v4270_v21, %v4270_v21  ;;  %3353 = vrcp.f32 %v1393_v26 }
 0x110   : > { %v3328_v42 = vpop.eup %3327  ;;  %v1360_v2 = vand.u32 2147483648, %v4125_v24  ;;  %v1232_v50 = vsel %vm1231_vm11, %v4102_v20, %v1230_v8  ;;  %3355 = vrcp.f32 %v1394_v46  ;;  %v1351_v46 = vsel %vm1350_vm15, %v4111_v4, %v1349_v51 }
 0x111   : > { %v4248_v30 = vpop.f32.mrf.mxu0  ;;  %v586_v7 = vpop.f32.mrf.mxu1  ;;  %1767 = vrot.lane.b32.xlu0 %v1709_v11, %s3549_s26  ;;  %v1244_v34 = vmul.f32 %v3328_v42, %v4123_v37  ;;  %v1235_v26 = vsel %vm1233_vm13, %v1234_v53, %v1232_v50  ;;  %3357 = vrsqrt.f32 %v4197_v25  ;;  %v1242_v51 = vsel %vm1240_vm2, %v1241_v18, %v1239_v39 }
 0x112   : > { %5306 = vst [vmem:[#allocation26_spill] sm:$0xff] %v4248_v30  ;;  %v3330_v40 = vpop.eup %3329  ;;  %v1395_v7 = vadd.f32 1e-10, %v1228_v22  ;;  %v1396_v50 = vadd.f32 1e-10, %v1235_v26  ;;  %vm1252_vm11 = vcmp.eq.f32.partialorder %v4144_v32, inf }
 0x113   : > { %v3081_v23 = vpop.f32.mrf.mxu0  ;;  %v3113_v38 = vpop.f32.mrf.mxu1  ;;  %v1356_v22 = vmul.f32 %v3330_v40, %v4125_v24  ;;  %vm1254_vm13 = vcmp.eq.f32.partialorder %v4144_v32, 0.0  ;;  %vm1378_vm15 = vcmp.eq.f32.partialorder %v4199_v31, inf  ;;  %vm1266_vm2 = vcmp.eq.f32.partialorder %v4197_v25, inf }
 0x114   : > { %v4295_v28 = vpop.eup %3331 }
 0x115   : > { %v4278_v55 = vpop.f32.mrf.mxu0  ;;  %v4280_v58 = vpop.f32.mrf.mxu1  ;;  %v1710_v8 = vmul.f32 %v4295_v28, %v4295_v28 }
 0x116   : > { %5307 = vst [vmem:[#allocation27_spill] sm:$0xff] %v4278_v55  ;;  %v3334_v62 = vpop.eup %3333  ;;  %3359 = vrsqrt.f32 %v4278_v55 }
 0x117   : > { %v3084_v27 = vpop.f32.mrf.mxu0  ;;  %v3124_v60 = vpop.f32.mrf.mxu1  ;;  %v1363_v11 = vmul.f32 %v3334_v62, %v4146_v33  ;;  %1769 = vrot.lane.b32.xlu0 %v1710_v8, %s3549_s26  ;;  %3361 = vrcp.f32 %v1410_v12  ;;  %v1354_v12 = vsel %vm1352_vm4, %v1353_v29, %v1351_v46  ;;  %vm1273_vm4 = vcmp.eq.f32.partialorder %v4226_v56, inf }
 0x118   : > { %v3336_v35 = vpop.eup %3335  ;;  %v1246_v27 = vsel %vm1245_vm3, %v4123_v37, %v1244_v34  ;;  %3363 = vrcp.f32 %v1411_v10  ;;  %v1358_v10 = vsel %vm1357_vm5, %v4125_v24, %v1356_v22  ;;  %v1262_v34 = vand.u32 2147483648, %v4172_v3 }
 0x119   : > { %v4306_v23 = vpop.f32.mrf.mxu0  ;;  %v4308_v38 = vpop.f32.mrf.mxu1  ;;  %3365 = vrsqrt.f32 %v4228_v49  ;;  %v1249_v26 = vsel %vm1247_vm6, %v1248_v13, %v1246_v27  ;;  %v1365_v39 = vsel %vm1364_vm7, %v4146_v33, %v1363_v11  ;;  %v1258_v46 = vmul.f32 %v3336_v35, %v4172_v3 }
 0x11a   : > { %5308 = vst [vmem:[#allocation28_spill] sm:$0xff] %v4306_v23  ;;  %5309 = vst [vmem:[#allocation29_spill] sm:$0xff] %v4308_v38  ;;  %v4325_v42 = vpop.eup %3337  ;;  %3367 = vrsqrt.f32 %v4248_v30  ;;  %v1361_v35 = vsel %vm1359_vm8, %v1360_v2, %v1358_v10  ;;  %vm1380_vm3 = vcmp.eq.f32.partialorder %v4199_v31, 0.0  ;;  %vm1268_vm5 = vcmp.eq.f32.partialorder %v4197_v25, 0.0 }
 0x11b   : > { %v3085_v53 = vpop.f32.mrf.mxu0  ;;  %v3125_v47 = vpop.f32.mrf.mxu1  ;;  %v1726_v60 = vmul.f32 %v4325_v42, %v4325_v42  ;;  %3369 = vrsqrt.f32 %v4280_v58  ;;  %v1260_v2 = vsel %vm1259_vm10, %v4172_v3, %v1258_v46  ;;  %v1414_v10 = vadd.f32 1e-10, %v1361_v35 }
 0x11c   : > { %v4334_v40 = vpop.eup %3339  ;;  %v1397_v53 = vadd.f32 1e-10, %v1242_v51  ;;  %v1413_v47 = vadd.f32 1e-10, %v1354_v12  ;;  %3371 = vrcp.f32 %v1395_v7  ;;  %v1398_v12 = vadd.f32 1e-10, %v1249_v26 }
 0x11d   : > { %v4344_v15 = vpop.f32.mrf.mxu1  ;;  %v1711_v18 = vmul.f32 %v4334_v40, %v4334_v40  ;;  %v3342_v62 = vpop.eup %3341  ;;  %1801 = vrot.lane.b32.xlu0 %v1726_v60, %s3549_s26  ;;  %3373 = vrcp.f32 %v1396_v50  ;;  %v1368_v7 = vsel %vm1366_vm9, %v1367_v36, %v1365_v39  ;;  %v1381_v26 = vand.u32 2147483648, %v4199_v31 }
 0x11e   : > { %5310 = vst [vmem:[#allocation30_spill] sm:$0xff] %v4344_v15  ;;  %v3344_v8 = vpop.eup %3343  ;;  %v1251_v11 = vmul.f32 %v3342_v62, %v4144_v32  ;;  %3375 = vrcp.f32 %v1412_v17  ;;  %vm1275_vm6 = vcmp.eq.f32.partialorder %v4226_v56, 0.0  ;;  %vm1385_vm7 = vcmp.eq.f32.partialorder %v4228_v49, inf }
 0x11f   : > { %v3128_v29 = vpop.f32.mrf.mxu1  ;;  %1771 = vrot.lane.b32.xlu1 %v1711_v18, %s3549_s26  ;;  %v3346_v22 = vpop.eup %3345  ;;  %3377 = vrcp.f32 %v1413_v47  ;;  %v1263_v47 = vsel %vm1261_vm12, %v1262_v34, %v1260_v2  ;;  %v5313_v34 = vand.u32 2147483648, %v4144_v32  ;;  %vm1287_vm8 = vcmp.eq.f32.partialorder %v4278_v55, inf }
 0x120   : > { %v4377_v27 = vpop.eup %3347  ;;  %v1377_v50 = vmul.f32 %v3346_v22, %v4199_v31  ;;  %v1253_v17 = vsel %vm1252_vm11, %v4144_v32, %v1251_v11  ;;  %v1370_v22 = vmul.f32 %v3344_v8, %v4174_v14  ;;  %3379 = vrsqrt.f32 %v4308_v38 }
 0x121   : > { %v4375_v52 = vpop.f32.mrf.mxu1  ;;  %v4385_v51 = vpop.eup %3349  ;;  %v1728_v18 = vmul.f32 %v4377_v27, %v4377_v27  ;;  %3381 = vrcp.f32 %v1397_v53  ;;  %v1256_v53 = vsel %vm1254_vm13, %v5313_v34, %v1253_v17  ;;  %v1276_v17 = vand.u32 2147483648, %v4226_v56 }
 0x122   : > { %5311 = vst [vmem:[#allocation31_spill] sm:$0xff] %v4375_v52  ;;  %v3352_v13 = vpop.eup %3351  ;;  %v1727_v62 = vmul.f32 %v4385_v51, %v4385_v51  ;;  %v1379_v8 = vsel %vm1378_vm15, %v4199_v31, %v1377_v50  ;;  %3383 = vrcp.f32 %v1398_v12  ;;  %v1372_v12 = vsel %vm1371_vm14, %v4174_v14, %v1370_v22 }
 0x123   : > { %v3129_v29 = vpop.f32.mrf.mxu1  ;;  %v4399_v36 = vpop.eup %3353  ;;  %1805 = vrot.lane.b32.xlu0 %v1728_v18, %s3549_s26  ;;  %v1272_v11 = vmul.f32 %v3352_v13, %v4226_v56  ;;  %3385 = vrsqrt.f32 %v4306_v23  ;;  %v2971_v13 = vcombine.low %v4188_v9, %v4188_v9  ;;  %v1400_v34 = vadd.f32 1e-10, %v1263_v47 }
 0x124   : > { %v4407_v46 = vpop.eup %3355  ;;  %1803 = vrot.lane.b32.xlu1 %v1727_v62, %s3549_s26  ;;  %v1415_v29 = vadd.f32 1e-10, %v1368_v7  ;;  %v1712_v7 = vmul.f32 %v4399_v36, %v4399_v36  ;;  %3387 = vrsqrt.f32 %v4344_v15  ;;  %v1382_v33 = vsel %vm1380_vm3, %v1381_v26, %v1379_v8 }
 0x125   : > { %v4405_v39 = vpop.f32.mrf.mxu1  ;;  %v3358_v35 = vpop.eup %3357  ;;  %v1713_v18 = vmul.f32 %v4407_v46, %v4407_v46  ;;  %3247 = vmatmul.mubr.msk.bf16.gmra.mxu0 %vm391_vm1, %v2971_v13  ;;  %v5315_v26 = vand.u32 2147483648, %v4174_v14  ;;  %vm1387_vm1 = vcmp.eq.f32.partialorder %v4228_v49, 0.0  ;;  %vm1280_vm9 = vcmp.eq.f32.partialorder %v4248_v30, inf }
 0x126   : > { %5312 = vst [vmem:[#allocation32_spill] sm:$0xff] %v4405_v39  ;;  %v3360_v1 = vpop.eup %3359  ;;  %v1265_v50 = vmul.f32 %v3358_v35, %v4197_v25  ;;  %3389 = vrcp.f32 %v1415_v29  ;;  %v1399_v35 = vadd.f32 1e-10, %v1256_v53  ;;  %v1417_v53 = vadd.f32 1e-10, %v1382_v33 }
 0x127   : > { %v3132_v60 = vpop.f32.mrf.mxu1  ;;  %v4427_v62 = vpop.eup %3361  ;;  %1775 = vrot.lane.b32.xlu0 %v1713_v18, %s3549_s26  ;;  %3391 = vrcp.f32 %v1414_v10  ;;  %v1375_v8 = vsel %vm1373_vm0, %v5315_v26, %v1372_v12  ;;  %v1388_v12 = vand.u32 2147483648, %v4228_v49  ;;  %vm1289_vm10 = vcmp.eq.f32.partialorder %v4278_v55, 0.0 }
 0x128   : > { %v4440_v2 = vpop.eup %3363  ;;  %1773 = vrot.lane.b32.xlu1 %v1712_v7, %s3549_s26  ;;  %v1274_v7 = vsel %vm1273_vm4, %v4226_v56, %v1272_v11  ;;  %v1729_v4 = vmul.f32 %v4427_v62, %v4427_v62  ;;  %v1267_v10 = vsel %vm1266_vm2, %v4197_v25, %v1265_v50  ;;  %3393 = vrcp.f32 %v1400_v34 }
 0x129   : > { %v4436_v60 = vpop.f32.mrf.mxu1  ;;  %v3366_v18 = vpop.eup %3365  ;;  %v1730_v9 = vmul.f32 %v4440_v2, %v4440_v2  ;;  %v1416_v14 = vadd.f32 1e-10, %v1375_v8  ;;  %3395 = vrcp.f32 %v1399_v35  ;;  %vm1450_vm11 = vcmp.eq.f32.partialorder %v4280_v58, inf }
 0x12a   : > { %5314 = vst [vmem:[#allocation33_spill] sm:$0xff] %v4436_v60  ;;  %v3368_v22 = vpop.eup %3367  ;;  %v1384_v13 = vmul.f32 %v3366_v18, %v4228_v49  ;;  %v5317_v18 = vand.u32 2147483648, %v4197_v25  ;;  %3397 = vrsqrt.f32 %v4375_v52  ;;  %vm1282_vm12 = vcmp.eq.f32.partialorder %v4248_v30, 0.0 }
 0x12b   : > { %v3133_v24 = vpop.f32.mrf.mxu1  ;;  %v3370_v47 = vpop.eup %3369  ;;  %1809 = vrot.lane.b32.xlu0 %v1730_v9, %s3549_s26  ;;  %v1290_v9 = vand.u32 2147483648, %v4278_v55  ;;  %3399 = vrcp.f32 %v1417_v53  ;;  %vm1452_vm13 = vcmp.eq.f32.partialorder %v4280_v58, 0.0  ;;  %vm1457_vm14 = vcmp.eq.f32.partialorder %v4308_v38, inf }
 0x12c   : > { %v1286_v24 = vmul.f32 %v3360_v1, %v4278_v55  ;;  %v4469_v11 = vpop.eup %3371  ;;  %1807 = vrot.lane.b32.xlu1 %v1729_v4, %s3549_s26  ;;  %v1277_v1 = vsel %vm1275_vm6, %v1276_v17, %v1274_v7  ;;  %v1270_v17 = vsel %vm1268_vm5, %v5317_v18, %v1267_v10  ;;  %v1279_v7 = vmul.f32 %v3368_v22, %v4248_v30 }
 0x12d   : > { %v4467_v29 = vpop.f32.mrf.mxu1  ;;  %v4477_v26 = vpop.eup %3373  ;;  %v1714_v33 = vmul.f32 %v4469_v11, %v4469_v11  ;;  %v1402_v16 = vadd.f32 1e-10, %v1277_v1  ;;  %v1386_v35 = vsel %vm1385_vm7, %v4228_v49, %v1384_v13  ;;  %v1449_v6 = vmul.f32 %v3370_v47, %v4280_v58 }
 0x12e   : > { %5316 = vst [vmem:[#allocation34_spill] sm:$0xff] %v4467_v29  ;;  %v1715_v50 = vmul.f32 %v4477_v26, %v4477_v26  ;;  %v4487_v4 = vpop.eup %3375  ;;  %v1288_v34 = vsel %vm1287_vm8, %v4278_v55, %v1286_v24  ;;  %v1283_v24 = vand.u32 2147483648, %v4248_v30  ;;  %v1401_v13 = vadd.f32 1e-10, %v1270_v17 }
 0x12f   : > { %v3136_v31 = vpop.f32.mrf.mxu1  ;;  %v4498_v8 = vpop.eup %3377  ;;  %v1291_v47 = vsel %vm1289_vm10, %v1290_v9, %v1288_v34  ;;  %3401 = vrcp.f32 %v1416_v14  ;;  %v1281_v57 = vsel %vm1280_vm9, %v4248_v30, %v1279_v7  ;;  %v1451_v9 = vsel %vm1450_vm11, %v4280_v58, %v1449_v6 }
 0x130   : > { %1777 = vrot.lane.b32.xlu1 %v1714_v33, %s3549_s26  ;;  %1779 = vrot.lane.b32.xlu0 %v1715_v50, %s3549_s26  ;;  %v3380_v22 = vpop.eup %3379  ;;  %v1732_v10 = vmul.f32 %v4498_v8, %v4498_v8  ;;  %v1731_v33 = vmul.f32 %v4487_v4, %v4487_v4  ;;  %v1389_v50 = vsel %vm1387_vm1, %v1388_v12, %v1386_v35  ;;  %3403 = vrsqrt.f32 %v4405_v39 }
 0x131   : > { %v4496_v31 = vpop.f32.mrf.mxu1  ;;  %v4511_v18 = vpop.eup %3381  ;;  %v1456_v17 = vmul.f32 %v3380_v22, %v4308_v38  ;;  %3405 = vrcp.f32 %v1402_v16  ;;  %v1404_v7 = vadd.f32 1e-10, %v1291_v47  ;;  %v1453_v34 = vand.u32 2147483648, %v4280_v58 }
 0x132   : > { %5318 = vst [vmem:[#allocation35_spill] sm:$0xff] %v4496_v31  ;;  %v4515_v53 = vpop.eup %3383  ;;  %v1418_v22 = vadd.f32 1e-10, %v1389_v50  ;;  %v1284_v49 = vsel %vm1282_vm12, %v1283_v24, %v1281_v57  ;;  %3407 = vrcp.f32 %v1401_v13  ;;  %vm1294_vm15 = vcmp.eq.f32.partialorder %v4306_v23, inf }
 0x133   : > { %v3137_v1 = vpop.f32.mrf.mxu1  ;;  %v3386_v0 = vpop.eup %3385  ;;  %v1717_v14 = vmul.f32 %v4515_v53, %v4515_v53  ;;  %v1454_v16 = vsel %vm1452_vm13, %v1453_v34, %v1451_v9  ;;  %3409 = vrsqrt.f32 %v4436_v60  ;;  %v1403_v24 = vadd.f32 1e-10, %v1284_v49 }
 0x134   : > { %1811 = vrot.lane.b32.xlu1 %v1731_v33, %s3549_s26  ;;  %1813 = vrot.lane.b32.xlu0 %v1732_v10, %s3549_s26  ;;  %v3388_v12 = vpop.eup %3387  ;;  %v1716_v10 = vmul.f32 %v4511_v18, %v4511_v18  ;;  %v1293_v48 = vmul.f32 %v3386_v0, %v4306_v23  ;;  %v1460_v0 = vand.u32 2147483648, %v4308_v38  ;;  %3411 = vrcp.f32 %v1404_v7 }
 0x135   : > { %v4522_v1 = vpop.f32.mrf.mxu1  ;;  %v4533_v6 = vpop.eup %3389  ;;  %v1463_v50 = vmul.f32 %v3388_v12, %v4344_v15  ;;  %v1651_v34 = vadd.f32 1e-10, %v1454_v16  ;;  %vm1459_vm0 = vcmp.eq.f32.partialorder %v4308_v38, 0.0  ;;  %3413 = vrcp.f32 %v1418_v22 }
 0x136   : > { %5319 = vst [vmem:[#allocation36_spill] sm:$0xff] %v4522_v1  ;;  %v4537_v33 = vpop.eup %3391  ;;  %v1734_v57 = vmul.f32 %v4533_v6, %v4533_v6  ;;  %v1295_v12 = vsel %vm1294_vm15, %v4306_v23, %v1293_v48  ;;  %vm1464_vm2 = vcmp.eq.f32.partialorder %v4344_v15, inf  ;;  %3415 = vrsqrt.f32 %v4467_v29 }
 0x137   : > { %v3140_v35 = vpop.f32.mrf.mxu1  ;;  %v4552_v9 = vpop.eup %3393  ;;  %v1297_v16 = vand.u32 2147483648, %v4306_v23  ;;  %vm1296_vm3 = vcmp.eq.f32.partialorder %v4306_v23, 0.0  ;;  %vm1466_vm4 = vcmp.eq.f32.partialorder %v4344_v15, 0.0  ;;  %3417 = vrcp.f32 %v1403_v24 }
 0x138   : > { %v1458_v35 = vsel %vm1457_vm14, %v4308_v38, %v1456_v17  ;;  %1781 = vrot.lane.b32.xlu1 %v1716_v10, %s3549_s26  ;;  %1783 = vrot.lane.b32.xlu0 %v1717_v14, %s3549_s26  ;;  %v1733_v17 = vmul.f32 %v4537_v33, %v4537_v33  ;;  %v4557_v14 = vpop.eup %3395  ;;  %v1719_v22 = vmul.f32 %v4552_v9, %v4552_v9  ;;  %3419 = vrcp.f32 %v1651_v34 }
 0x139   : > { %v4542_v47 = vpop.f32.mrf.mxu1  ;;  %v1461_v49 = vsel %vm1459_vm0, %v1460_v0, %v1458_v35  ;;  %v3398_v10 = vpop.eup %3397  ;;  %v1467_v35 = vand.u32 2147483648, %v4344_v15  ;;  %v1298_v43 = vsel %vm1296_vm3, %v1297_v16, %v1295_v12  ;;  %3421 = vrsqrt.f32 %v4496_v31 }
 0x13a   : > { %5320 = vst [vmem:[#allocation37_spill] sm:$0xff] %v4542_v47  ;;  %v4570_v48 = vpop.eup %3399  ;;  %v1652_v45 = vadd.f32 1e-10, %v1461_v49  ;;  %v1470_v30 = vmul.f32 %v3398_v10, %v4375_v52  ;;  %v4587_v12 = vpop.f32.mrf.mxu0  ;;  %v1405_v49 = vadd.f32 1e-10, %v1298_v43  ;;  %vm1471_vm5 = vcmp.eq.f32.partialorder %v4375_v52, inf }
 0x13b   : > { %v3141_v13 = vpop.f32.mrf.mxu1  ;;  %v1736_v24 = vmul.f32 %v4570_v48, %v4570_v48  ;;  %vm1473_vm6 = vcmp.eq.f32.partialorder %v4375_v52, 0.0  ;;  %vm1478_vm7 = vcmp.eq.f32.partialorder %v4405_v39, inf  ;;  %v1481_v37 = vand.u32 2147483648, %v4405_v39 }
 0x13c   : > { %v1465_v13 = vsel %vm1464_vm2, %v4344_v15, %v1463_v50  ;;  %1815 = vrot.lane.b32.xlu1 %v1733_v17, %s3549_s26  ;;  %1817 = vrot.lane.b32.xlu0 %v1734_v57, %s3549_s26  ;;  %v1718_v50 = vmul.f32 %v4557_v14, %v4557_v14  ;;  %v4577_v57 = vpop.eup %3401  ;;  %3423 = vrcp.f32 %v1652_v45  ;;  %v1472_v43 = vsel %vm1471_vm5, %v4375_v52, %v1470_v30 }
 0x13d   : > { %v4562_v7 = vpop.f32.mrf.mxu1  ;;  %v1468_v17 = vsel %vm1466_vm4, %v1467_v35, %v1465_v13  ;;  %v3404_v23 = vpop.eup %3403  ;;  %v1735_v35 = vmul.f32 %v4577_v57, %v4577_v57  ;;  %3425 = vrsqrt.f32 %v4522_v1  ;;  %vm1480_vm1 = vcmp.eq.f32.partialorder %v4405_v39, 0.0 }
 0x13e   : > { %5321 = vst [vmem:[#allocation38_spill] sm:$0xff] %v4562_v7  ;;  %v4589_v34 = vpop.eup %3405  ;;  %v1653_v13 = vadd.f32 1e-10, %v1468_v17  ;;  %3427 = vrcp.f32 %v1405_v49  ;;  %vm1485_vm8 = vcmp.eq.f32.partialorder %v4436_v60, inf  ;;  %vm1487_vm9 = vcmp.eq.f32.partialorder %v4436_v60, 0.0 }
 0x13f   : > { %v3144_v0 = vpop.f32.mrf.mxu1  ;;  %v4593_v10 = vpop.eup %3407  ;;  %v1721_v45 = vmul.f32 %v4589_v34, %v4589_v34  ;;  %vm1492_vm10 = vcmp.eq.f32.partialorder %v4467_v29, inf  ;;  %vm1494_vm11 = vcmp.eq.f32.partialorder %v4467_v29, 0.0  ;;  %vm1499_vm12 = vcmp.eq.f32.partialorder %v4496_v31, inf }
 0x140   : > { %1785 = vrot.lane.b32.xlu1 %v1718_v50, %s3549_s26  ;;  %1787 = vrot.lane.b32.xlu0 %v1719_v22, %s3549_s26  ;;  %v3192_v0 = vpop.f32.mrf.mxu0  ;;  %v1477_v22 = vmul.f32 %v3404_v23, %v4405_v39  ;;  %v3410_v56 = vpop.eup %3409  ;;  %v1720_v30 = vmul.f32 %v4593_v10, %v4593_v10  ;;  %3429 = vrcp.f32 %v1653_v13  ;;  %v1502_v15 = vand.u32 2147483648, %v4496_v31 }
 0x141   : > { %v4580_v55 = vpop.f32.mrf.mxu1  ;;  %v4608_v0 = vpop.eup %3411  ;;  %v1484_v32 = vmul.f32 %v3410_v56, %v4436_v60  ;;  %3431 = vrsqrt.f32 %v4542_v47  ;;  %vm1501_vm13 = vcmp.eq.f32.partialorder %v4496_v31, 0.0  ;;  %vm1506_vm14 = vcmp.eq.f32.partialorder %v4522_v1, inf }
 0x142   : > { %5322 = vst [vmem:[#allocation39_spill] sm:$0xff] %v4580_v55  ;;  %v4605_v17 = vpop.f32.mrf.mxu0  ;;  %v1479_v3 = vsel %vm1478_vm7, %v4405_v39, %v1477_v22  ;;  %v1723_v13 = vmul.f32 %v4608_v0, %v4608_v0  ;;  %3433 = vrsqrt.f32 %v4562_v7  ;;  %vm1508_vm15 = vcmp.eq.f32.partialorder %v4522_v1, 0.0 }
 0x143   : > { %v3145_v16 = vpop.f32.mrf.mxu1  ;;  %vm1513_vm0 = vcmp.eq.f32.partialorder %v4542_v47, inf  ;;  %vm1515_vm2 = vcmp.eq.f32.partialorder %v4542_v47, 0.0  ;;  %vm1520_vm3 = vcmp.eq.f32.partialorder %v4562_v7, inf  ;;  %vm1522_vm4 = vcmp.eq.f32.partialorder %v4562_v7, 0.0 }
 0x144   : > { %1819 = vrot.lane.b32.xlu1 %v1735_v35, %s3549_s26  ;;  %1821 = vrot.lane.b32.xlu0 %v1736_v24, %s3549_s26  ;;  %v1474_v16 = vand.u32 2147483648, %v4375_v52  ;;  %v3193_v24 = vpop.f32.mrf.mxu0  ;;  %v4614_v35 = vpop.eup %3413  ;;  %vm1527_vm5 = vcmp.eq.f32.partialorder %v4580_v55, inf }
 0x145   : > { %v4598_v50 = vpop.f32.mrf.mxu1  ;;  %v1737_v61 = vmul.f32 %v4614_v35, %v4614_v35 }
 0x146   : > { %5323 = vst [vmem:[#allocation40_spill] sm:$0xff] %v4598_v50  ;;  %v1475_v25 = vsel %vm1473_vm6, %v1474_v16, %v1472_v43  ;;  %v4626_v24 = vpop.f32.mrf.mxu0  ;;  %v1482_v16 = vsel %vm1480_vm1, %v1481_v37, %v1479_v3  ;;  %vm1529_vm6 = vcmp.eq.f32.partialorder %v4580_v55, 0.0  ;;  %vm1534_vm7 = vcmp.eq.f32.partialorder %v4598_v50, inf }
 0x147   : > { %v3148_v23 = vpop.f32.mrf.mxu1  ;;  %v1654_v43 = vadd.f32 1e-10, %v1475_v25  ;;  %v1655_v3 = vadd.f32 1e-10, %v1482_v16  ;;  %vm1536_vm1 = vcmp.eq.f32.partialorder %v4598_v50, 0.0 }
 0x148   : > { %v3416_v23 = vpop.eup %3415  ;;  %1789 = vrot.lane.b32.xlu1 %v1720_v30, %s3549_s26  ;;  %1791 = vrot.lane.b32.xlu0 %v1721_v45, %s3549_s26  ;;  %v3196_v30 = vpop.f32.mrf.mxu0  ;;  %v1486_v45 = vsel %vm1485_vm8, %v4436_v60, %v1484_v32 }
 0x149   : > { %v4619_v49 = vpop.f32.mrf.mxu1  ;;  %v4629_v56 = vpop.eup %3417  ;;  %v1491_v63 = vmul.f32 %v3416_v23, %v4467_v29  ;;  %3435 = vrcp.f32 %v1654_v43 }
 0x14a   : > { %5324 = vst [vmem:[#allocation41_spill] sm:$0xff] %v4619_v49  ;;  %v3420_v20 = vpop.eup %3419  ;;  %v4642_v37 = vpop.f32.mrf.mxu0  ;;  %v1722_v23 = vmul.f32 %v4629_v56, %v4629_v56  ;;  %3437 = vrsqrt.f32 %v4580_v55  ;;  %vm1541_vm8 = vcmp.eq.f32.partialorder %v4619_v49, inf }
 0x14b   : > { %v3149_v22 = vpop.f32.mrf.mxu1  ;;  %v3422_v52 = vpop.eup %3421  ;;  %5326 = vst [vmem:[#allocation43_spill] sm:$0xff] %v4642_v37  ;;  %v1912_v30 = vmul.f32 %v3420_v20, %v4270_v21  ;;  %3439 = vrcp.f32 %v1655_v3 }
 0x14c   : > { %v1488_v22 = vand.u32 2147483648, %v4436_v60  ;;  %1823 = vrot.lane.b32.xlu1 %v1737_v61, %s3549_s26  ;;  %1795 = vrot.lane.b32.xlu0 %v1723_v13, %s3549_s26  ;;  %v3197_v61 = vpop.f32.mrf.mxu0  ;;  %v3424_v39 = vpop.eup %3423  ;;  %v1493_v13 = vsel %vm1492_vm10, %v4467_v29, %v1491_v63  ;;  %v1498_v59 = vmul.f32 %v3422_v52, %v4496_v31  ;;  %v1495_v60 = vand.u32 2147483648, %v4467_v29 }
 0x14d   : > { %v4636_v19 = vpop.f32.mrf.mxu1  ;;  %v3426_v16 = vpop.eup %3425  ;;  %3441 = vrsqrt.f32 %v4598_v50 }
 0x14e   : > { %5325 = vst [vmem:[#allocation42_spill] sm:$0xff] %v4636_v19  ;;  %v1489_v25 = vsel %vm1487_vm9, %v1488_v22, %v1486_v45  ;;  %v4659_v63 = vpop.f32.mrf.mxu0  ;;  %v4661_v52 = vpop.eup %3427  ;;  %v1496_v43 = vsel %vm1494_vm11, %v1495_v60, %v1493_v13  ;;  %v2115_v22 = vmul.f32 %v3420_v20, %v3420_v20  ;;  %vm1543_vm9 = vcmp.eq.f32.partialorder %v4619_v49, 0.0 }
 0x14f   : > { %v3152_v32 = vpop.f32.mrf.mxu1  ;;  %v1656_v45 = vadd.f32 1e-10, %v1489_v25  ;;  %v3430_v61 = vpop.eup %3429  ;;  %v1657_v20 = vadd.f32 1e-10, %v1496_v43  ;;  %v1724_v13 = vmul.f32 %v4661_v52, %v4661_v52  ;;  %vm1548_vm10 = vcmp.eq.f32.partialorder %v4636_v19, inf }
 0x150   : > { %1793 = vrot.lane.b32.xlu1 %v1722_v23, %s3549_s26  ;;  %1970 = vrot.lane.b32.xlu0 %v1912_v30, %s3549_s26  ;;  %v2116_v32 = vmul.f32 %v3424_v39, %v3424_v39  ;;  %v1500_v23 = vsel %vm1499_vm12, %v4496_v31, %v1498_v59  ;;  %v1505_v30 = vmul.f32 %v3426_v16, %v4522_v1  ;;  %v3200_v25 = vpop.f32.mrf.mxu0  ;;  %v3432_v29 = vpop.eup %3431  ;;  %vm1550_vm11 = vcmp.eq.f32.partialorder %v4636_v19, 0.0 }
 0x151   : > { %v4651_v37 = vpop.f32.mrf.mxu1  ;;  %v1503_v3 = vsel %vm1501_vm13, %v1502_v15, %v1500_v23  ;;  %v1914_v16 = vmul.f32 %v3430_v61, %v4334_v40  ;;  %3443 = vrcp.f32 %v1656_v45  ;;  %v1509_v25 = vand.u32 2147483648, %v4522_v1  ;;  %v3434_v15 = vpop.eup %3433 }
 0x152   : > { %5327 = vst [vmem:[#allocation44_spill] sm:$0xff] %v4651_v37  ;;  %v4673_v60 = vpop.f32.mrf.mxu0  ;;  %3445 = vrsqrt.f32 %v4619_v49  ;;  %v1658_v23 = vadd.f32 1e-10, %v1503_v3  ;;  %v1516_v3 = vand.u32 2147483648, %v4542_v47  ;;  %vm1555_vm12 = vcmp.eq.f32.partialorder %v4651_v37, inf }
 0x153   : > { %v3153_v21 = vpop.f32.mrf.mxu1  ;;  %3447 = vrcp.f32 %v1657_v20 }
 0x154   : > { %2173 = vrot.lane.b32.xlu1 %v2115_v22, %s3549_s26  ;;  %2175 = vrot.lane.b32.xlu0 %v2116_v32, %s3549_s26  ;;  %v1507_v21 = vsel %vm1506_vm14, %v4522_v1, %v1505_v30  ;;  %v1512_v22 = vmul.f32 %v3432_v29, %v4542_v47  ;;  %v3201_v43 = vpop.f32.mrf.mxu0  ;;  %v1913_v30 = vmul.f32 %v3424_v39, %v4295_v28  ;;  %3449 = vrsqrt.f32 %v4636_v19 }
 0x155   : > { %v4665_v38 = vpop.f32.mrf.mxu1  ;;  %v1510_v29 = vsel %vm1508_vm15, %v1509_v25, %v1507_v21  ;;  %v1519_v1 = vmul.f32 %v3434_v15, %v4562_v7  ;;  %3451 = vrcp.f32 %v1658_v23  ;;  %vm1557_vm14 = vcmp.eq.f32.partialorder %v4651_v37, 0.0 }
 0x156   : > { %5328 = vst [vmem:[#allocation45_spill] sm:$0xff] %v4665_v38  ;;  %v4688_v45 = vpop.f32.mrf.mxu0  ;;  %v3436_v43 = vpop.eup %3435  ;;  %v1659_v28 = vadd.f32 1e-10, %v1510_v29  ;;  %3453 = vrsqrt.f32 %v4651_v37  ;;  %vm1562_vm13 = vcmp.eq.f32.partialorder %v4665_v38, inf  ;;  %vm1564_vm15 = vcmp.eq.f32.partialorder %v4665_v38, 0.0 }
 0x157   : > { %v3156_v59 = vpop.f32.mrf.mxu1  ;;  %v3438_v21 = vpop.eup %3437  ;;  %v1521_v29 = vsel %vm1520_vm3, %v4562_v7, %v1519_v1  ;;  %3455 = vrsqrt.f32 %v4665_v38 }
 0x158   : > { %1797 = vrot.lane.b32.xlu1 %v1724_v13, %s3549_s26  ;;  %1974 = vrot.lane.b32.xlu0 %v1914_v16, %s3549_s26  ;;  %v2117_v59 = vmul.f32 %v3430_v61, %v3430_v61  ;;  %v1514_v13 = vsel %vm1513_vm0, %v4542_v47, %v1512_v22  ;;  %v3204_v31 = vpop.f32.mrf.mxu0  ;;  %v2118_v22 = vmul.f32 %v3436_v43, %v3436_v43  ;;  %v3440_v25 = vpop.eup %3439  ;;  %3457 = vrcp.f32 %v1659_v28 }
 0x159   : > { %v4680_v32 = vpop.f32.mrf.mxu1  ;;  %v1517_v20 = vsel %vm1515_vm2, %v1516_v3, %v1514_v13  ;;  %v1915_v31 = vmul.f32 %v3436_v43, %v4399_v36  ;;  %v1916_v3 = vmul.f32 %v3440_v25, %v4407_v46  ;;  %v2119_v1 = vmul.f32 %v3440_v25, %v3440_v25 }
 0x15a   : > { %5329 = vst [vmem:[#allocation46_spill] sm:$0xff] %v4680_v32  ;;  %v4700_v61 = vpop.f32.mrf.mxu0  ;;  %v3442_v36 = vpop.eup %3441  ;;  %v1660_v23 = vadd.f32 1e-10, %v1517_v20  ;;  %v1530_v46 = vand.u32 2147483648, %v4580_v55  ;;  %vm1569_vm0 = vcmp.eq.f32.partialorder %v4680_v32, inf  ;;  %vm1571_vm3 = vcmp.eq.f32.partialorder %v4680_v32, 0.0 }
 0x15b   : > { %v3157_v40 = vpop.f32.mrf.mxu1 }
 0x15c   : > { %1972 = vrot.lane.b32.xlu1 %v1913_v30, %s3549_s26  ;;  %2177 = vrot.lane.b32.xlu0 %v2117_v59, %s3549_s26  ;;  %v3205_v40 = vpop.f32.mrf.mxu0  ;;  %v1526_v30 = vmul.f32 %v3438_v21, %v4580_v55  ;;  %v1523_v59 = vand.u32 2147483648, %v4562_v7  ;;  %3459 = vrcp.f32 %v1660_v23 }
 0x15d   : > { %v4692_v16 = vpop.f32.mrf.mxu1  ;;  %v1533_v40 = vmul.f32 %v3442_v36, %v4598_v50  ;;  %3461 = vrsqrt.f32 %v4680_v32 }
 0x15e   : > { %5330 = vst [vmem:[#allocation47_spill] sm:$0xff] %v4692_v16  ;;  %v4713_v13 = vpop.f32.mrf.mxu0  ;;  %v3444_v21 = vpop.eup %3443  ;;  %v1528_v20 = vsel %vm1527_vm5, %v4580_v55, %v1526_v30  ;;  %3463 = vrsqrt.f32 %v4692_v16  ;;  %vm1576_vm2 = vcmp.eq.f32.partialorder %v4692_v16, inf }
 0x15f   : > { %v3160_v39 = vpop.f32.mrf.mxu1  ;;  %v1531_v7 = vsel %vm1529_vm6, %v1530_v46, %v1528_v20  ;;  %v1535_v23 = vsel %vm1534_vm7, %v4598_v50, %v1533_v40 }
 0x160   : > { %1976 = vrot.lane.b32.xlu1 %v1915_v31, %s3549_s26  ;;  %2179 = vrot.lane.b32.xlu0 %v2118_v22, %s3549_s26  ;;  %v1524_v39 = vsel %vm1522_vm4, %v1523_v59, %v1521_v29  ;;  %v3208_v22 = vpop.f32.mrf.mxu0  ;;  %v1917_v59 = vmul.f32 %v3444_v21, %v4469_v11  ;;  %v1662_v20 = vadd.f32 1e-10, %v1531_v7  ;;  %v1544_v7 = vand.u32 2147483648, %v4619_v49 }
 0x161   : > { %v4705_v15 = vpop.f32.mrf.mxu1  ;;  %v1661_v29 = vadd.f32 1e-10, %v1524_v39  ;;  %v2120_v22 = vmul.f32 %v3444_v21, %v3444_v21  ;;  %v1537_v21 = vand.u32 2147483648, %v4598_v50  ;;  %vm1578_vm4 = vcmp.eq.f32.partialorder %v4692_v16, 0.0 }
 0x162   : > { %5331 = vst [vmem:[#allocation48_spill] sm:$0xff] %v4705_v15  ;;  %v4725_v25 = vpop.f32.mrf.mxu0  ;;  %vm1583_vm5 = vcmp.eq.f32.partialorder %v4705_v15, inf  ;;  %vm1585_vm7 = vcmp.eq.f32.partialorder %v4705_v15, 0.0 }
 0x163   : > { %v3161_v43 = vpop.f32.mrf.mxu1  ;;  %3465 = vrcp.f32 %v1661_v29 }
 0x164   : > { %1978 = vrot.lane.b32.xlu1 %v1916_v3, %s3549_s26  ;;  %2181 = vrot.lane.b32.xlu0 %v2119_v1, %s3549_s26  ;;  %v3446_v43 = vpop.eup %3445  ;;  %v3209_v3 = vpop.f32.mrf.mxu0  ;;  %3467 = vrcp.f32 %v1662_v20 }
 0x165   : > { %v4718_v31 = vpop.f32.mrf.mxu1  ;;  %v3448_v30 = vpop.eup %3447  ;;  %v1540_v1 = vmul.f32 %v3446_v43, %v4619_v49  ;;  %v1538_v3 = vsel %vm1536_vm1, %v1537_v21, %v1535_v23  ;;  %3469 = vrsqrt.f32 %v4705_v15 }
 0x166   : > { %5332 = vst [vmem:[#allocation49_spill] sm:$0xff] %v4718_v31  ;;  %v3450_v11 = vpop.eup %3449  ;;  %v1918_v46 = vmul.f32 %v3448_v30, %v4477_v26  ;;  %v1663_v23 = vadd.f32 1e-10, %v1538_v3  ;;  %3471 = vrsqrt.f32 %v4718_v31  ;;  %vm1590_vm6 = vcmp.eq.f32.partialorder %v4718_v31, inf }
 0x167   : > { %v3164_v28 = vpop.f32.mrf.mxu1  ;;  %v3452_v40 = vpop.eup %3451  ;;  %v1542_v55 = vsel %vm1541_vm8, %v4619_v49, %v1540_v1  ;;  %v1547_v47 = vmul.f32 %v3450_v11, %v4636_v19  ;;  %v1558_v49 = vand.u32 2147483648, %v4651_v37  ;;  %vm1592_vm1 = vcmp.eq.f32.partialorder %v4718_v31, 0.0 }
 0x168   : > { %1980 = vrot.lane.b32.xlu1 %v1917_v59, %s3549_s26  ;;  %2183 = vrot.lane.b32.xlu0 %v2120_v22, %s3549_s26  ;;  %v2121_v28 = vmul.f32 %v3448_v30, %v3448_v30  ;;  %v4744_v59 = vpop.f32.mrf.mxu0  ;;  %v3454_v22 = vpop.eup %3453  ;;  %v1919_v21 = vmul.f32 %v3452_v40, %v4511_v18  ;;  %v1545_v1 = vsel %vm1543_vm9, %v1544_v7, %v1542_v55  ;;  %v1551_v55 = vand.u32 2147483648, %v4636_v19 }
 0x169   : > { %v4731_v36 = vpop.f32.mrf.mxu1  ;;  %v3456_v26 = vpop.eup %3455  ;;  %v1554_v11 = vmul.f32 %v3454_v22, %v4651_v37  ;;  %v1664_v22 = vadd.f32 1e-10, %v1545_v1  ;;  %3473 = vrcp.f32 %v1663_v23 }
 0x16a   : > { %5333 = vst [vmem:[#allocation50_spill] sm:$0xff] %v4731_v36  ;;  %v3212_v30 = vpop.f32.mrf.mxu0  ;;  %v3458_v50 = vpop.eup %3457  ;;  %v1561_v3 = vmul.f32 %v3456_v26, %v4665_v38  ;;  %vm1597_vm8 = vcmp.eq.f32.partialorder %v4731_v36, inf }
 0x16b   : > { %v3165_v39 = vpop.f32.mrf.mxu1  ;;  %v2123_v7 = vmul.f32 %v3458_v50, %v3458_v50  ;;  %v1556_v30 = vsel %vm1555_vm12, %v4651_v37, %v1554_v11  ;;  %3475 = vrcp.f32 %v1664_v22 }
 0x16c   : > { %1982 = vrot.lane.b32.xlu1 %v1918_v46, %s3549_s26  ;;  %2185 = vrot.lane.b32.xlu0 %v2121_v28, %s3549_s26  ;;  %v2122_v39 = vmul.f32 %v3452_v40, %v3452_v40  ;;  %v4758_v28 = vpop.f32.mrf.mxu0  ;;  %v3460_v40 = vpop.eup %3459  ;;  %3477 = vrsqrt.f32 %v4731_v36 }
 0x16d   : > { %v4742_v43 = vpop.f32.mrf.mxu1  ;;  %v1921_v23 = vmul.f32 %v3460_v40, %v4557_v14 }
 0x16e   : > { %5334 = vst [vmem:[#allocation51_spill] sm:$0xff] %v4742_v43  ;;  %v3213_v20 = vpop.f32.mrf.mxu0  ;;  %3479 = vrsqrt.f32 %v4742_v43  ;;  %vm1604_vm9 = vcmp.eq.f32.partialorder %v4742_v43, inf }
 0x16f   : > { %v3168_v29 = vpop.f32.mrf.mxu1  ;;  %v2124_v20 = vmul.f32 %v3460_v40, %v3460_v40 }
 0x170   : > { %v1549_v29 = vsel %vm1548_vm10, %v4636_v19, %v1547_v47  ;;  %1984 = vrot.lane.b32.xlu1 %v1919_v21, %s3549_s26  ;;  %2187 = vrot.lane.b32.xlu0 %v2122_v39, %s3549_s26  ;;  %v1920_v47 = vmul.f32 %v3458_v50, %v4515_v53  ;;  %v4773_v39 = vpop.f32.mrf.mxu0  ;;  %v3462_v19 = vpop.eup %3461  ;;  %v1565_v50 = vand.u32 2147483648, %v4665_v38  ;;  %vm1599_vm10 = vcmp.eq.f32.partialorder %v4731_v36, 0.0 }
 0x171   : > { %v4756_v46 = vpop.f32.mrf.mxu1  ;;  %v1552_v26 = vsel %vm1550_vm11, %v1551_v55, %v1549_v29  ;;  %5337 = vst [vmem:[#allocation54_spill] sm:$0xff] %v4773_v39  ;;  %v3464_v53 = vpop.eup %3463  ;;  %v1559_v55 = vsel %vm1557_vm14, %v1558_v49, %v1556_v30  ;;  %vm1606_vm11 = vcmp.eq.f32.partialorder %v4742_v43, 0.0 }
 0x172   : > { %5335 = vst [vmem:[#allocation52_spill] sm:$0xff] %v4756_v46  ;;  %v3216_v11 = vpop.f32.mrf.mxu0  ;;  %v1665_v29 = vadd.f32 1e-10, %v1552_v26  ;;  %v1666_v14 = vadd.f32 1e-10, %v1559_v55  ;;  %vm1611_vm12 = vcmp.eq.f32.partialorder %v4756_v46, inf }
 0x173   : > { %v3169_v18 = vpop.f32.mrf.mxu1  ;;  %vm1613_vm14 = vcmp.eq.f32.partialorder %v4756_v46, 0.0 }
 0x174   : > { %v1563_v18 = vsel %vm1562_vm13, %v4665_v38, %v1561_v3  ;;  %1986 = vrot.lane.b32.xlu1 %v1920_v47, %s3549_s26  ;;  %2189 = vrot.lane.b32.xlu0 %v2123_v7, %s3549_s26  ;;  %v3466_v3 = vpop.eup %3465  ;;  %v1568_v47 = vmul.f32 %v3462_v19, %v4680_v32  ;;  %v4787_v37 = vpop.f32.mrf.mxu0  ;;  %v1575_v38 = vmul.f32 %v3464_v53, %v4692_v16  ;;  %3481 = vrcp.f32 %v1665_v29 }
 0x175   : > { %v4771_v21 = vpop.f32.mrf.mxu1  ;;  %v1566_v39 = vsel %vm1564_vm15, %v1565_v50, %v1563_v18  ;;  %v1922_v22 = vmul.f32 %v3466_v3, %v4552_v9  ;;  %v2125_v26 = vmul.f32 %v3466_v3, %v3466_v3  ;;  %v3468_v30 = vpop.eup %3467  ;;  %3483 = vrcp.f32 %v1666_v14 }
 0x176   : > { %5336 = vst [vmem:[#allocation53_spill] sm:$0xff] %v4771_v21  ;;  %v3217_v40 = vpop.f32.mrf.mxu0  ;;  %v1667_v19 = vadd.f32 1e-10, %v1566_v39  ;;  %v1570_v18 = vsel %vm1569_vm0, %v4680_v32, %v1568_v47  ;;  %v1577_v11 = vsel %vm1576_vm2, %v4692_v16, %v1575_v38  ;;  %v1579_v39 = vand.u32 2147483648, %v4692_v16 }
 0x177   : > { %v3172_v1 = vpop.f32.mrf.mxu1  ;;  %v1923_v3 = vmul.f32 %v3468_v30, %v4593_v10  ;;  %v2126_v47 = vmul.f32 %v3468_v30, %v3468_v30  ;;  %vm1618_vm13 = vcmp.eq.f32.partialorder %v4771_v21, inf  ;;  %vm1620_vm15 = vcmp.eq.f32.partialorder %v4771_v21, 0.0 }
 0x178   : > { %1988 = vrot.lane.b32.xlu1 %v1921_v23, %s3549_s26  ;;  %2191 = vrot.lane.b32.xlu0 %v2124_v20, %s3549_s26  ;;  %v4799_v50 = vpop.f32.mrf.mxu0  ;;  %v3470_v23 = vpop.eup %3469  ;;  %v1572_v1 = vand.u32 2147483648, %v4680_v32  ;;  %3485 = vrcp.f32 %v1667_v19 }
 0x179   : > { %v4785_v7 = vpop.f32.mrf.mxu1  ;;  %v3472_v9 = vpop.eup %3471  ;;  %v1582_v40 = vmul.f32 %v3470_v23, %v4705_v15  ;;  %3487 = vrsqrt.f32 %v4756_v46 }
 0x17a   : > { %5338 = vst [vmem:[#allocation55_spill] sm:$0xff] %v4785_v7  ;;  %v3220_v55 = vpop.f32.mrf.mxu0  ;;  %v1573_v20 = vsel %vm1571_vm3, %v1572_v1, %v1570_v18  ;;  %v3474_v38 = vpop.eup %3473  ;;  %v1589_v16 = vmul.f32 %v3472_v9, %v4718_v31  ;;  %3489 = vrsqrt.f32 %v4771_v21  ;;  %vm1625_vm0 = vcmp.eq.f32.partialorder %v4785_v7, inf }
 0x17b   : > { %v3173_v49 = vpop.f32.mrf.mxu1  ;;  %v1668_v10 = vadd.f32 1e-10, %v1573_v20  ;;  %v1924_v18 = vmul.f32 %v3474_v38, %v4589_v34  ;;  %v2127_v23 = vmul.f32 %v3474_v38, %v3474_v38  ;;  %v3476_v1 = vpop.eup %3475  ;;  %v1586_v55 = vand.u32 2147483648, %v4705_v15 }
 0x17c   : > { %1990 = vrot.lane.b32.xlu1 %v1922_v22, %s3549_s26  ;;  %2193 = vrot.lane.b32.xlu0 %v2125_v26, %s3549_s26  ;;  %v1580_v49 = vsel %vm1578_vm4, %v1579_v39, %v1577_v11  ;;  %v4813_v26 = vpop.f32.mrf.mxu0  ;;  %v1584_v11 = vsel %vm1583_vm5, %v4705_v15, %v1582_v40  ;;  %v1591_v20 = vsel %vm1590_vm6, %v4718_v31, %v1589_v16  ;;  %vm1627_vm3 = vcmp.eq.f32.partialorder %v4785_v7, 0.0 }
 0x17d   : > { %v4797_v53 = vpop.f32.mrf.mxu1  ;;  %v1669_v30 = vadd.f32 1e-10, %v1580_v49  ;;  %3491 = vrcp.f32 %v1668_v10  ;;  %v1587_v49 = vsel %vm1585_vm7, %v1586_v55, %v1584_v11  ;;  %v1925_v40 = vmul.f32 %v3476_v1, %v4629_v56 }
 0x17e   : > { %5339 = vst [vmem:[#allocation56_spill] sm:$0xff] %v4797_v53  ;;  %v3221_v19 = vpop.f32.mrf.mxu0  ;;  %v1670_v56 = vadd.f32 1e-10, %v1587_v49  ;;  %vm1632_vm2 = vcmp.eq.f32.partialorder %v4797_v53, inf  ;;  %vm1634_vm4 = vcmp.eq.f32.partialorder %v4797_v53, 0.0 }
 0x17f   : > { %v3176_v29 = vpop.f32.mrf.mxu1  ;;  %3493 = vrcp.f32 %v1669_v30 }
 0x180   : > { %1992 = vrot.lane.b32.xlu1 %v1923_v3, %s3549_s26  ;;  %2195 = vrot.lane.b32.xlu0 %v2126_v47, %s3549_s26  ;;  %v4825_v39 = vpop.f32.mrf.mxu0  ;;  %v3478_v29 = vpop.eup %3477  ;;  %v1593_v3 = vand.u32 2147483648, %v4718_v31  ;;  %3495 = vrsqrt.f32 %v4785_v7 }
 0x181   : > { %v4811_v22 = vpop.f32.mrf.mxu1  ;;  %v3480_v34 = vpop.eup %3479  ;;  %3497 = vrsqrt.f32 %v4797_v53 }
 0x182   : > { %5340 = vst [vmem:[#allocation57_spill] sm:$0xff] %v4811_v22  ;;  %v3224_v38 = vpop.f32.mrf.mxu0  ;;  %v3482_v16 = vpop.eup %3481  ;;  %v1594_v19 = vsel %vm1592_vm1, %v1593_v3, %v1591_v20  ;;  %v1603_v32 = vmul.f32 %v3480_v34, %v4742_v43  ;;  %3499 = vrcp.f32 %v1670_v56  ;;  %vm1639_vm5 = vcmp.eq.f32.partialorder %v4811_v22, inf }
 0x183   : > { %v3177_v14 = vpop.f32.mrf.mxu1  ;;  %v4841_v10 = vpop.permute.xlu0 %1767  ;;  %v1926_v55 = vmul.f32 %v3482_v16, %v4608_v0  ;;  %v2129_v20 = vmul.f32 %v3482_v16, %v3482_v16  ;;  %v1607_v16 = vand.u32 2147483648, %v4742_v43  ;;  %vm1641_vm7 = vcmp.eq.f32.partialorder %v4811_v22, 0.0 }
 0x184   : > { %1994 = vrot.lane.b32.xlu1 %v1924_v18, %s3549_s26  ;;  %2197 = vrot.lane.b32.xlu0 %v2127_v23, %s3549_s26  ;;  %v2128_v14 = vmul.f32 %v3476_v1, %v3476_v1  ;;  %v1596_v18 = vmul.f32 %v3478_v29, %v4731_v36  ;;  %v4837_v15 = vpop.f32.mrf.mxu0  ;;  %v3484_v11 = vpop.eup %3483  ;;  %v1671_v29 = vadd.f32 1e-10, %v1594_v19  ;;  %v1605_v49 = vsel %vm1604_vm9, %v4742_v43, %v1603_v32 }
 0x185   : > { %v4823_v9 = vpop.f32.mrf.mxu1  ;;  %v3486_v3 = vpop.eup %3485  ;;  %v1927_v32 = vmul.f32 %v3484_v11, %v4661_v52  ;;  %vm2467_vm9 = vcmask 0  }
 0x186   : > { %5341 = vst [vmem:[#allocation58_spill] sm:$0xff] %v4823_v9  ;;  %v3225_v1 = vpop.f32.mrf.mxu0  ;;  %v1598_v34 = vsel %vm1597_vm8, %v4731_v36, %v1596_v18  ;;  %v3488_v38 = vpop.eup %3487  ;;  %3501 = vrcp.f32 %v1671_v29  ;;  %vm1646_vm6 = vcmp.eq.f32.partialorder %v4823_v9, inf  ;;  %vm1648_vm1 = vcmp.eq.f32.partialorder %v4823_v9, 0.0 }
 0x187   : > { %v3180_v47 = vpop.f32.mrf.mxu1  ;;  %v3490_v0 = vpop.eup %3489  ;;  %v1608_v1 = vsel %vm1606_vm11, %v1607_v16, %v1605_v49  ;;  %3503 = vrsqrt.f32 %v4811_v22  ;;  %vm2438_vm8 = vcmask 7168  }
 0x188   : > { %1996 = vrot.lane.b32.xlu1 %v1925_v40, %s3549_s26  ;;  %2199 = vrot.lane.b32.xlu0 %v2128_v14, %s3549_s26  ;;  %v4849_v47 = vpop.f32.mrf.mxu0  ;;  %v1600_v40 = vand.u32 2147483648, %v4731_v36  ;;  %v4853_v14 = vpop.permute.xlu1 %1799  ;;  %v1617_v36 = vmul.f32 %v3490_v0, %v4771_v21  ;;  %3505 = vrsqrt.f32 %v4823_v9 }
 0x189   : > { %v885_v23 = vpop.f32.mrf.mxu1  ;;  %v4856_v19 = vpop.permute.xlu0 %1769 }
 0x18a   : > { %v3228_v18 = vpop.f32.mrf.mxu0  ;;  %v1601_v23 = vsel %vm1599_vm10, %v1600_v40, %v1598_v34  ;;  %v3492_v29 = vpop.eup %3491  ;;  %v1673_v34 = vadd.f32 1e-10, %v1608_v1  ;;  %v2131_v40 = vmul.f32 %v3486_v3, %v3486_v3 }
 0x18b   : > { %v3181_v30 = vpop.f32.mrf.mxu1 }
 0x18c   : > { %1998 = vrot.lane.b32.xlu1 %v1926_v55, %s3549_s26  ;;  %2201 = vrot.lane.b32.xlu0 %v2129_v20, %s3549_s26  ;;  %v1928_v30 = vmul.f32 %v3486_v3, %v4258_v5  ;;  %v1610_v55 = vmul.f32 %v3488_v38, %v4756_v46  ;;  %v4866_v20 = vpop.f32.mrf.mxu0  ;;  %v1672_v5 = vadd.f32 1e-10, %v1601_v23  ;;  %v2130_v38 = vmul.f32 %v3484_v11, %v3484_v11  ;;  %v3494_v49 = vpop.eup %3493 }
 0x18d   : > { %5342 = vst [vmem:[#allocation59_spill] sm:$0xff] %v4866_v20  ;;  %v3496_v18 = vpop.eup %3495  ;;  %v1621_v11 = vand.u32 2147483648, %v4771_v21 }
 0x18e   : > { %v3229_v52 = vpop.f32.mrf.mxu0  ;;  %v1612_v0 = vsel %vm1611_vm12, %v4756_v46, %v1610_v55  ;;  %v3498_v23 = vpop.eup %3497  ;;  %3507 = vrcp.f32 %v1672_v5  ;;  %v1624_v31 = vmul.f32 %v3496_v18, %v4785_v7  ;;  %v2133_v18 = vmul.f32 %v3494_v49, %v3494_v49 }
 0x18f   : > { %v4870_v43 = vpop.permute.xlu0 %1801  ;;  %3509 = vrcp.f32 %v1673_v34  ;;  %v1631_v20 = vmul.f32 %v3498_v23, %v4797_v53  ;;  %v2132_v34 = vmul.f32 %v3492_v29, %v3492_v29 }
 0x190   : > { %2000 = vrot.lane.b32.xlu1 %v1927_v32, %s3549_s26  ;;  %2002 = vrot.lane.b32.xlu0 %v1928_v30, %s3549_s26  ;;  %v4879_v16 = vpop.f32.mrf.mxu0  ;;  %v1614_v32 = vand.u32 2147483648, %v4756_v46  ;;  %v1619_v30 = vsel %vm1618_vm13, %v4771_v21, %v1617_v36  ;;  %v1929_v36 = vmul.f32 %v3492_v29, %v4325_v42 }
 0x191   : > { %v4872_v56 = vpop.permute.xlu1 %1771 }
 0x192   : > { %v3232_v1 = vpop.f32.mrf.mxu0  ;;  %v1615_v55 = vsel %vm1613_vm14, %v1614_v32, %v1612_v0 }
 0x193   : > { %v1674_v5 = vadd.f32 1e-10, %v1615_v55  ;;  %v3500_v1 = vpop.eup %3499  ;;  %v1628_v55 = vand.u32 2147483648, %v4785_v7 }
 0x194   : > { %2203 = vrot.lane.b32.xlu1 %v2130_v38, %s3549_s26  ;;  %2205 = vrot.lane.b32.xlu0 %v2131_v40, %s3549_s26  ;;  %v1930_v38 = vmul.f32 %v3494_v49, %v4385_v51  ;;  %v1622_v40 = vsel %vm1620_vm15, %v1621_v11, %v1619_v30  ;;  %v4895_v46 = vpop.f32.mrf.mxu0  ;;  %v3502_v30 = vpop.eup %3501  ;;  %v1626_v11 = vsel %vm1625_vm0, %v4785_v7, %v1624_v31  ;;  %v1635_v31 = vand.u32 2147483648, %v4797_v53 }
 0x195   : > { %v4888_v3 = vpop.permute.xlu0 %1805  ;;  %5343 = vst [vmem:[#allocation60_spill] sm:$0xff] %v4895_v46  ;;  %v1675_v42 = vadd.f32 1e-10, %v1622_v40  ;;  %3511 = vrcp.f32 %v1674_v5 }
 0x196   : > { %v4890_v52 = vpop.permute.xlu1 %1803  ;;  %v3233_v32 = vpop.f32.mrf.mxu0 }
 0x197   : > { %v1629_v32 = vsel %vm1627_vm3, %v1628_v55, %v1626_v11  ;;  %3513 = vrcp.f32 %v1675_v42  ;;  %v2134_v42 = vmul.f32 %v3500_v1, %v3500_v1 }
 0x198   : > { %2004 = vrot.lane.b32.xlu1 %v1929_v36, %s3549_s26  ;;  %2006 = vrot.lane.b32.xlu0 %v1930_v38, %s3549_s26  ;;  %v4907_v23 = vpop.f32.mrf.mxu0  ;;  %v3504_v36 = vpop.eup %3503  ;;  %v1633_v38 = vsel %vm1632_vm2, %v4797_v53, %v1631_v20  ;;  %v1931_v20 = vmul.f32 %v3500_v1, %v4377_v27  ;;  %v1676_v5 = vadd.f32 1e-10, %v1629_v32  ;;  %v1649_v1 = vand.u32 2147483648, %v4823_v9 }
 0x199   : > { %v4900_v0 = vpop.permute.xlu0 %1775  ;;  %5344 = vst [vmem:[#allocation61_spill] sm:$0xff] %v4907_v23  ;;  %v3506_v40 = vpop.eup %3505  ;;  %v1638_v46 = vmul.f32 %v3504_v36, %v4811_v22  ;;  %v2135_v36 = vmul.f32 %v3502_v30, %v3502_v30 }
 0x19a   : > { %v4903_v51 = vpop.permute.xlu1 %1773  ;;  %v3236_v49 = vpop.f32.mrf.mxu0  ;;  %v1645_v23 = vmul.f32 %v3506_v40, %v4823_v9  ;;  %v1642_v40 = vand.u32 2147483648, %v4811_v22  ;;  %3515 = vrcp.f32 %v1676_v5 }
 0x19b   : > { %v3508_v55 = vpop.eup %3507 }
 0x19c   : > { %2207 = vrot.lane.b32.xlu1 %v2132_v34, %s3549_s26  ;;  %2209 = vrot.lane.b32.xlu0 %v2133_v18, %s3549_s26  ;;  %v1932_v34 = vmul.f32 %v3502_v30, %v4427_v62  ;;  %v1636_v18 = vsel %vm1634_vm4, %v1635_v31, %v1633_v38  ;;  %v4923_v7 = vpop.f32.mrf.mxu0  ;;  %v3510_v38 = vpop.eup %3509  ;;  %v1640_v31 = vsel %vm1639_vm5, %v4811_v22, %v1638_v46 }
 0x19d   : > { %v4916_v29 = vpop.permute.xlu0 %1809  ;;  %v1677_v49 = vadd.f32 1e-10, %v1636_v18  ;;  %v1647_v32 = vsel %vm1646_vm6, %v4823_v9, %v1645_v23  ;;  %v1643_v46 = vsel %vm1641_vm7, %v1642_v40, %v1640_v31  ;;  %v1933_v23 = vmul.f32 %v3508_v55, %v4440_v2 }
 0x19e   : > { %v4918_v21 = vpop.permute.xlu1 %1807  ;;  %v3237_v11 = vpop.f32.mrf.mxu0  ;;  %v1934_v18 = vmul.f32 %v3510_v38, %v4487_v4  ;;  %v2136_v53 = vmul.f32 %v3508_v55, %v3508_v55  ;;  %v2137_v2 = vmul.f32 %v3510_v38, %v3510_v38 }
 0x19f   : > { %3517 = vrcp.f32 %v1677_v49  ;;  %v1650_v11 = vsel %vm1648_vm1, %v1649_v1, %v1647_v32 }
 0x1a0   : > { %2008 = vrot.lane.b32.xlu1 %v1931_v20, %s3549_s26  ;;  %2010 = vrot.lane.b32.xlu0 %v1932_v34, %s3549_s26  ;;  %v4939_v20 = vpop.f32.mrf.mxu0  ;;  %v1679_v31 = vadd.f32 1e-10, %v1650_v11 }
 0x1a2   : > { %v4929_v27 = vpop.permute.xlu1 %1777  ;;  %v4931_v62 = vpop.permute.xlu0 %1779 }
 0x1a3   : > { %v3512_v5 = vpop.eup %3511 }
 0x1a4   : > { %2211 = vrot.lane.b32.xlu1 %v2134_v42, %s3549_s26  ;;  %2213 = vrot.lane.b32.xlu0 %v2135_v36, %s3549_s26  ;;  %v3240_v42 = vpop.f32.mrf.mxu0  ;;  %v1678_v36 = vadd.f32 1e-10, %v1643_v46  ;;  %v1935_v46 = vmul.f32 %v3512_v5, %v4498_v8 }
 0x1a5   : > { %v2138_v42 = vmul.f32 %v3512_v5, %v3512_v5 }
 0x1a6   : > { %v4944_v30 = vpop.permute.xlu1 %1811  ;;  %v4946_v34 = vpop.permute.xlu0 %1813  ;;  %3519 = vrcp.f32 %v1678_v36 }
 0x1a7   : > { %5345 = vst [vmem:[#allocation62_spill] sm:$0xff] %v4946_v34  ;;  %v4952_v22 = vpop.f32.mrf.mxu0  ;;  %v3514_v34 = vpop.eup %3513  ;;  %3521 = vrcp.f32 %v1679_v31 }
 0x1a8   : > { %2012 = vrot.lane.b32.xlu1 %v1933_v23, %s3549_s26  ;;  %2014 = vrot.lane.b32.xlu0 %v1934_v18, %s3549_s26  ;;  %5346 = vst [vmem:[#allocation63_spill] sm:$0xff] %v4952_v22  ;;  %v1936_v23 = vmul.f32 %v3514_v34, %v4537_v33  ;;  %v3516_v38 = vpop.eup %3515  ;;  %v2139_v36 = vmul.f32 %v3514_v34, %v3514_v34 }
 0x1a9   : > { %v3241_v4 = vpop.f32.mrf.mxu0  ;;  %v1937_v31 = vmul.f32 %v3516_v38, %v4533_v6 }
 0x1aa   : > { %v4954_v40 = vpop.permute.xlu1 %1781  ;;  %v4956_v9 = vpop.permute.xlu0 %1783 }
 0x1ab   : > { %v4960_v49 = vpop.f32.mrf.mxu0 }
 0x1ac   : > { %2215 = vrot.lane.b32.xlu1 %v2136_v53, %s3549_s26  ;;  %2217 = vrot.lane.b32.xlu0 %v2137_v2, %s3549_s26  ;;  %5347 = vst [vmem:[#allocation64_spill] sm:$0xff] %v4960_v49  ;;  %v3518_v2 = vpop.eup %3517 }
 0x1ad   : > { %v3244_v55 = vpop.f32.mrf.mxu0 }
 0x1ae   : > { %v4962_v32 = vpop.permute.xlu1 %1815  ;;  %v4964_v1 = vpop.permute.xlu0 %1817  ;;  %v2140_v55 = vmul.f32 %v3516_v38, %v3516_v38 }
 0x1af   : > { %5348 = vst [vmem:[#allocation65_spill] sm:$0xff] %v4964_v1  ;;  %v4970_v53 = vpop.f32.mrf.mxu0 }
 0x1b0   : > { %2016 = vrot.lane.b32.xlu1 %v1935_v46, %s3549_s26  ;;  %2018 = vrot.lane.b32.xlu0 %v1936_v23, %s3549_s26  ;;  %5349 = vst [vmem:[#allocation66_spill] sm:$0xff] %v4970_v53  ;;  %v1938_v46 = vmul.f32 %v3518_v2, %v4577_v57 }
 0x1b1   : > { %v3245_v4 = vpop.f32.mrf.mxu0 }
 0x1b2   : > { %v4972_v18 = vpop.permute.xlu1 %1785  ;;  %v4974_v11 = vpop.permute.xlu0 %1787 }
 0x1b3   : > { %v3520_v5 = vpop.eup %3519 }
 0x1b4   : > { %2219 = vrot.lane.b32.xlu1 %v2138_v42, %s3549_s26  ;;  %2221 = vrot.lane.b32.xlu0 %v2139_v36, %s3549_s26  ;;  %v2141_v42 = vmul.f32 %v3518_v2, %v3518_v2  ;;  %v3522_v36 = vpop.eup %3521  ;;  %v1939_v6 = vmul.f32 %v3520_v5, %v4570_v48  ;;  %v2142_v2 = vmul.f32 %v3520_v5, %v3520_v5 }
 0x1b6   : > { %v4978_v8 = vpop.permute.xlu1 %1819  ;;  %v4980_v33 = vpop.permute.xlu0 %1821 }
 0x1b7   : > { %5350 = vst [vmem:[#allocation67_spill] sm:$0xff] %v4978_v8  ;;  %5351 = vst [vmem:[#allocation68_spill] sm:$0xff] %v4980_v33  ;;  %v2143_v33 = vmul.f32 %v3522_v36, %v3522_v36 }
 0x1b8   : > { %2020 = vrot.lane.b32.xlu1 %v1937_v31, %s3549_s26  ;;  %2022 = vrot.lane.b32.xlu0 %v1938_v46, %s3549_s26  ;;  %v1940_v31 = vmul.f32 %v3522_v36, %v4614_v35  ;;  %v1883_v46 = vmul.f32 2.0, %v4587_v12 }
 0x1ba   : > { %v4986_v34 = vpop.permute.xlu1 %1789  ;;  %v4988_v23 = vpop.permute.xlu0 %1791 }
 0x1bc   : > { %2223 = vrot.lane.b32.xlu1 %v2140_v55, %s3549_s26  ;;  %2225 = vrot.lane.b32.xlu0 %v2141_v42, %s3549_s26  ;;  %v1854_v42 = vmul.f32 %v4841_v10, %v4054_v44  ;;  %v1856_v10 = vmul.f32 %v4872_v56, %v4069_v41 }
 0x1be   : > { %v4992_v4 = vpop.permute.xlu1 %1823  ;;  %v4995_v57 = vpop.permute.xlu0 %1795 }
 0x1bf   : > { %5352 = vst [vmem:[#allocation69_spill] sm:$0xff] %v4992_v4 }
 0x1c0   : > { %2024 = vrot.lane.b32.xlu1 %v1939_v6, %s3549_s26  ;;  %2026 = vrot.lane.b32.xlu0 %v1940_v31, %s3549_s26  ;;  %v1885_v31 = vmul.f32 2.0, %v4626_v24 }
 0x1c2   : > { %v5001_v38 = vpop.permute.xlu1 %1793  ;;  %v1971_v55 = vpop.permute.xlu0 %1970 }
 0x1c3   : > { %v2057_v4 = vmul.f32 %v1971_v55, %v1883_v46 }
 0x1c4   : > { %2227 = vrot.lane.b32.xlu1 %v2142_v2, %s3549_s26  ;;  %2229 = vrot.lane.b32.xlu0 %v2143_v33, %s3549_s26  ;;  %v1884_v33 = vmul.f32 2.0, %v4605_v17  ;;  %v5353_v2 = vld [vmem:[#allocation30_spill] sm:$0xff] }
 0x1c5   : > { %v2086_v48 = vsub.f32 %v1854_v42, %v2057_v4  ;;  %v5354_v42 = vld [vmem:[#allocation29_spill] sm:$0xff]  ;;  %v5356_v17 = vld [vmem:[#allocation6_spill] sm:$0xff] }
 0x1c6   : > { %v2174_v35 = vpop.permute.xlu1 %2173  ;;  %v2176_v12 = vpop.permute.xlu0 %2175  ;;  %v1857_v1 = vmul.f32 %v4903_v51, %v5356_v17  ;;  %v1888_v51 = vmul.f32 2.0, %v4673_v60  ;;  %v5362_v60 = vld [vmem:[#allocation12_spill] sm:$0xff] }
 0x1c7   : > { %v2260_v6 = vmul.f32 %v2174_v35, %v4280_v58  ;;  %v1855_v58 = vmul.f32 %v4856_v19, %v4065_v54  ;;  %v5355_v35 = vld [vmem:[#allocation43_spill] sm:$0xff] }
 0x1c8   : > { %v5357_v54 = vld [vmem:[#allocation31_spill] sm:$0xff] }
 0x1c9   : > { %v2289_v53 = vadd.f32 %v2260_v6, %v2086_v48  ;;  %v2261_v48 = vmul.f32 %v2176_v12, %v5354_v42  ;;  %v1886_v6 = vmul.f32 2.0, %v5355_v35  ;;  %v5361_v35 = vld [vmem:[#allocation33_spill] sm:$0xff] }
 0x1ca   : > { %v5009_v8 = vpop.permute.xlu1 %1797  ;;  %v1975_v5 = vpop.permute.xlu0 %1974 }
 0x1cb   : > { %2351 = vrot.lane.b32.xlu1 %v2289_v53, %s3550_s27  ;;  %v2059_v44 = vmul.f32 %v1975_v5, %v1885_v31  ;;  %v1887_v5 = vmul.f32 2.0, %v4659_v63 }
 0x1cd   : > { %v2088_v46 = vsub.f32 %v1856_v10, %v2059_v44 }
 0x1ce   : > { %v1973_v36 = vpop.permute.xlu1 %1972  ;;  %v2178_v4 = vpop.permute.xlu0 %2177 }
 0x1cf   : > { %v2058_v24 = vmul.f32 %v1973_v36, %v1884_v33  ;;  %v2262_v55 = vmul.f32 %v2178_v4, %v5353_v2  ;;  %v5358_v33 = vld [vmem:[#allocation8_spill] sm:$0xff]  ;;  %v1889_v2 = vmul.f32 2.0, %v4688_v45  ;;  %v5363_v45 = vld [vmem:[#allocation34_spill] sm:$0xff] }
 0x1d0   : > { %v1858_v36 = vmul.f32 %v4900_v0, %v5358_v33 }
 0x1d1   : > { %v2087_v53 = vsub.f32 %v1855_v58, %v2058_v24  ;;  %v2291_v31 = vadd.f32 %v2262_v55, %v2088_v46  ;;  %v5359_v58 = vld [vmem:[#allocation32_spill] sm:$0xff] }
 0x1d2   : > { %v1977_v41 = vpop.permute.xlu1 %1976  ;;  %v2180_v56 = vpop.permute.xlu0 %2179 }
 0x1d3   : > { %v2060_v22 = vmul.f32 %v1977_v41, %v1886_v6  ;;  %v2290_v49 = vadd.f32 %v2261_v48, %v2087_v53  ;;  %v2263_v19 = vmul.f32 %v2180_v56, %v5357_v54  ;;  %2355 = vrot.lane.b32.xlu1 %v2291_v31, %s3550_s27  ;;  %v1890_v54 = vmul.f32 2.0, %v4700_v61  ;;  %v5366_v61 = vld [vmem:[#allocation16_spill] sm:$0xff] }
 0x1d5   : > { %v2089_v44 = vsub.f32 %v1857_v1, %v2060_v22  ;;  %2353 = vrot.lane.b32.xlu0 %v2290_v49, %s3550_s27  ;;  %v5360_v1 = vld [vmem:[#allocation10_spill] sm:$0xff] }
 0x1d6   : > { %v1979_v12 = vpop.permute.xlu1 %1978  ;;  %v2182_v10 = vpop.permute.xlu0 %2181  ;;  %v1859_v49 = vmul.f32 %v4929_v27, %v5360_v1  ;;  %v1891_v27 = vmul.f32 2.0, %v4713_v13  ;;  %v5367_v13 = vld [vmem:[#allocation36_spill] sm:$0xff]  ;;  %v1892_v1 = vmul.f32 2.0, %v4725_v25 }
 0x1d7   : > { %v2292_v63 = vadd.f32 %v2263_v19, %v2089_v44  ;;  %v2061_v4 = vmul.f32 %v1979_v12, %v1887_v5  ;;  %v2264_v46 = vmul.f32 %v2182_v10, %v5359_v58  ;;  %v1860_v5 = vmul.f32 %v4931_v62, %v5362_v60  ;;  %v5364_v10 = vld [vmem:[#allocation14_spill] sm:$0xff] }
 0x1d8   : > { %v1861_v33 = vmul.f32 %v4954_v40, %v5364_v10 }
 0x1d9   : > { %v2090_v24 = vsub.f32 %v1858_v36, %v2061_v4  ;;  %2357 = vrot.lane.b32.xlu0 %v2292_v63, %s3550_s27  ;;  %v5365_v4 = vld [vmem:[#allocation35_spill] sm:$0xff] }
 0x1da   : > { %v1981_v55 = vpop.permute.xlu1 %1980  ;;  %v2184_v22 = vpop.permute.xlu0 %2183 }
 0x1db   : > { %v2293_v42 = vadd.f32 %v2264_v46, %v2090_v24  ;;  %v2062_v48 = vmul.f32 %v1981_v55, %v1888_v51  ;;  %v2265_v0 = vmul.f32 %v2184_v22, %v5361_v35  ;;  %v1862_v24 = vmul.f32 %v4956_v9, %v5366_v61 }
 0x1dd   : > { %v2091_v6 = vsub.f32 %v1859_v49, %v2062_v48  ;;  %2359 = vrot.lane.b32.xlu1 %v2293_v42, %s3550_s27  ;;  %v1893_v42 = vmul.f32 2.0, %v4744_v59 }
 0x1de   : > { %v1983_v53 = vpop.permute.xlu1 %1982  ;;  %v2186_v31 = vpop.permute.xlu0 %2185 }
 0x1df   : > { %v2294_v41 = vadd.f32 %v2265_v0, %v2091_v6  ;;  %v2063_v56 = vmul.f32 %v1983_v53, %v1889_v2  ;;  %v2266_v17 = vmul.f32 %v2186_v31, %v5363_v45  ;;  %v5368_v0 = vld [vmem:[#allocation18_spill] sm:$0xff]  ;;  %v5369_v31 = vld [vmem:[#allocation37_spill] sm:$0xff] }
 0x1e0   : > { %v1863_v6 = vmul.f32 %v4972_v18, %v5368_v0  ;;  %v1894_v18 = vmul.f32 2.0, %v4758_v28  ;;  %v5375_v28 = vld [vmem:[#allocation24_spill] sm:$0xff] }
 0x1e1   : > { %v2092_v19 = vsub.f32 %v1860_v5, %v2063_v56  ;;  %2361 = vrot.lane.b32.xlu0 %v2294_v41, %s3550_s27 }
 0x1e2   : > { %v1985_v44 = vpop.permute.xlu1 %1984  ;;  %v2188_v12 = vpop.permute.xlu0 %2187 }
 0x1e3   : > { %v2295_v36 = vadd.f32 %v2266_v17, %v2092_v19  ;;  %v2064_v63 = vmul.f32 %v1985_v44, %v1890_v54  ;;  %v2267_v62 = vmul.f32 %v2188_v12, %v5365_v4  ;;  %v5370_v17 = vld [vmem:[#allocation20_spill] sm:$0xff] }
 0x1e4   : > { %v1864_v54 = vmul.f32 %v4974_v11, %v5370_v17  ;;  %v5374_v11 = vld [vmem:[#allocation39_spill] sm:$0xff] }
 0x1e5   : > { %v2093_v58 = vsub.f32 %v1861_v33, %v2064_v63  ;;  %2363 = vrot.lane.b32.xlu1 %v2295_v36, %s3550_s27  ;;  %v5051_v40 = vpop.f32.mrf.mxu0  ;;  %v5372_v33 = vld [vmem:[#allocation54_spill] sm:$0xff] }
 0x1e6   : > { %v1987_v46 = vpop.permute.xlu1 %1986  ;;  %v2190_v51 = vpop.permute.xlu0 %2189  ;;  %v1895_v36 = vmul.f32 2.0, %v5372_v33 }
 0x1e7   : > { %v2296_v2 = vadd.f32 %v2267_v62, %v2093_v58  ;;  %v2065_v55 = vmul.f32 %v1987_v46, %v1891_v27  ;;  %v2268_v22 = vmul.f32 %v2190_v51, %v5367_v13  ;;  %v3248_v5 = vpop.f32.mrf.mxu0  ;;  %v5371_v27 = vld [vmem:[#allocation38_spill] sm:$0xff]  ;;  %v1866_v13 = vmul.f32 %v4988_v23, %v5375_v28 }
 0x1e8   : > { %v5373_v62 = vld [vmem:[#allocation22_spill] sm:$0xff]  ;;  %v5378_v5 = vld [vmem:[#allocation41_spill] sm:$0xff] }
 0x1e9   : > { %v2094_v49 = vsub.f32 %v1862_v24, %v2065_v55  ;;  %2365 = vrot.lane.b32.xlu0 %v2296_v2, %s3550_s27  ;;  %v1184_v25 = vpop.f32.mrf.mxu0  ;;  %v1865_v58 = vmul.f32 %v4986_v34, %v5373_v62  ;;  %v1897_v34 = vmul.f32 2.0, %v4799_v50  ;;  %v1901_v62 = vmul.f32 2.0, %v4849_v47  ;;  %v5385_v47 = vld [vmem:[#allocation4_spill] sm:$0xff] }
 0x1ea   : > { %v1989_v48 = vpop.permute.xlu1 %1988  ;;  %v2192_v35 = vpop.permute.xlu0 %2191 }
 0x1eb   : > { %v2297_v53 = vadd.f32 %v2268_v22, %v2094_v49  ;;  %v2066_v9 = vmul.f32 %v1989_v48, %v1892_v1  ;;  %v2269_v60 = vmul.f32 %v2192_v35, %v5369_v31  ;;  %v3249_v12 = vpop.f32.mrf.mxu0  ;;  %v5376_v49 = vld [vmem:[#allocation40_spill] sm:$0xff]  ;;  %v1896_v48 = vmul.f32 2.0, %v4787_v37 }
 0x1ec   : > { %v1899_v37 = vmul.f32 2.0, %v4825_v39 }
 0x1ed   : > { %v2095_v41 = vsub.f32 %v1863_v6, %v2066_v9  ;;  %2367 = vrot.lane.b32.xlu1 %v2297_v53, %s3550_s27  ;;  %v5377_v53 = vld [vmem:[#allocation26_spill] sm:$0xff] }
 0x1ee   : > { %v1991_v56 = vpop.permute.xlu1 %1990  ;;  %v2194_v45 = vpop.permute.xlu0 %2193  ;;  %v1867_v9 = vmul.f32 %v5001_v38, %v5377_v53  ;;  %v1898_v38 = vmul.f32 2.0, %v4813_v26 }
 0x1ef   : > { %v2298_v59 = vadd.f32 %v2269_v60, %v2095_v41  ;;  %v2067_v19 = vmul.f32 %v1991_v56, %v1893_v42  ;;  %v2270_v44 = vmul.f32 %v2194_v45, %v5371_v27  ;;  %v5379_v45 = vld [vmem:[#allocation27_spill] sm:$0xff] }
 0x1f0   : > { %v1868_v17 = vmul.f32 %v4995_v57, %v5379_v45  ;;  %v5391_v45 = vld [vmem:[#allocation9_spill] sm:$0xff] }
 0x1f1   : > { %v2096_v10 = vsub.f32 %v1864_v54, %v2067_v19  ;;  %2369 = vrot.lane.b32.xlu0 %v2298_v59, %s3550_s27  ;;  %v5380_v59 = vld [vmem:[#allocation42_spill] sm:$0xff] }
 0x1f2   : > { %v1993_v63 = vpop.permute.xlu1 %1992  ;;  %v2196_v4 = vpop.permute.xlu0 %2195 }
 0x1f3   : > { %v2299_v46 = vadd.f32 %v2270_v44, %v2096_v10  ;;  %v2068_v51 = vmul.f32 %v1993_v63, %v1894_v18  ;;  %v2271_v61 = vmul.f32 %v2196_v4, %v5374_v11  ;;  %v5382_v63 = vld [vmem:[#allocation28_spill] sm:$0xff] }
 0x1f4   : > { %v1869_v57 = vmul.f32 %v5009_v8, %v5382_v63 }
 0x1f5   : > { %v2097_v24 = vsub.f32 %v1865_v58, %v2068_v51  ;;  %2371 = vrot.lane.b32.xlu1 %v2299_v46, %s3550_s27  ;;  %v5383_v51 = vld [vmem:[#allocation44_spill] sm:$0xff] }
 0x1f6   : > { %v1995_v2 = vpop.permute.xlu1 %1994  ;;  %v2198_v55 = vpop.permute.xlu0 %2197 }
 0x1f7   : > { %v2300_v22 = vadd.f32 %v2271_v61, %v2097_v24  ;;  %v2069_v1 = vmul.f32 %v1995_v2, %v1895_v36  ;;  %v2272_v42 = vmul.f32 %v2198_v55, %v5376_v49  ;;  %v5381_v36 = vld [vmem:[#allocation3_spill] sm:$0xff]  ;;  %v5384_v61 = vld [vmem:[#allocation45_spill] sm:$0xff]  ;;  %v1900_v2 = vmul.f32 2.0, %v4837_v15 }
 0x1f8   : > { %v1870_v39 = vmul.f32 %v4853_v14, %v5381_v36  ;;  %v5386_v49 = vld [vmem:[#allocation5_spill] sm:$0xff] }
 0x1f9   : > { %v2098_v35 = vsub.f32 %v1866_v13, %v2069_v1  ;;  %2373 = vrot.lane.b32.xlu0 %v2300_v22, %s3550_s27  ;;  %v1871_v1 = vmul.f32 %v4870_v43, %v5385_v47 }
 0x1fa   : > { %v1997_v0 = vpop.permute.xlu1 %1996  ;;  %v2200_v6 = vpop.permute.xlu0 %2199 }
 0x1fb   : > { %v2301_v31 = vadd.f32 %v2272_v42, %v2098_v35  ;;  %v2070_v60 = vmul.f32 %v1997_v0, %v1896_v48  ;;  %v2273_v23 = vmul.f32 %v2200_v6, %v5378_v5  ;;  %v1872_v42 = vmul.f32 %v4890_v52, %v5386_v49  ;;  %v5387_v6 = vld [vmem:[#allocation46_spill] sm:$0xff] }
 0x1fc   : > { %v1903_v35 = vmul.f32 2.0, %v4879_v16  ;;  %v5390_v16 = vld [vmem:[#allocation7_spill] sm:$0xff] }
 0x1fd   : > { %v2099_v41 = vsub.f32 %v1867_v9, %v2070_v60  ;;  %2375 = vrot.lane.b32.xlu1 %v2301_v31, %s3550_s27  ;;  %v5388_v9 = vld [vmem:[#allocation47_spill] sm:$0xff] }
 0x1fe   : > { %v1999_v25 = vpop.permute.xlu1 %1998  ;;  %v2202_v56 = vpop.permute.xlu0 %2201  ;;  %v5389_v60 = vld [vmem:[#allocation59_spill] sm:$0xff] }
 0x1ff   : > { %v2302_v50 = vadd.f32 %v2273_v23, %v2099_v41  ;;  %v2071_v54 = vmul.f32 %v1999_v25, %v1897_v34  ;;  %v2274_v19 = vmul.f32 %v2202_v56, %v5380_v59  ;;  %v1902_v5 = vmul.f32 2.0, %v5389_v60 }
 0x200   : > { %v1873_v56 = vmul.f32 %v4888_v3, %v5390_v16  ;;  %v5408_v16 = vld [vmem:[#allocation65_spill] sm:$0xff] }
 0x201   : > { %v2100_v27 = vsub.f32 %v1868_v17, %v2071_v54  ;;  %2377 = vrot.lane.b32.xlu0 %v2302_v50, %s3550_s27  ;;  %v1874_v17 = vmul.f32 %v4918_v21, %v5391_v45  ;;  %v5392_v54 = vld [vmem:[#allocation61_spill] sm:$0xff] }
 0x202   : > { %v2001_v44 = vpop.permute.xlu1 %2000  ;;  %v2003_v12 = vpop.permute.xlu0 %2002  ;;  %v1905_v59 = vmul.f32 2.0, %v5392_v54 }
 0x203   : > { %v2303_v18 = vadd.f32 %v2274_v19, %v2100_v27  ;;  %v2072_v10 = vmul.f32 %v2001_v44, %v1898_v38  ;;  %v2073_v33 = vmul.f32 %v2003_v12, %v1899_v37  ;;  %v5393_v44 = vld [vmem:[#allocation48_spill] sm:$0xff] }
 0x205   : > { %2379 = vrot.lane.b32.xlu1 %v2303_v18, %s3550_s27  ;;  %v2101_v58 = vsub.f32 %v1869_v57, %v2072_v10  ;;  %v2102_v46 = vsub.f32 %v1870_v39, %v2073_v33  ;;  %v5394_v18 = vld [vmem:[#allocation49_spill] sm:$0xff]  ;;  %v5395_v33 = vld [vmem:[#allocation60_spill] sm:$0xff] }
 0x206   : > { %v2204_v4 = vpop.permute.xlu1 %2203  ;;  %v2206_v26 = vpop.permute.xlu0 %2205  ;;  %v1904_v36 = vmul.f32 2.0, %v5395_v33  ;;  %v1911_v33 = vmul.f32 2.0, %v5051_v40 }
 0x207   : > { %v2275_v11 = vmul.f32 %v2204_v4, %v5383_v51  ;;  %v2276_v24 = vmul.f32 %v2206_v26, %v5384_v61 }
 0x209   : > { %v2304_v55 = vadd.f32 %v2275_v11, %v2101_v58  ;;  %v2305_v28 = vadd.f32 %v2276_v24, %v2102_v46  ;;  %v5397_v58 = vld [vmem:[#allocation13_spill] sm:$0xff]  ;;  %v1907_v11 = vmul.f32 2.0, %v4939_v20  ;;  %v5400_v20 = vld [vmem:[#allocation15_spill] sm:$0xff] }
 0x20a   : > { %v2005_v14 = vpop.permute.xlu1 %2004  ;;  %v2007_v13 = vpop.permute.xlu0 %2006  ;;  %v1876_v46 = vmul.f32 %v4944_v30, %v5397_v58 }
 0x20b   : > { %v2074_v22 = vmul.f32 %v2005_v14, %v1900_v2  ;;  %2381 = vrot.lane.b32.xlu0 %v2304_v55, %s3550_s27  ;;  %v2075_v8 = vmul.f32 %v2007_v13, %v1901_v62  ;;  %2383 = vrot.lane.b32.xlu1 %v2305_v28, %s3550_s27  ;;  %v5396_v62 = vld [vmem:[#allocation11_spill] sm:$0xff]  ;;  %v5398_v55 = vld [vmem:[#allocation50_spill] sm:$0xff] }
 0x20c   : > { %v1875_v26 = vmul.f32 %v4916_v29, %v5396_v62  ;;  %v5399_v14 = vld [vmem:[#allocation51_spill] sm:$0xff]  ;;  %v5415_v62 = vld [vmem:[#allocation68_spill] sm:$0xff] }
 0x20d   : > { %v2103_v34 = vsub.f32 %v1871_v1, %v2074_v22  ;;  %v2104_v0 = vsub.f32 %v1872_v42, %v2075_v8  ;;  %v1906_v22 = vmul.f32 2.0, %v4923_v7  ;;  %v5401_v42 = vld [vmem:[#allocation62_spill] sm:$0xff] }
 0x20e   : > { %v2208_v48 = vpop.permute.xlu1 %2207  ;;  %v2210_v15 = vpop.permute.xlu0 %2209 }
 0x20f   : > { %v2277_v53 = vmul.f32 %v2208_v48, %v5387_v6  ;;  %v2278_v31 = vmul.f32 %v2210_v15, %v5388_v9  ;;  %v1877_v48 = vmul.f32 %v5401_v42, %v5400_v20 }
 0x211   : > { %v2306_v23 = vadd.f32 %v2277_v53, %v2103_v34  ;;  %v2307_v41 = vadd.f32 %v2278_v31, %v2104_v0  ;;  %v5403_v0 = vld [vmem:[#allocation64_spill] sm:$0xff] }
 0x212   : > { %v2009_v25 = vpop.permute.xlu1 %2008  ;;  %v2011_v37 = vpop.permute.xlu0 %2010  ;;  %v1909_v6 = vmul.f32 2.0, %v5403_v0  ;;  %v5404_v31 = vld [vmem:[#allocation52_spill] sm:$0xff] }
 0x213   : > { %v2076_v43 = vmul.f32 %v2009_v25, %v1902_v5  ;;  %2385 = vrot.lane.b32.xlu0 %v2306_v23, %s3550_s27  ;;  %v2077_v52 = vmul.f32 %v2011_v37, %v1903_v35  ;;  %2387 = vrot.lane.b32.xlu1 %v2307_v41, %s3550_s27  ;;  %v5402_v35 = vld [vmem:[#allocation17_spill] sm:$0xff]  ;;  %v5406_v41 = vld [vmem:[#allocation63_spill] sm:$0xff] }
 0x214   : > { %v1878_v15 = vmul.f32 %v4962_v32, %v5402_v35  ;;  %v5405_v5 = vld [vmem:[#allocation53_spill] sm:$0xff]  ;;  %v1908_v25 = vmul.f32 2.0, %v5406_v41 }
 0x215   : > { %v2105_v38 = vsub.f32 %v1873_v56, %v2076_v43  ;;  %v2106_v27 = vsub.f32 %v1874_v17, %v2077_v52  ;;  %v5407_v52 = vld [vmem:[#allocation19_spill] sm:$0xff]  ;;  %v5409_v32 = vld [vmem:[#allocation21_spill] sm:$0xff] }
 0x216   : > { %v2212_v50 = vpop.permute.xlu1 %2211  ;;  %v2214_v19 = vpop.permute.xlu0 %2213  ;;  %v1879_v56 = vmul.f32 %v5408_v16, %v5407_v52 }
 0x217   : > { %v2279_v12 = vmul.f32 %v2212_v50, %v5393_v44  ;;  %v2280_v10 = vmul.f32 %v2214_v19, %v5394_v18  ;;  %v5410_v50 = vld [vmem:[#allocation67_spill] sm:$0xff] }
 0x218   : > { %v1880_v54 = vmul.f32 %v5410_v50, %v5409_v32  ;;  %v5411_v18 = vld [vmem:[#allocation55_spill] sm:$0xff] }
 0x219   : > { %v2308_v39 = vadd.f32 %v2279_v12, %v2105_v38  ;;  %v2309_v63 = vadd.f32 %v2280_v10, %v2106_v27 }
 0x21a   : > { %v2013_v57 = vpop.permute.xlu1 %2012  ;;  %v2015_v4 = vpop.permute.xlu0 %2014 }
 0x21b   : > { %v2078_v3 = vmul.f32 %v2013_v57, %v1904_v36  ;;  %2389 = vrot.lane.b32.xlu0 %v2308_v39, %s3550_s27  ;;  %v2079_v21 = vmul.f32 %v2015_v4, %v1905_v59  ;;  %2391 = vrot.lane.b32.xlu1 %v2309_v63, %s3550_s27  ;;  %v5412_v36 = vld [vmem:[#allocation56_spill] sm:$0xff]  ;;  %v5413_v63 = vld [vmem:[#allocation66_spill] sm:$0xff] }
 0x21c   : > { %v1910_v57 = vmul.f32 2.0, %v5413_v63 }
 0x21d   : > { %v2107_v24 = vsub.f32 %v1875_v26, %v2078_v3  ;;  %v2108_v2 = vsub.f32 %v1876_v46, %v2079_v21  ;;  %v5414_v21 = vld [vmem:[#allocation23_spill] sm:$0xff] }
 0x21e   : > { %v2216_v51 = vpop.permute.xlu1 %2215  ;;  %v2218_v61 = vpop.permute.xlu0 %2217  ;;  %v1881_v26 = vmul.f32 %v5415_v62, %v5414_v21 }
 0x21f   : > { %v2281_v28 = vmul.f32 %v2216_v51, %v5398_v55  ;;  %v2282_v13 = vmul.f32 %v2218_v61, %v5399_v14  ;;  %v5416_v51 = vld [vmem:[#allocation25_spill] sm:$0xff] }
 0x221   : > { %v2310_v8 = vadd.f32 %v2281_v28, %v2107_v24  ;;  %v2311_v47 = vadd.f32 %v2282_v13, %v2108_v2  ;;  %v5418_v13 = vld [vmem:[#allocation57_spill] sm:$0xff] }
 0x222   : > { %v2017_v1 = vpop.permute.xlu1 %2016  ;;  %v2019_v49 = vpop.permute.xlu0 %2018 }
 0x223   : > { %v2080_v29 = vmul.f32 %v2017_v1, %v1906_v22  ;;  %2393 = vrot.lane.b32.xlu0 %v2310_v8, %s3550_s27  ;;  %v2081_v30 = vmul.f32 %v2019_v49, %v1907_v11  ;;  %2395 = vrot.lane.b32.xlu1 %v2311_v47, %s3550_s27  ;;  %v5417_v11 = vld [vmem:[#allocation69_spill] sm:$0xff]  ;;  %v5419_v8 = vld [vmem:[#allocation58_spill] sm:$0xff] }
 0x224   : > { %v1882_v61 = vmul.f32 %v5417_v11, %v5416_v51 }
 0x225   : > { %v2109_v53 = vsub.f32 %v1877_v48, %v2080_v29  ;;  %v2110_v9 = vsub.f32 %v1878_v15, %v2081_v30 }
 0x226   : > { %v2220_v34 = vpop.permute.xlu1 %2219  ;;  %v2222_v7 = vpop.permute.xlu0 %2221 }
 0x227   : > { %v2283_v60 = vmul.f32 %v2220_v34, %v5404_v31  ;;  %v2284_v23 = vmul.f32 %v2222_v7, %v5405_v5 }
 0x229   : > { %v2312_v37 = vadd.f32 %v2283_v60, %v2109_v53  ;;  %v2313_v43 = vadd.f32 %v2284_v23, %v2110_v9 }
 0x22a   : > { %v2021_v45 = vpop.permute.xlu1 %2020  ;;  %v2023_v17 = vpop.permute.xlu0 %2022 }
 0x22b   : > { %v2082_v59 = vmul.f32 %v2021_v45, %v1908_v25  ;;  %2397 = vrot.lane.b32.xlu0 %v2312_v37, %s3550_s27  ;;  %v2083_v19 = vmul.f32 %v2023_v17, %v1909_v6  ;;  %2399 = vrot.lane.b32.xlu1 %v2313_v43, %s3550_s27 }
 0x22d   : > { %v2111_v38 = vsub.f32 %v1879_v56, %v2082_v59  ;;  %v2112_v27 = vsub.f32 %v1880_v54, %v2083_v19 }
 0x22e   : > { %v2224_v44 = vpop.permute.xlu1 %2223  ;;  %v2226_v12 = vpop.permute.xlu0 %2225 }
 0x22f   : > { %v2285_v10 = vmul.f32 %v2224_v44, %v5411_v18  ;;  %v2286_v39 = vmul.f32 %v2226_v12, %v5412_v36 }
 0x231   : > { %v2314_v4 = vadd.f32 %v2285_v10, %v2111_v38  ;;  %v2315_v3 = vadd.f32 %v2286_v39, %v2112_v27 }
 0x232   : > { %v2025_v58 = vpop.permute.xlu1 %2024  ;;  %v2027_v46 = vpop.permute.xlu0 %2026 }
 0x233   : > { %v2084_v24 = vmul.f32 %v2025_v58, %v1910_v57  ;;  %2401 = vrot.lane.b32.xlu0 %v2314_v4, %s3550_s27  ;;  %v2085_v2 = vmul.f32 %v2027_v46, %v1911_v33  ;;  %2403 = vrot.lane.b32.xlu1 %v2315_v3, %s3550_s27 }
 0x235   : > { %v2113_v40 = vsub.f32 %v1881_v26, %v2084_v24  ;;  %v2114_v55 = vsub.f32 %v1882_v61, %v2085_v2 }
 0x236   : > { %v2228_v28 = vpop.permute.xlu1 %2227  ;;  %v2230_v14 = vpop.permute.xlu0 %2229 }
 0x237   : > { %v2287_v22 = vmul.f32 %v2228_v28, %v5418_v13  ;;  %v2288_v47 = vmul.f32 %v2230_v14, %v5419_v8 }
 0x239   : > { %v2316_v1 = vadd.f32 %v2287_v22, %v2113_v40  ;;  %v2317_v49 = vadd.f32 %v2288_v47, %v2114_v55 }
 0x23b   : > { %2405 = vrot.lane.b32.xlu0 %v2316_v1, %s3550_s27  ;;  %2407 = vrot.lane.b32.xlu1 %v2317_v49, %s3550_s27 }
 0x23d   : > { %v2352_v29 = vpop.permute.xlu1 %2351 }
 0x23e   : > { %2439 = vst.msk [vmem:[#allocation2] sm:$0xff] %vm2438_vm8, %v2352_v29 }
 0x245   : > { %v2356_v30 = vpop.permute.xlu1 %2355  ;;  %v2681_v23 = vld [vmem:[#allocation2] sm:$0xff] }
 0x246   : > { %2441 = vst.msk [vmem:[#allocation2 + $0x10] sm:$0xff] %vm2438_vm8, %v2356_v30  ;;  %v2711_v52 = vsel %vm2438_vm8, %v2681_v23, 0.0 }
 0x247   : > { %v2354_v20 = vpop.permute.xlu0 %2353 }
 0x248   : > { %2440 = vst.msk [vmem:[#allocation2 + $0x8] sm:$0xff] %vm2438_vm8, %v2354_v20 }
 0x24b   : > { %v2358_v42 = vpop.permute.xlu0 %2357 }
 0x24c   : > { %2442 = vst.msk [vmem:[#allocation2 + $0x18] sm:$0xff] %vm2438_vm8, %v2358_v42 }
 0x24d   : > { %v2683_v43 = vld [vmem:[#allocation2 + $0x10] sm:$0xff] }
 0x24e   : > { %v2714_v45 = vsel %vm2438_vm8, %v2683_v43, 0.0 }
 0x24f   : > { %v2360_v48 = vpop.permute.xlu1 %2359  ;;  %v2682_v5 = vld [vmem:[#allocation2 + $0x8] sm:$0xff] }
 0x250   : > { %2443 = vst.msk [vmem:[#allocation2 + $0x20] sm:$0xff] %vm2438_vm8, %v2360_v48  ;;  %v2712_v37 = vsel %vm2438_vm8, %v2682_v5, 0.0 }
 0x251   : > { %v2713_v16 = vadd.f32 %v2712_v37, %v2711_v52 }
 0x253   : > { %v2362_v35 = vpop.permute.xlu0 %2361  ;;  %v2684_v56 = vld [vmem:[#allocation2 + $0x18] sm:$0xff]  ;;  %v2715_v50 = vadd.f32 %v2714_v45, %v2713_v16 }
 0x254   : > { %2444 = vst.msk [vmem:[#allocation2 + $0x28] sm:$0xff] %vm2438_vm8, %v2362_v35  ;;  %v2716_v32 = vsel %vm2438_vm8, %v2684_v56, 0.0 }
 0x255   : > { %v2717_v27 = vadd.f32 %v2716_v32, %v2715_v50 }
 0x257   : > { %v2364_v15 = vpop.permute.xlu1 %2363  ;;  %v2685_v17 = vld [vmem:[#allocation2 + $0x20] sm:$0xff] }
 0x258   : > { %2445 = vst.msk [vmem:[#allocation2 + $0x30] sm:$0xff] %vm2438_vm8, %v2364_v15  ;;  %v2718_v38 = vsel %vm2438_vm8, %v2685_v17, 0.0 }
 0x259   : > { %v2719_v18 = vadd.f32 %v2718_v38, %v2717_v27 }
 0x25b   : > { %v2366_v34 = vpop.permute.xlu0 %2365  ;;  %v2686_v54 = vld [vmem:[#allocation2 + $0x28] sm:$0xff] }
 0x25c   : > { %2446 = vst.msk [vmem:[#allocation2 + $0x38] sm:$0xff] %vm2438_vm8, %v2366_v34  ;;  %v2720_v12 = vsel %vm2438_vm8, %v2686_v54, 0.0 }
 0x25d   : > { %v2721_v36 = vadd.f32 %v2720_v12, %v2719_v18 }
 0x25f   : > { %v2368_v0 = vpop.permute.xlu1 %2367  ;;  %v2687_v44 = vld [vmem:[#allocation2 + $0x30] sm:$0xff] }
 0x260   : > { %2447 = vst.msk [vmem:[#allocation2 + $0x40] sm:$0xff] %vm2438_vm8, %v2368_v0  ;;  %v2722_v33 = vsel %vm2438_vm8, %v2687_v44, 0.0 }
 0x261   : > { %v2723_v57 = vadd.f32 %v2722_v33, %v2721_v36 }
 0x263   : > { %v2370_v6 = vpop.permute.xlu0 %2369  ;;  %v2688_v10 = vld [vmem:[#allocation2 + $0x38] sm:$0xff] }
 0x264   : > { %2448 = vst.msk [vmem:[#allocation2 + $0x48] sm:$0xff] %vm2438_vm8, %v2370_v6  ;;  %v2724_v63 = vsel %vm2438_vm8, %v2688_v10, 0.0 }
 0x265   : > { %v2725_v26 = vadd.f32 %v2724_v63, %v2723_v57 }
 0x267   : > { %v2372_v7 = vpop.permute.xlu1 %2371  ;;  %v2689_v39 = vld [vmem:[#allocation2 + $0x40] sm:$0xff] }
 0x268   : > { %2449 = vst.msk [vmem:[#allocation2 + $0x50] sm:$0xff] %vm2438_vm8, %v2372_v7  ;;  %v2726_v62 = vsel %vm2438_vm8, %v2689_v39, 0.0 }
 0x269   : > { %v2727_v51 = vadd.f32 %v2726_v62, %v2725_v26 }
 0x26b   : > { %v2374_v53 = vpop.permute.xlu0 %2373  ;;  %v2690_v4 = vld [vmem:[#allocation2 + $0x48] sm:$0xff] }
 0x26c   : > { %2450 = vst.msk [vmem:[#allocation2 + $0x58] sm:$0xff] %vm2438_vm8, %v2374_v53  ;;  %v2728_v46 = vsel %vm2438_vm8, %v2690_v4, 0.0 }
 0x26d   : > { %v2729_v24 = vadd.f32 %v2728_v46, %v2727_v51 }
 0x26f   : > { %v2376_v9 = vpop.permute.xlu1 %2375  ;;  %v2691_v58 = vld [vmem:[#allocation2 + $0x50] sm:$0xff] }
 0x270   : > { %2451 = vst.msk [vmem:[#allocation2 + $0x60] sm:$0xff] %vm2438_vm8, %v2376_v9  ;;  %v2730_v61 = vsel %vm2438_vm8, %v2691_v58, 0.0 }
 0x271   : > { %v2731_v55 = vadd.f32 %v2730_v61, %v2729_v24 }
 0x273   : > { %v2378_v31 = vpop.permute.xlu0 %2377  ;;  %v2692_v11 = vld [vmem:[#allocation2 + $0x58] sm:$0xff] }
 0x274   : > { %2452 = vst.msk [vmem:[#allocation2 + $0x68] sm:$0xff] %vm2438_vm8, %v2378_v31  ;;  %v2732_v40 = vsel %vm2438_vm8, %v2692_v11, 0.0 }
 0x275   : > { %v2733_v8 = vadd.f32 %v2732_v40, %v2731_v55 }
 0x277   : > { %v2380_v60 = vpop.permute.xlu1 %2379  ;;  %v2693_v2 = vld [vmem:[#allocation2 + $0x60] sm:$0xff] }
 0x278   : > { %2453 = vst.msk [vmem:[#allocation2 + $0x70] sm:$0xff] %vm2438_vm8, %v2380_v60  ;;  %v2734_v22 = vsel %vm2438_vm8, %v2693_v2, 0.0 }
 0x279   : > { %v2735_v49 = vadd.f32 %v2734_v22, %v2733_v8 }
 0x27b   : > { %v2694_v28 = vld [vmem:[#allocation2 + $0x68] sm:$0xff] }
 0x27c   : > { %v2736_v1 = vsel %vm2438_vm8, %v2694_v28, 0.0 }
 0x27d   : > { %v2382_v41 = vpop.permute.xlu0 %2381  ;;  %v2384_v25 = vpop.permute.xlu1 %2383  ;;  %v2737_v20 = vadd.f32 %v2736_v1, %v2735_v49 }
 0x27e   : > { %2454 = vst.msk [vmem:[#allocation2 + $0x78] sm:$0xff] %vm2438_vm8, %v2382_v41  ;;  %2455 = vst.msk [vmem:[#allocation2 + $0x80] sm:$0xff] %vm2438_vm8, %v2384_v25 }
 0x27f   : > { %v2695_v47 = vld [vmem:[#allocation2 + $0x70] sm:$0xff] }
 0x280   : > { %v2738_v30 = vsel %vm2438_vm8, %v2695_v47, 0.0 }
 0x281   : > { %v2739_v0 = vadd.f32 %v2738_v30, %v2737_v20 }
 0x285   : > { %v2386_v59 = vpop.permute.xlu0 %2385  ;;  %v2388_v19 = vpop.permute.xlu1 %2387  ;;  %v2696_v29 = vld [vmem:[#allocation2 + $0x78] sm:$0xff]  ;;  %v2697_v42 = vld [vmem:[#allocation2 + $0x80] sm:$0xff] }
 0x286   : > { %2456 = vst.msk [vmem:[#allocation2 + $0x88] sm:$0xff] %vm2438_vm8, %v2386_v59  ;;  %2457 = vst.msk [vmem:[#allocation2 + $0x90] sm:$0xff] %vm2438_vm8, %v2388_v19  ;;  %v2740_v48 = vsel %vm2438_vm8, %v2696_v29, 0.0  ;;  %v2742_v6 = vsel %vm2438_vm8, %v2697_v42, 0.0 }
 0x287   : > { %v2741_v53 = vadd.f32 %v2740_v48, %v2739_v0 }
 0x289   : > { %v2743_v60 = vadd.f32 %v2742_v6, %v2741_v53 }
 0x28d   : > { %v2390_v3 = vpop.permute.xlu0 %2389  ;;  %v2392_v21 = vpop.permute.xlu1 %2391  ;;  %v2698_v34 = vld [vmem:[#allocation2 + $0x88] sm:$0xff]  ;;  %v2699_v7 = vld [vmem:[#allocation2 + $0x90] sm:$0xff] }
 0x28e   : > { %2458 = vst.msk [vmem:[#allocation2 + $0x98] sm:$0xff] %vm2438_vm8, %v2390_v3  ;;  %2459 = vst.msk [vmem:[#allocation2 + $0xa0] sm:$0xff] %vm2438_vm8, %v2392_v21  ;;  %v2744_v9 = vsel %vm2438_vm8, %v2698_v34, 0.0  ;;  %v2746_v5 = vsel %vm2438_vm8, %v2699_v7, 0.0 }
 0x28f   : > { %v2745_v41 = vadd.f32 %v2744_v9, %v2743_v60 }
 0x291   : > { %v2747_v16 = vadd.f32 %v2746_v5, %v2745_v41 }
 0x295   : > { %v2394_v14 = vpop.permute.xlu0 %2393  ;;  %v2396_v13 = vpop.permute.xlu1 %2395  ;;  %v2700_v31 = vld [vmem:[#allocation2 + $0x98] sm:$0xff]  ;;  %v2701_v23 = vld [vmem:[#allocation2 + $0xa0] sm:$0xff] }
 0x296   : > { %2460 = vst.msk [vmem:[#allocation2 + $0xa8] sm:$0xff] %vm2438_vm8, %v2394_v14  ;;  %2461 = vst.msk [vmem:[#allocation2 + $0xb0] sm:$0xff] %vm2438_vm8, %v2396_v13  ;;  %v2748_v25 = vsel %vm2438_vm8, %v2700_v31, 0.0  ;;  %v2750_v56 = vsel %vm2438_vm8, %v2701_v23, 0.0 }
 0x297   : > { %v2749_v17 = vadd.f32 %v2748_v25, %v2747_v16 }
 0x299   : > { %v2751_v54 = vadd.f32 %v2750_v56, %v2749_v17 }
 0x29d   : > { %v2398_v35 = vpop.permute.xlu0 %2397  ;;  %v2400_v15 = vpop.permute.xlu1 %2399  ;;  %v2702_v52 = vld [vmem:[#allocation2 + $0xa8] sm:$0xff]  ;;  %v2703_v45 = vld [vmem:[#allocation2 + $0xb0] sm:$0xff] }
 0x29e   : > { %2462 = vst.msk [vmem:[#allocation2 + $0xb8] sm:$0xff] %vm2438_vm8, %v2398_v35  ;;  %2463 = vst.msk [vmem:[#allocation2 + $0xc0] sm:$0xff] %vm2438_vm8, %v2400_v15  ;;  %v2752_v32 = vsel %vm2438_vm8, %v2702_v52, 0.0  ;;  %v2754_v59 = vsel %vm2438_vm8, %v2703_v45, 0.0 }
 0x29f   : > { %v2753_v38 = vadd.f32 %v2752_v32, %v2751_v54 }
 0x2a1   : > { %v2755_v18 = vadd.f32 %v2754_v59, %v2753_v38 }
 0x2a5   : > { %v2402_v37 = vpop.permute.xlu0 %2401  ;;  %v2404_v43 = vpop.permute.xlu1 %2403  ;;  %v2704_v50 = vld [vmem:[#allocation2 + $0xb8] sm:$0xff]  ;;  %v2705_v19 = vld [vmem:[#allocation2 + $0xc0] sm:$0xff] }
 0x2a6   : > { %2464 = vst.msk [vmem:[#allocation2 + $0xc8] sm:$0xff] %vm2438_vm8, %v2402_v37  ;;  %2465 = vst.msk [vmem:[#allocation2 + $0xd0] sm:$0xff] %vm2438_vm8, %v2404_v43  ;;  %v2756_v27 = vsel %vm2438_vm8, %v2704_v50, 0.0  ;;  %v2758_v33 = vsel %vm2438_vm8, %v2705_v19, 0.0 }
 0x2a7   : > { %v2757_v39 = vadd.f32 %v2756_v27, %v2755_v18 }
 0x2a9   : > { %v2759_v57 = vadd.f32 %v2758_v33, %v2757_v39 }
 0x2ad   : > { %v2406_v44 = vpop.permute.xlu0 %2405  ;;  %v2706_v12 = vld [vmem:[#allocation2 + $0xc8] sm:$0xff]  ;;  %v2408_v10 = vpop.permute.xlu1 %2407  ;;  %v2707_v36 = vld [vmem:[#allocation2 + $0xd0] sm:$0xff] }
 0x2ae   : > { %2466 = vst.msk [vmem:[#allocation2 + $0xd8] sm:$0xff] %vm2438_vm8, %v2406_v44  ;;  %v2760_v63 = vsel %vm2438_vm8, %v2706_v12, 0.0  ;;  %v2762_v4 = vsel %vm2438_vm8, %v2707_v36, 0.0 }
 0x2af   : > { %2468 = vst.msk [vmem:[#allocation2 + $0xe0] sm:$0x1] %vm2467_vm9, %v2408_v10  ;;  %v2761_v3 = vadd.f32 %v2760_v63, %v2759_v57 }
 0x2b1   : > { %v2763_v62 = vadd.f32 %v2762_v4, %v2761_v3 }
 0x2b5   : > { %v2708_v21 = vld [vmem:[#allocation2 + $0xd8] sm:$0xff] }
 0x2b6   : > { %v2709_v26 = vld [vmem:[#allocation2 + $0xe0] sm:$0x1]  ;;  %v2764_v58 = vsel %vm2438_vm8, %v2708_v21, 0.0 }
 0x2b7   : > { %v2767_v46 = vsel %vm2467_vm9, %v2709_v26, 0.0  ;;  %v2765_v51 = vadd.f32 %v2764_v58, %v2763_v62 }
 0x2b9   : > { %v2768_v11 = vadd.f32 %v2767_v46, %v2765_v51 }
 0x2bb   : > { %v2769_v61 = vrot.slane %v2768_v11, 4 }
 0x2bd   : > { %v2770_v24 = vadd.f32 %v2769_v61, %v2768_v11 }
 0x2bf   : > { %v2771_v2 = vrot.slane %v2770_v24, 2 }
 0x2c1   : > { %v2772_v40 = vadd.f32 %v2771_v2, %v2770_v24 }
 0x2c3   : > { %v2773_v55 = vrot.slane %v2772_v40, 1 }
 0x2c5   : > { %v2774_v28 = vadd.f32 %v2773_v55, %v2772_v40 }
 0x2c7   : > { %v2775_v14 = vmul.f32 0.0044444446, %v2774_v28 }
 0x2c9   : > { %2776 = vst.msk [vmem:[%s196_s30] sm:$0x1] %vm2467_vm9, %v2775_v14 }
 0x2ca PF: > { %s12_s11 = sadd.s32 1, %s3545_s11   ;;  %s5420_s9 = smov %s3541_s10 }
 0x2cb   : > { %p9_p6 = scmp.ge.s32.totalorder %s12_s11, 4   ;;  %s5421_s10 = smov %s5423_s12 }
 0x2cd   :  { %11 = sbr.rel (!%p9_p6) target bundleno = 2 (0x2), region = 71 }

</bundles_post_ra>
